<compile_context>
chip_gen: v7x
topology: tpu7x:2x2x1
jax: 0.10.0
libtpu: 0.0.40
codegen_flags: <defaults>
</compile_context>

<pallas_src>
import functools

import jax
import jax.numpy as jnp
from jax import lax
from jax.experimental import pallas as pl
from jax.experimental.pallas import tpu as pltpu


# ============================================================================
# Fused forward kernel (one batch tile per grid step, everything in VMEM)
# ============================================================================
def _lenet5_kernel(x_ref, s1_ref, w1_ref, sh1_ref, p1_ref, g1_ref,
                   s2_ref, w2_ref, sh2_ref, p2_ref, g2_ref,
                   wfc_ref, bfc_ref, wfc1_ref, bfc1_ref, wfc2_ref, bfc2_ref,
                   out_ref, *, tb):
    # Activation layout: rows = (image-in-tile, height), lanes = width*C + c.
    f32 = jnp.float32
    dot = functools.partial(jnp.dot, preferred_element_type=f32)

    x = x_ref[...]                                           # (tb*32, 32)

    # ---- layer1: conv(1->6, 5x5) [BN scale folded] + shift + ReLU + pool ----
    acc1 = jnp.zeros((tb * 28, 28 * 6), f32)
    for i in range(5):                                       # kernel-height taps
        rows = dot(s1_ref[i], x)                             # gather rows h+i  -> (tb*28, 32)
        acc1 = acc1 + dot(rows, w1_ref[i])                   # banded width taps -> (tb*28, 168)
    a1 = jnp.maximum(acc1 + sh1_ref[...], 0.0)               # BN/bias shift + ReLU
    t1 = jnp.maximum(dot(p1_ref[0], a1), dot(p1_ref[1], a1))  # pool over H -> (tb*14, 168)
    a1p = jnp.maximum(dot(t1, g1_ref[0]), dot(t1, g1_ref[1]))  # pool over W -> (tb*14, 84)

    # ---- layer2: conv(6->16, 5x5) + shift + ReLU + pool ----
    acc2 = jnp.zeros((tb * 10, 10 * 16), f32)
    for i in range(5):
        rows = dot(s2_ref[i], a1p)                           # (tb*10, 84)
        acc2 = acc2 + dot(rows, w2_ref[i])                   # (tb*10, 160)
    a2 = jnp.maximum(acc2 + sh2_ref[...], 0.0)
    t2 = jnp.maximum(dot(p2_ref[0], a2), dot(p2_ref[1], a2))  # pool over H -> (tb*5, 160), rows h-major
    a2p = jnp.maximum(dot(t2, g2_ref[0]), dot(t2, g2_ref[1]))  # pool over W -> (tb*5, 80)

    # ---- fc -> relu -> fc1 -> relu -> fc2 (NCHW flatten folded into wfc) ----
    h = jnp.zeros((tb, 120), f32)
    for hh in range(5):                                      # contract the pooled-H rows
        h = h + dot(a2p[hh * tb:(hh + 1) * tb, :],
                    wfc_ref[pl.ds(hh * 80, 80), :])
    h = jnp.maximum(h + bfc_ref[...], 0.0)
    h = jnp.maximum(dot(h, wfc1_ref[...]) + bfc1_ref[...], 0.0)
    out = dot(h, wfc2_ref[...]) + bfc2_ref[...]
    out_ref[...] = out.astype(out_ref.dtype)


# ============================================================================
# One-time constant transforms (run outside the kernel; weights are constants)
# ============================================================================
def _fold_bn(gamma, beta, mean, var, conv_bias, eps=1e-5):
    scale = gamma / jnp.sqrt(var + eps)
    shift = beta + (conv_bias - mean) * scale
    return scale, shift


def _banded_conv_weight(w_oihw, w_in):
    """(Co,Ci,5,5) conv weight -> 5 banded GEMM mats (w_in*Ci, w_out*Co).

    B[i, win*Ci + ci, wo*Co + co] = w[co, ci, i, win - wo] for 0 <= win-wo < 5,
    so  sum_i rows_{h+i}(X) @ B[i]  is the full valid 2-D conv when X has
    rows = (image, h) and lanes = win*Ci + ci.
    """
    co, ci, kh, kw = w_oihw.shape
    w_out = w_in - kw + 1
    what = jnp.transpose(w_oihw, (2, 3, 1, 0))               # (kh, kw, ci, co)
    b = jnp.zeros((kh, w_in, w_out, ci, co), jnp.float32)
    wo = jnp.arange(w_out)
    for i in range(kh):
        for j in range(kw):
            b = b.at[i, wo + j, wo, :, :].add(what[i, j])
    b = jnp.transpose(b, (0, 1, 3, 2, 4))                    # (kh, w_in, ci, w_out, co)
    return b.reshape(kh, w_in * ci, w_out * co)


def _tap_select(tb, h_in, h_out, k=5):
    """S[i, n*h_out + ho, n*h_in + ho + i] = 1 (kernel-height row gather)."""
    s = jnp.zeros((k, tb * h_out, tb * h_in), jnp.float32)
    n = jnp.arange(tb)[:, None]
    ho = jnp.arange(h_out)[None, :]
    rows = (n * h_out + ho).reshape(-1)
    for i in range(k):
        cols = (n * h_in + ho + i).reshape(-1)
        s = s.at[i, rows, cols].set(1.0)
    return s


def _hpool_select(tb, h_in, *, h_major_out):
    """P[d, row, n*h_in + 2q + d] = 1 ; row = n*h_out+q, or q*tb+n (h-major)."""
    h_out = h_in // 2
    p = jnp.zeros((2, tb * h_out, tb * h_in), jnp.float32)
    n = jnp.arange(tb)[:, None]
    q = jnp.arange(h_out)[None, :]
    rows = (q * tb + n) if h_major_out else (n * h_out + q)
    rows = rows.reshape(-1)
    for d in range(2):
        cols = (n * h_in + 2 * q + d).reshape(-1)
        p = p.at[d, rows, cols].set(1.0)
    return p


def _wpool_select(w_in, c):
    """G[d, (2q+d)*c + ch, q*c + ch] = 1 (2x1 pooling along the lane W axis)."""
    w_out = w_in // 2
    g = jnp.zeros((2, w_in * c, w_out * c), jnp.float32)
    q = jnp.arange(w_out)[:, None]
    ch = jnp.arange(c)[None, :]
    cols = (q * c + ch).reshape(-1)
    for d in range(2):
        rows = ((2 * q + d) * c + ch).reshape(-1)
        g = g.at[d, rows, cols].set(1.0)
    return g


def prepare_params(p, *, batch_tile=8, eps=1e-5):
    """Fold BN into weights, build banded conv weights, pooling / tap
    selection matrices, and the flatten-permuted fc weight."""
    assert batch_tile % 8 == 0, "batch_tile must be a multiple of 8 (sublane tiling)"
    tb = batch_tile
    scale1, shift1 = _fold_bn(p["bn1_gamma"], p["bn1_beta"], p["bn1_mean"],
                              p["bn1_var"], p["b1"], eps)
    scale2, shift2 = _fold_bn(p["bn2_gamma"], p["bn2_beta"], p["bn2_mean"],
                              p["bn2_var"], p["b2"], eps)
    w1s = p["w1"] * scale1[:, None, None, None]              # BN scale folded in
    w2s = p["w2"] * scale2[:, None, None, None]
    num_classes = p["wfc2"].shape[0]

    kp = {
        # layer 1: 32x32x1 -> conv 28x28x6 -> pool 14x14x6
        "s1": _tap_select(tb, 32, 28),
        "w1": _banded_conv_weight(w1s, 32),                  # (5, 32, 168)
        "shift1": jnp.tile(shift1, 28).reshape(1, 28 * 6),
        "p1": _hpool_select(tb, 28, h_major_out=False),
        "g1": _wpool_select(28, 6),
        # layer 2: 14x14x6 -> conv 10x10x16 -> pool 5x5x16
        "s2": _tap_select(tb, 14, 10),
        "w2": _banded_conv_weight(w2s, 14),                  # (5, 84, 160)
        "shift2": jnp.tile(shift2, 10).reshape(1, 10 * 16),
        "p2": _hpool_select(tb, 10, h_major_out=True),
        "g2": _wpool_select(10, 16),
        # fc stack; PyTorch flatten index c*25+h*5+w is folded into a row
        # permutation of wfc so our lane layout h*80 + w*16 + c needs no
        # transpose: wfc_perm[h*80 + w*16 + c, o] = wfc[o, c*25 + h*5 + w].
        "wfc": jnp.transpose(p["wfc"].reshape(120, 16, 5, 5),
                             (2, 3, 1, 0)).reshape(400, 120),
        "bfc": p["bfc"].reshape(1, 120),
        "wfc1": p["wfc1"].T,                                 # (120, 84)
        "bfc1": p["bfc1"].reshape(1, 84),
        "wfc2": p["wfc2"].T,                                 # (84, num_classes)
        "bfc2": p["bfc2"].reshape(1, num_classes),
    }
    return jax.tree.map(lambda a: a.astype(jnp.float32), kp)


# ============================================================================
# Forward pass: one pallas_call, gridded over batch tiles
# ============================================================================
def _const_spec(arr):
    zero = (0,) * arr.ndim
    return pl.BlockSpec(arr.shape, lambda i, _z=zero: _z)


@jax.jit
def lenet5_forward(x_nchw, kp):
    """x_nchw: (N, 1, 32, 32) float32; kp: dict from prepare_params."""
    N = x_nchw.shape[0]
    assert x_nchw.shape[1:] == (1, 32, 32)
    tb = kp["p2"].shape[1] // 5            # batch tile baked into the constants
    num_classes = kp["wfc2"].shape[1]
    n_pad = pl.cdiv(N, tb) * tb

    x = x_nchw.astype(jnp.float32).reshape(N, 32, 32)
    if n_pad != N:
        x = jnp.pad(x, ((0, n_pad - N), (0, 0), (0, 0)))
    x2 = x.reshape(n_pad * 32, 32)         # rows = (image, input row), lanes = width

    const_names = ("s1", "w1", "shift1", "p1", "g1",
                   "s2", "w2", "shift2", "p2", "g2",
                   "wfc", "bfc", "wfc1", "bfc1", "wfc2", "bfc2")
    consts = [kp[k] for k in const_names]

    out = pl.pallas_call(
        functools.partial(_lenet5_kernel, tb=tb),
        out_shape=jax.ShapeDtypeStruct((n_pad, num_classes), jnp.float32),
        grid=(n_pad // tb,),
        in_specs=[pl.BlockSpec((tb * 32, 32), lambda i: (i, 0))]
                 + [_const_spec(c) for c in consts],
        out_specs=pl.BlockSpec((tb, num_classes), lambda i: (i, 0)),
        compiler_params=pltpu.CompilerParams(
            dimension_semantics=("parallel",),   # batch tiles shard across cores
            vmem_limit_bytes=32 * 1024 * 1024),
    )(x2, *consts)
    return out[:N]


# ============================================================================
# Deterministic synthetic parameters (PyTorch layouts) + pure-JAX reference
# ============================================================================
def init_params(key, num_classes=10):
    ks = jax.random.split(key, 16)
    p = {}
    p["w1"] = 0.1 * jax.random.normal(ks[0], (6, 1, 5, 5), jnp.float32)
    p["b1"] = 0.1 * jax.random.normal(ks[1], (6,), jnp.float32)
    p["bn1_gamma"] = 1.0 + 0.1 * jax.random.normal(ks[2], (6,), jnp.float32)
    p["bn1_beta"] = 0.1 * jax.random.normal(ks[3], (6,), jnp.float32)
    p["bn1_mean"] = 0.1 * jax.random.normal(ks[4], (6,), jnp.float32)
    p["bn1_var"] = jnp.abs(1.0 + 0.1 * jax.random.normal(ks[5], (6,), jnp.float32))
    p["w2"] = 0.1 * jax.random.normal(ks[6], (16, 6, 5, 5), jnp.float32)
    p["b2"] = 0.1 * jax.random.normal(ks[7], (16,), jnp.float32)
    p["bn2_gamma"] = 1.0 + 0.1 * jax.random.normal(ks[8], (16,), jnp.float32)
    p["bn2_beta"] = 0.1 * jax.random.normal(ks[9], (16,), jnp.float32)
    p["bn2_mean"] = 0.1 * jax.random.normal(ks[10], (16,), jnp.float32)
    p["bn2_var"] = jnp.abs(1.0 + 0.1 * jax.random.normal(ks[11], (16,), jnp.float32))
    p["wfc"] = 0.05 * jax.random.normal(ks[12], (120, 400), jnp.float32)
    p["bfc"] = 0.05 * jax.random.normal(ks[13], (120,), jnp.float32)
    p["wfc1"] = 0.05 * jax.random.normal(ks[14], (84, 120), jnp.float32)
    p["bfc1"] = 0.05 * jax.random.normal(ks[15], (84,), jnp.float32)
    k2a, k2b = jax.random.split(jax.random.fold_in(key, 99))
    p["wfc2"] = 0.05 * jax.random.normal(k2a, (num_classes, 84), jnp.float32)
    p["bfc2"] = 0.05 * jax.random.normal(k2b, (num_classes,), jnp.float32)
    return p


def lenet5_reference(x_nchw, p, eps=1e-5):
    """Pure-JAX/XLA reference of the PyTorch module (BatchNorm in eval mode)."""
    def conv(x, w, b):
        y = lax.conv_general_dilated(x, w, (1, 1), "VALID",
                                     dimension_numbers=("NCHW", "OIHW", "NCHW"))
        return y + b.reshape(1, -1, 1, 1)

    def bn(x, g, bta, m, v):
        g, bta, m, v = (t.reshape(1, -1, 1, 1) for t in (g, bta, m, v))
        return (x - m) / jnp.sqrt(v + eps) * g + bta

    def pool(x):
        return lax.reduce_window(x, jnp.array(-jnp.inf, x.dtype), lax.max,
                                 (1, 1, 2, 2), (1, 1, 2, 2), "VALID")

    y = pool(jnp.maximum(bn(conv(x_nchw, p["w1"], p["b1"]), p["bn1_gamma"],
                            p["bn1_beta"], p["bn1_mean"], p["bn1_var"]), 0.0))
    y = pool(jnp.maximum(bn(conv(y, p["w2"], p["b2"]), p["bn2_gamma"],
                            p["bn2_beta"], p["bn2_mean"], p["bn2_var"]), 0.0))
    f = y.reshape(y.shape[0], -1)
    f = jnp.maximum(f @ p["wfc"].T + p["bfc"], 0.0)
    f = jnp.maximum(f @ p["wfc1"].T + p["bfc1"], 0.0)
    return f @ p["wfc2"].T + p["bfc2"]


if __name__ == "__main__":
    num_classes = 10
    key = jax.random.PRNGKey(0)
    k_in, k_param = jax.random.split(key)

    # LeNet-5 requires 32x32 single-channel input so that 16*5*5 = 400 feeds fc.
    x = jax.random.normal(k_in, (2, 1, 32, 32), jnp.float32)   # NCHW, batch=2
    params = init_params(k_param, num_classes)
    kparams = prepare_params(params, batch_tile=8)             # one-time const prep

    logits = lenet5_forward(x, kparams)
    jax.block_until_ready(logits)
    assert logits.shape == (2, num_classes)
    assert logits.dtype == jnp.float32

    # Self-check against the pure-JAX reference (loose tol: MXU default
    # precision rounds f32 operands to bf16 per pass).
    ref = lenet5_reference(x, params)
    assert jnp.allclose(logits, ref, atol=2e-2, rtol=2e-2), (
        "Pallas kernel disagrees with the reference forward pass")
    print("KERNEL_OK")
</pallas_src>

<mosaic_0001>
module attributes {stable_mosaic.version = 11 : i64} {
  func.func @_lenet5_kernel(%arg0: i32, %arg1: memref<256x32xf32, #tpu.memory_space<vmem>>, %arg2: memref<5x224x256xf32, #tpu.memory_space<vmem>>, %arg3: memref<5x32x168xf32, #tpu.memory_space<vmem>>, %arg4: memref<1x168xf32, #tpu.memory_space<vmem>>, %arg5: memref<2x112x224xf32, #tpu.memory_space<vmem>>, %arg6: memref<2x168x84xf32, #tpu.memory_space<vmem>>, %arg7: memref<5x80x112xf32, #tpu.memory_space<vmem>>, %arg8: memref<5x84x160xf32, #tpu.memory_space<vmem>>, %arg9: memref<1x160xf32, #tpu.memory_space<vmem>>, %arg10: memref<2x40x80xf32, #tpu.memory_space<vmem>>, %arg11: memref<2x160x80xf32, #tpu.memory_space<vmem>>, %arg12: memref<400x120xf32, #tpu.memory_space<vmem>>, %arg13: memref<1x120xf32, #tpu.memory_space<vmem>>, %arg14: memref<120x84xf32, #tpu.memory_space<vmem>>, %arg15: memref<1x84xf32, #tpu.memory_space<vmem>>, %arg16: memref<84x10xf32, #tpu.memory_space<vmem>>, %arg17: memref<1x10xf32, #tpu.memory_space<vmem>>, %arg18: memref<8x10xf32, #tpu.memory_space<vmem>>) attributes {dimension_semantics = [#tpu.dimension_semantics<parallel>], iteration_bounds = array<i64: 1>, scalar_prefetch = 0 : i64, scratch_operands = 0 : i64, tpu.core_type = #tpu.core_type<tc>, window_params = [{transform_indices = @transform_0, window_bounds = array<i64: 256, 32>}, {pipeline_mode = #tpu.pipeline_mode<synchronous>, transform_indices = @transform_1, window_bounds = array<i64: 5, 224, 256>}, {pipeline_mode = #tpu.pipeline_mode<synchronous>, transform_indices = @transform_2, window_bounds = array<i64: 5, 32, 168>}, {pipeline_mode = #tpu.pipeline_mode<synchronous>, transform_indices = @transform_3, window_bounds = array<i64: 1, 168>}, {pipeline_mode = #tpu.pipeline_mode<synchronous>, transform_indices = @transform_4, window_bounds = array<i64: 2, 112, 224>}, {pipeline_mode = #tpu.pipeline_mode<synchronous>, transform_indices = @transform_5, window_bounds = array<i64: 2, 168, 84>}, {pipeline_mode = #tpu.pipeline_mode<synchronous>, transform_indices = @transform_6, window_bounds = array<i64: 5, 80, 112>}, {pipeline_mode = #tpu.pipeline_mode<synchronous>, transform_indices = @transform_7, window_bounds = array<i64: 5, 84, 160>}, {pipeline_mode = #tpu.pipeline_mode<synchronous>, transform_indices = @transform_8, window_bounds = array<i64: 1, 160>}, {pipeline_mode = #tpu.pipeline_mode<synchronous>, transform_indices = @transform_9, window_bounds = array<i64: 2, 40, 80>}, {pipeline_mode = #tpu.pipeline_mode<synchronous>, transform_indices = @transform_10, window_bounds = array<i64: 2, 160, 80>}, {pipeline_mode = #tpu.pipeline_mode<synchronous>, transform_indices = @transform_11, window_bounds = array<i64: 400, 120>}, {pipeline_mode = #tpu.pipeline_mode<synchronous>, transform_indices = @transform_12, window_bounds = array<i64: 1, 120>}, {pipeline_mode = #tpu.pipeline_mode<synchronous>, transform_indices = @transform_13, window_bounds = array<i64: 120, 84>}, {pipeline_mode = #tpu.pipeline_mode<synchronous>, transform_indices = @transform_14, window_bounds = array<i64: 1, 84>}, {pipeline_mode = #tpu.pipeline_mode<synchronous>, transform_indices = @transform_15, window_bounds = array<i64: 84, 10>}, {pipeline_mode = #tpu.pipeline_mode<synchronous>, transform_indices = @transform_16, window_bounds = array<i64: 1, 10>}, {transform_indices = @transform_17, window_bounds = array<i64: 8, 10>}]} {
    %c0 = arith.constant 0 : index
    %c0_0 = arith.constant 0 : index
    %0 = vector.load %arg1[%c0, %c0_0] : memref<256x32xf32, #tpu.memory_space<vmem>>, vector<256x32xf32>
    %cst = arith.constant 0.000000e+00 : f32
    %1 = vector.broadcast %cst : f32 to vector<224x168xf32>
    %c0_1 = arith.constant 0 : index
    %c0_2 = arith.constant 0 : index
    %c0_3 = arith.constant 0 : index
    %2 = vector.load %arg2[%c0_1, %c0_2, %c0_3] : memref<5x224x256xf32, #tpu.memory_space<vmem>>, vector<1x224x256xf32>
    %3 = vector.shape_cast %2 : vector<1x224x256xf32> to vector<224x256xf32>
    %cst_4 = arith.constant dense<0.000000e+00> : vector<224x32xf32>
    %4 = tpu.matmul %3, %0, %cst_4 {dimension_numbers = #tpu.dot_dimension_numbers<[1], [0], [0], [1], [0, 0, 1, 1], [], []>} : vector<224x256xf32>, vector<256x32xf32>, vector<224x32xf32> -> vector<224x32xf32>
    %c0_5 = arith.constant 0 : index
    %c0_6 = arith.constant 0 : index
    %c0_7 = arith.constant 0 : index
    %5 = vector.load %arg3[%c0_5, %c0_6, %c0_7] : memref<5x32x168xf32, #tpu.memory_space<vmem>>, vector<1x32x168xf32>
    %6 = vector.shape_cast %5 : vector<1x32x168xf32> to vector<32x168xf32>
    %cst_8 = arith.constant dense<0.000000e+00> : vector<224x168xf32>
    %7 = tpu.matmul %4, %6, %cst_8 {dimension_numbers = #tpu.dot_dimension_numbers<[1], [0], [0], [1], [0, 0, 1, 1], [], []>} : vector<224x32xf32>, vector<32x168xf32>, vector<224x168xf32> -> vector<224x168xf32>
    %8 = arith.addf %1, %7 : vector<224x168xf32>
    %c1 = arith.constant 1 : index
    %c0_9 = arith.constant 0 : index
    %c0_10 = arith.constant 0 : index
    %9 = vector.load %arg2[%c1, %c0_9, %c0_10] : memref<5x224x256xf32, #tpu.memory_space<vmem>>, vector<1x224x256xf32>
    %10 = vector.shape_cast %9 : vector<1x224x256xf32> to vector<224x256xf32>
    %cst_11 = arith.constant dense<0.000000e+00> : vector<224x32xf32>
    %11 = tpu.matmul %10, %0, %cst_11 {dimension_numbers = #tpu.dot_dimension_numbers<[1], [0], [0], [1], [0, 0, 1, 1], [], []>} : vector<224x256xf32>, vector<256x32xf32>, vector<224x32xf32> -> vector<224x32xf32>
    %c1_12 = arith.constant 1 : index
    %c0_13 = arith.constant 0 : index
    %c0_14 = arith.constant 0 : index
    %12 = vector.load %arg3[%c1_12, %c0_13, %c0_14] : memref<5x32x168xf32, #tpu.memory_space<vmem>>, vector<1x32x168xf32>
    %13 = vector.shape_cast %12 : vector<1x32x168xf32> to vector<32x168xf32>
    %cst_15 = arith.constant dense<0.000000e+00> : vector<224x168xf32>
    %14 = tpu.matmul %11, %13, %cst_15 {dimension_numbers = #tpu.dot_dimension_numbers<[1], [0], [0], [1], [0, 0, 1, 1], [], []>} : vector<224x32xf32>, vector<32x168xf32>, vector<224x168xf32> -> vector<224x168xf32>
    %15 = arith.addf %8, %14 : vector<224x168xf32>
    %c2 = arith.constant 2 : index
    %c0_16 = arith.constant 0 : index
    %c0_17 = arith.constant 0 : index
    %16 = vector.load %arg2[%c2, %c0_16, %c0_17] : memref<5x224x256xf32, #tpu.memory_space<vmem>>, vector<1x224x256xf32>
    %17 = vector.shape_cast %16 : vector<1x224x256xf32> to vector<224x256xf32>
    %cst_18 = arith.constant dense<0.000000e+00> : vector<224x32xf32>
    %18 = tpu.matmul %17, %0, %cst_18 {dimension_numbers = #tpu.dot_dimension_numbers<[1], [0], [0], [1], [0, 0, 1, 1], [], []>} : vector<224x256xf32>, vector<256x32xf32>, vector<224x32xf32> -> vector<224x32xf32>
    %c2_19 = arith.constant 2 : index
    %c0_20 = arith.constant 0 : index
    %c0_21 = arith.constant 0 : index
    %19 = vector.load %arg3[%c2_19, %c0_20, %c0_21] : memref<5x32x168xf32, #tpu.memory_space<vmem>>, vector<1x32x168xf32>
    %20 = vector.shape_cast %19 : vector<1x32x168xf32> to vector<32x168xf32>
    %cst_22 = arith.constant dense<0.000000e+00> : vector<224x168xf32>
    %21 = tpu.matmul %18, %20, %cst_22 {dimension_numbers = #tpu.dot_dimension_numbers<[1], [0], [0], [1], [0, 0, 1, 1], [], []>} : vector<224x32xf32>, vector<32x168xf32>, vector<224x168xf32> -> vector<224x168xf32>
    %22 = arith.addf %15, %21 : vector<224x168xf32>
    %c3 = arith.constant 3 : index
    %c0_23 = arith.constant 0 : index
    %c0_24 = arith.constant 0 : index
    %23 = vector.load %arg2[%c3, %c0_23, %c0_24] : memref<5x224x256xf32, #tpu.memory_space<vmem>>, vector<1x224x256xf32>
    %24 = vector.shape_cast %23 : vector<1x224x256xf32> to vector<224x256xf32>
    %cst_25 = arith.constant dense<0.000000e+00> : vector<224x32xf32>
    %25 = tpu.matmul %24, %0, %cst_25 {dimension_numbers = #tpu.dot_dimension_numbers<[1], [0], [0], [1], [0, 0, 1, 1], [], []>} : vector<224x256xf32>, vector<256x32xf32>, vector<224x32xf32> -> vector<224x32xf32>
    %c3_26 = arith.constant 3 : index
    %c0_27 = arith.constant 0 : index
    %c0_28 = arith.constant 0 : index
    %26 = vector.load %arg3[%c3_26, %c0_27, %c0_28] : memref<5x32x168xf32, #tpu.memory_space<vmem>>, vector<1x32x168xf32>
    %27 = vector.shape_cast %26 : vector<1x32x168xf32> to vector<32x168xf32>
    %cst_29 = arith.constant dense<0.000000e+00> : vector<224x168xf32>
    %28 = tpu.matmul %25, %27, %cst_29 {dimension_numbers = #tpu.dot_dimension_numbers<[1], [0], [0], [1], [0, 0, 1, 1], [], []>} : vector<224x32xf32>, vector<32x168xf32>, vector<224x168xf32> -> vector<224x168xf32>
    %29 = arith.addf %22, %28 : vector<224x168xf32>
    %c4 = arith.constant 4 : index
    %c0_30 = arith.constant 0 : index
    %c0_31 = arith.constant 0 : index
    %30 = vector.load %arg2[%c4, %c0_30, %c0_31] : memref<5x224x256xf32, #tpu.memory_space<vmem>>, vector<1x224x256xf32>
    %31 = vector.shape_cast %30 : vector<1x224x256xf32> to vector<224x256xf32>
    %cst_32 = arith.constant dense<0.000000e+00> : vector<224x32xf32>
    %32 = tpu.matmul %31, %0, %cst_32 {dimension_numbers = #tpu.dot_dimension_numbers<[1], [0], [0], [1], [0, 0, 1, 1], [], []>} : vector<224x256xf32>, vector<256x32xf32>, vector<224x32xf32> -> vector<224x32xf32>
    %c4_33 = arith.constant 4 : index
    %c0_34 = arith.constant 0 : index
    %c0_35 = arith.constant 0 : index
    %33 = vector.load %arg3[%c4_33, %c0_34, %c0_35] : memref<5x32x168xf32, #tpu.memory_space<vmem>>, vector<1x32x168xf32>
    %34 = vector.shape_cast %33 : vector<1x32x168xf32> to vector<32x168xf32>
    %cst_36 = arith.constant dense<0.000000e+00> : vector<224x168xf32>
    %35 = tpu.matmul %32, %34, %cst_36 {dimension_numbers = #tpu.dot_dimension_numbers<[1], [0], [0], [1], [0, 0, 1, 1], [], []>} : vector<224x32xf32>, vector<32x168xf32>, vector<224x168xf32> -> vector<224x168xf32>
    %36 = arith.addf %29, %35 : vector<224x168xf32>
    %c0_37 = arith.constant 0 : index
    %c0_38 = arith.constant 0 : index
    %37 = vector.load %arg4[%c0_37, %c0_38] : memref<1x168xf32, #tpu.memory_space<vmem>>, vector<1x168xf32>
    %38 = vector.broadcast %37 : vector<1x168xf32> to vector<224x168xf32>
    %39 = arith.addf %36, %38 : vector<224x168xf32>
    %cst_39 = arith.constant 0.000000e+00 : f32
    %40 = vector.broadcast %cst_39 : f32 to vector<224x168xf32>
    %41 = arith.maximumf %39, %40 : vector<224x168xf32>
    %c0_40 = arith.constant 0 : index
    %c0_41 = arith.constant 0 : index
    %c0_42 = arith.constant 0 : index
    %42 = vector.load %arg5[%c0_40, %c0_41, %c0_42] : memref<2x112x224xf32, #tpu.memory_space<vmem>>, vector<1x112x224xf32>
    %43 = vector.shape_cast %42 : vector<1x112x224xf32> to vector<112x224xf32>
    %cst_43 = arith.constant dense<0.000000e+00> : vector<112x168xf32>
    %44 = tpu.matmul %43, %41, %cst_43 {dimension_numbers = #tpu.dot_dimension_numbers<[1], [0], [0], [1], [0, 0, 1, 1], [], []>} : vector<112x224xf32>, vector<224x168xf32>, vector<112x168xf32> -> vector<112x168xf32>
    %c1_44 = arith.constant 1 : index
    %c0_45 = arith.constant 0 : index
    %c0_46 = arith.constant 0 : index
    %45 = vector.load %arg5[%c1_44, %c0_45, %c0_46] : memref<2x112x224xf32, #tpu.memory_space<vmem>>, vector<1x112x224xf32>
    %46 = vector.shape_cast %45 : vector<1x112x224xf32> to vector<112x224xf32>
    %cst_47 = arith.constant dense<0.000000e+00> : vector<112x168xf32>
    %47 = tpu.matmul %46, %41, %cst_47 {dimension_numbers = #tpu.dot_dimension_numbers<[1], [0], [0], [1], [0, 0, 1, 1], [], []>} : vector<112x224xf32>, vector<224x168xf32>, vector<112x168xf32> -> vector<112x168xf32>
    %48 = arith.maximumf %44, %47 : vector<112x168xf32>
    %c0_48 = arith.constant 0 : index
    %c0_49 = arith.constant 0 : index
    %c0_50 = arith.constant 0 : index
    %49 = vector.load %arg6[%c0_48, %c0_49, %c0_50] : memref<2x168x84xf32, #tpu.memory_space<vmem>>, vector<1x168x84xf32>
    %50 = vector.shape_cast %49 : vector<1x168x84xf32> to vector<168x84xf32>
    %cst_51 = arith.constant dense<0.000000e+00> : vector<112x84xf32>
    %51 = tpu.matmul %48, %50, %cst_51 {dimension_numbers = #tpu.dot_dimension_numbers<[1], [0], [0], [1], [0, 0, 1, 1], [], []>} : vector<112x168xf32>, vector<168x84xf32>, vector<112x84xf32> -> vector<112x84xf32>
    %c1_52 = arith.constant 1 : index
    %c0_53 = arith.constant 0 : index
    %c0_54 = arith.constant 0 : index
    %52 = vector.load %arg6[%c1_52, %c0_53, %c0_54] : memref<2x168x84xf32, #tpu.memory_space<vmem>>, vector<1x168x84xf32>
    %53 = vector.shape_cast %52 : vector<1x168x84xf32> to vector<168x84xf32>
    %cst_55 = arith.constant dense<0.000000e+00> : vector<112x84xf32>
    %54 = tpu.matmul %48, %53, %cst_55 {dimension_numbers = #tpu.dot_dimension_numbers<[1], [0], [0], [1], [0, 0, 1, 1], [], []>} : vector<112x168xf32>, vector<168x84xf32>, vector<112x84xf32> -> vector<112x84xf32>
    %55 = arith.maximumf %51, %54 : vector<112x84xf32>
    %cst_56 = arith.constant 0.000000e+00 : f32
    %56 = vector.broadcast %cst_56 : f32 to vector<80x160xf32>
    %c0_57 = arith.constant 0 : index
    %c0_58 = arith.constant 0 : index
    %c0_59 = arith.constant 0 : index
    %57 = vector.load %arg7[%c0_57, %c0_58, %c0_59] : memref<5x80x112xf32, #tpu.memory_space<vmem>>, vector<1x80x112xf32>
    %58 = vector.shape_cast %57 : vector<1x80x112xf32> to vector<80x112xf32>
    %cst_60 = arith.constant dense<0.000000e+00> : vector<80x84xf32>
    %59 = tpu.matmul %58, %55, %cst_60 {dimension_numbers = #tpu.dot_dimension_numbers<[1], [0], [0], [1], [0, 0, 1, 1], [], []>} : vector<80x112xf32>, vector<112x84xf32>, vector<80x84xf32> -> vector<80x84xf32>
    %c0_61 = arith.constant 0 : index
    %c0_62 = arith.constant 0 : index
    %c0_63 = arith.constant 0 : index
    %60 = vector.load %arg8[%c0_61, %c0_62, %c0_63] : memref<5x84x160xf32, #tpu.memory_space<vmem>>, vector<1x84x160xf32>
    %61 = vector.shape_cast %60 : vector<1x84x160xf32> to vector<84x160xf32>
    %cst_64 = arith.constant dense<0.000000e+00> : vector<80x160xf32>
    %62 = tpu.matmul %59, %61, %cst_64 {dimension_numbers = #tpu.dot_dimension_numbers<[1], [0], [0], [1], [0, 0, 1, 1], [], []>} : vector<80x84xf32>, vector<84x160xf32>, vector<80x160xf32> -> vector<80x160xf32>
    %63 = arith.addf %56, %62 : vector<80x160xf32>
    %c1_65 = arith.constant 1 : index
    %c0_66 = arith.constant 0 : index
    %c0_67 = arith.constant 0 : index
    %64 = vector.load %arg7[%c1_65, %c0_66, %c0_67] : memref<5x80x112xf32, #tpu.memory_space<vmem>>, vector<1x80x112xf32>
    %65 = vector.shape_cast %64 : vector<1x80x112xf32> to vector<80x112xf32>
    %cst_68 = arith.constant dense<0.000000e+00> : vector<80x84xf32>
    %66 = tpu.matmul %65, %55, %cst_68 {dimension_numbers = #tpu.dot_dimension_numbers<[1], [0], [0], [1], [0, 0, 1, 1], [], []>} : vector<80x112xf32>, vector<112x84xf32>, vector<80x84xf32> -> vector<80x84xf32>
    %c1_69 = arith.constant 1 : index
    %c0_70 = arith.constant 0 : index
    %c0_71 = arith.constant 0 : index
    %67 = vector.load %arg8[%c1_69, %c0_70, %c0_71] : memref<5x84x160xf32, #tpu.memory_space<vmem>>, vector<1x84x160xf32>
    %68 = vector.shape_cast %67 : vector<1x84x160xf32> to vector<84x160xf32>
    %cst_72 = arith.constant dense<0.000000e+00> : vector<80x160xf32>
    %69 = tpu.matmul %66, %68, %cst_72 {dimension_numbers = #tpu.dot_dimension_numbers<[1], [0], [0], [1], [0, 0, 1, 1], [], []>} : vector<80x84xf32>, vector<84x160xf32>, vector<80x160xf32> -> vector<80x160xf32>
    %70 = arith.addf %63, %69 : vector<80x160xf32>
    %c2_73 = arith.constant 2 : index
    %c0_74 = arith.constant 0 : index
    %c0_75 = arith.constant 0 : index
    %71 = vector.load %arg7[%c2_73, %c0_74, %c0_75] : memref<5x80x112xf32, #tpu.memory_space<vmem>>, vector<1x80x112xf32>
    %72 = vector.shape_cast %71 : vector<1x80x112xf32> to vector<80x112xf32>
    %cst_76 = arith.constant dense<0.000000e+00> : vector<80x84xf32>
    %73 = tpu.matmul %72, %55, %cst_76 {dimension_numbers = #tpu.dot_dimension_numbers<[1], [0], [0], [1], [0, 0, 1, 1], [], []>} : vector<80x112xf32>, vector<112x84xf32>, vector<80x84xf32> -> vector<80x84xf32>
    %c2_77 = arith.constant 2 : index
    %c0_78 = arith.constant 0 : index
    %c0_79 = arith.constant 0 : index
    %74 = vector.load %arg8[%c2_77, %c0_78, %c0_79] : memref<5x84x160xf32, #tpu.memory_space<vmem>>, vector<1x84x160xf32>
    %75 = vector.shape_cast %74 : vector<1x84x160xf32> to vector<84x160xf32>
    %cst_80 = arith.constant dense<0.000000e+00> : vector<80x160xf32>
    %76 = tpu.matmul %73, %75, %cst_80 {dimension_numbers = #tpu.dot_dimension_numbers<[1], [0], [0], [1], [0, 0, 1, 1], [], []>} : vector<80x84xf32>, vector<84x160xf32>, vector<80x160xf32> -> vector<80x160xf32>
    %77 = arith.addf %70, %76 : vector<80x160xf32>
    %c3_81 = arith.constant 3 : index
    %c0_82 = arith.constant 0 : index
    %c0_83 = arith.constant 0 : index
    %78 = vector.load %arg7[%c3_81, %c0_82, %c0_83] : memref<5x80x112xf32, #tpu.memory_space<vmem>>, vector<1x80x112xf32>
    %79 = vector.shape_cast %78 : vector<1x80x112xf32> to vector<80x112xf32>
    %cst_84 = arith.constant dense<0.000000e+00> : vector<80x84xf32>
    %80 = tpu.matmul %79, %55, %cst_84 {dimension_numbers = #tpu.dot_dimension_numbers<[1], [0], [0], [1], [0, 0, 1, 1], [], []>} : vector<80x112xf32>, vector<112x84xf32>, vector<80x84xf32> -> vector<80x84xf32>
    %c3_85 = arith.constant 3 : index
    %c0_86 = arith.constant 0 : index
    %c0_87 = arith.constant 0 : index
    %81 = vector.load %arg8[%c3_85, %c0_86, %c0_87] : memref<5x84x160xf32, #tpu.memory_space<vmem>>, vector<1x84x160xf32>
    %82 = vector.shape_cast %81 : vector<1x84x160xf32> to vector<84x160xf32>
    %cst_88 = arith.constant dense<0.000000e+00> : vector<80x160xf32>
    %83 = tpu.matmul %80, %82, %cst_88 {dimension_numbers = #tpu.dot_dimension_numbers<[1], [0], [0], [1], [0, 0, 1, 1], [], []>} : vector<80x84xf32>, vector<84x160xf32>, vector<80x160xf32> -> vector<80x160xf32>
    %84 = arith.addf %77, %83 : vector<80x160xf32>
    %c4_89 = arith.constant 4 : index
    %c0_90 = arith.constant 0 : index
    %c0_91 = arith.constant 0 : index
    %85 = vector.load %arg7[%c4_89, %c0_90, %c0_91] : memref<5x80x112xf32, #tpu.memory_space<vmem>>, vector<1x80x112xf32>
    %86 = vector.shape_cast %85 : vector<1x80x112xf32> to vector<80x112xf32>
    %cst_92 = arith.constant dense<0.000000e+00> : vector<80x84xf32>
    %87 = tpu.matmul %86, %55, %cst_92 {dimension_numbers = #tpu.dot_dimension_numbers<[1], [0], [0], [1], [0, 0, 1, 1], [], []>} : vector<80x112xf32>, vector<112x84xf32>, vector<80x84xf32> -> vector<80x84xf32>
    %c4_93 = arith.constant 4 : index
    %c0_94 = arith.constant 0 : index
    %c0_95 = arith.constant 0 : index
    %88 = vector.load %arg8[%c4_93, %c0_94, %c0_95] : memref<5x84x160xf32, #tpu.memory_space<vmem>>, vector<1x84x160xf32>
    %89 = vector.shape_cast %88 : vector<1x84x160xf32> to vector<84x160xf32>
    %cst_96 = arith.constant dense<0.000000e+00> : vector<80x160xf32>
    %90 = tpu.matmul %87, %89, %cst_96 {dimension_numbers = #tpu.dot_dimension_numbers<[1], [0], [0], [1], [0, 0, 1, 1], [], []>} : vector<80x84xf32>, vector<84x160xf32>, vector<80x160xf32> -> vector<80x160xf32>
    %91 = arith.addf %84, %90 : vector<80x160xf32>
    %c0_97 = arith.constant 0 : index
    %c0_98 = arith.constant 0 : index
    %92 = vector.load %arg9[%c0_97, %c0_98] : memref<1x160xf32, #tpu.memory_space<vmem>>, vector<1x160xf32>
    %93 = vector.broadcast %92 : vector<1x160xf32> to vector<80x160xf32>
    %94 = arith.addf %91, %93 : vector<80x160xf32>
    %cst_99 = arith.constant 0.000000e+00 : f32
    %95 = vector.broadcast %cst_99 : f32 to vector<80x160xf32>
    %96 = arith.maximumf %94, %95 : vector<80x160xf32>
    %c0_100 = arith.constant 0 : index
    %c0_101 = arith.constant 0 : index
    %c0_102 = arith.constant 0 : index
    %97 = vector.load %arg10[%c0_100, %c0_101, %c0_102] : memref<2x40x80xf32, #tpu.memory_space<vmem>>, vector<1x40x80xf32>
    %98 = vector.shape_cast %97 : vector<1x40x80xf32> to vector<40x80xf32>
    %cst_103 = arith.constant dense<0.000000e+00> : vector<40x160xf32>
    %99 = tpu.matmul %98, %96, %cst_103 {dimension_numbers = #tpu.dot_dimension_numbers<[1], [0], [0], [1], [0, 0, 1, 1], [], []>} : vector<40x80xf32>, vector<80x160xf32>, vector<40x160xf32> -> vector<40x160xf32>
    %c1_104 = arith.constant 1 : index
    %c0_105 = arith.constant 0 : index
    %c0_106 = arith.constant 0 : index
    %100 = vector.load %arg10[%c1_104, %c0_105, %c0_106] : memref<2x40x80xf32, #tpu.memory_space<vmem>>, vector<1x40x80xf32>
    %101 = vector.shape_cast %100 : vector<1x40x80xf32> to vector<40x80xf32>
    %cst_107 = arith.constant dense<0.000000e+00> : vector<40x160xf32>
    %102 = tpu.matmul %101, %96, %cst_107 {dimension_numbers = #tpu.dot_dimension_numbers<[1], [0], [0], [1], [0, 0, 1, 1], [], []>} : vector<40x80xf32>, vector<80x160xf32>, vector<40x160xf32> -> vector<40x160xf32>
    %103 = arith.maximumf %99, %102 : vector<40x160xf32>
    %c0_108 = arith.constant 0 : index
    %c0_109 = arith.constant 0 : index
    %c0_110 = arith.constant 0 : index
    %104 = vector.load %arg11[%c0_108, %c0_109, %c0_110] : memref<2x160x80xf32, #tpu.memory_space<vmem>>, vector<1x160x80xf32>
    %105 = vector.shape_cast %104 : vector<1x160x80xf32> to vector<160x80xf32>
    %cst_111 = arith.constant dense<0.000000e+00> : vector<40x80xf32>
    %106 = tpu.matmul %103, %105, %cst_111 {dimension_numbers = #tpu.dot_dimension_numbers<[1], [0], [0], [1], [0, 0, 1, 1], [], []>} : vector<40x160xf32>, vector<160x80xf32>, vector<40x80xf32> -> vector<40x80xf32>
    %c1_112 = arith.constant 1 : index
    %c0_113 = arith.constant 0 : index
    %c0_114 = arith.constant 0 : index
    %107 = vector.load %arg11[%c1_112, %c0_113, %c0_114] : memref<2x160x80xf32, #tpu.memory_space<vmem>>, vector<1x160x80xf32>
    %108 = vector.shape_cast %107 : vector<1x160x80xf32> to vector<160x80xf32>
    %cst_115 = arith.constant dense<0.000000e+00> : vector<40x80xf32>
    %109 = tpu.matmul %103, %108, %cst_115 {dimension_numbers = #tpu.dot_dimension_numbers<[1], [0], [0], [1], [0, 0, 1, 1], [], []>} : vector<40x160xf32>, vector<160x80xf32>, vector<40x80xf32> -> vector<40x80xf32>
    %110 = arith.maximumf %106, %109 : vector<40x80xf32>
    %cst_116 = arith.constant 0.000000e+00 : f32
    %111 = vector.broadcast %cst_116 : f32 to vector<8x120xf32>
    %112 = vector.extract_strided_slice %110 {offsets = [0, 0], sizes = [8, 80], strides = [1, 1]} : vector<40x80xf32> to vector<8x80xf32>
    %c0_117 = arith.constant 0 : index
    %c0_118 = arith.constant 0 : index
    %113 = vector.load %arg12[%c0_117, %c0_118] : memref<400x120xf32, #tpu.memory_space<vmem>>, vector<80x120xf32>
    %cst_119 = arith.constant dense<0.000000e+00> : vector<8x120xf32>
    %114 = tpu.matmul %112, %113, %cst_119 {dimension_numbers = #tpu.dot_dimension_numbers<[1], [0], [0], [1], [0, 0, 1, 1], [], []>} : vector<8x80xf32>, vector<80x120xf32>, vector<8x120xf32> -> vector<8x120xf32>
    %115 = arith.addf %111, %114 : vector<8x120xf32>
    %116 = vector.extract_strided_slice %110 {offsets = [8, 0], sizes = [8, 80], strides = [1, 1]} : vector<40x80xf32> to vector<8x80xf32>
    %c80 = arith.constant 80 : index
    %c0_120 = arith.constant 0 : index
    %117 = vector.load %arg12[%c80, %c0_120] : memref<400x120xf32, #tpu.memory_space<vmem>>, vector<80x120xf32>
    %cst_121 = arith.constant dense<0.000000e+00> : vector<8x120xf32>
    %118 = tpu.matmul %116, %117, %cst_121 {dimension_numbers = #tpu.dot_dimension_numbers<[1], [0], [0], [1], [0, 0, 1, 1], [], []>} : vector<8x80xf32>, vector<80x120xf32>, vector<8x120xf32> -> vector<8x120xf32>
    %119 = arith.addf %115, %118 : vector<8x120xf32>
    %120 = vector.extract_strided_slice %110 {offsets = [16, 0], sizes = [8, 80], strides = [1, 1]} : vector<40x80xf32> to vector<8x80xf32>
    %c160 = arith.constant 160 : index
    %c0_122 = arith.constant 0 : index
    %121 = vector.load %arg12[%c160, %c0_122] : memref<400x120xf32, #tpu.memory_space<vmem>>, vector<80x120xf32>
    %cst_123 = arith.constant dense<0.000000e+00> : vector<8x120xf32>
    %122 = tpu.matmul %120, %121, %cst_123 {dimension_numbers = #tpu.dot_dimension_numbers<[1], [0], [0], [1], [0, 0, 1, 1], [], []>} : vector<8x80xf32>, vector<80x120xf32>, vector<8x120xf32> -> vector<8x120xf32>
    %123 = arith.addf %119, %122 : vector<8x120xf32>
    %124 = vector.extract_strided_slice %110 {offsets = [24, 0], sizes = [8, 80], strides = [1, 1]} : vector<40x80xf32> to vector<8x80xf32>
    %c240 = arith.constant 240 : index
    %c0_124 = arith.constant 0 : index
    %125 = vector.load %arg12[%c240, %c0_124] : memref<400x120xf32, #tpu.memory_space<vmem>>, vector<80x120xf32>
    %cst_125 = arith.constant dense<0.000000e+00> : vector<8x120xf32>
    %126 = tpu.matmul %124, %125, %cst_125 {dimension_numbers = #tpu.dot_dimension_numbers<[1], [0], [0], [1], [0, 0, 1, 1], [], []>} : vector<8x80xf32>, vector<80x120xf32>, vector<8x120xf32> -> vector<8x120xf32>
    %127 = arith.addf %123, %126 : vector<8x120xf32>
    %128 = vector.extract_strided_slice %110 {offsets = [32, 0], sizes = [8, 80], strides = [1, 1]} : vector<40x80xf32> to vector<8x80xf32>
    %c320 = arith.constant 320 : index
    %c0_126 = arith.constant 0 : index
    %129 = vector.load %arg12[%c320, %c0_126] : memref<400x120xf32, #tpu.memory_space<vmem>>, vector<80x120xf32>
    %cst_127 = arith.constant dense<0.000000e+00> : vector<8x120xf32>
    %130 = tpu.matmul %128, %129, %cst_127 {dimension_numbers = #tpu.dot_dimension_numbers<[1], [0], [0], [1], [0, 0, 1, 1], [], []>} : vector<8x80xf32>, vector<80x120xf32>, vector<8x120xf32> -> vector<8x120xf32>
    %131 = arith.addf %127, %130 : vector<8x120xf32>
    %c0_128 = arith.constant 0 : index
    %c0_129 = arith.constant 0 : index
    %132 = vector.load %arg13[%c0_128, %c0_129] : memref<1x120xf32, #tpu.memory_space<vmem>>, vector<1x120xf32>
    %133 = vector.broadcast %132 : vector<1x120xf32> to vector<8x120xf32>
    %134 = arith.addf %131, %133 : vector<8x120xf32>
    %cst_130 = arith.constant 0.000000e+00 : f32
    %135 = vector.broadcast %cst_130 : f32 to vector<8x120xf32>
    %136 = arith.maximumf %134, %135 : vector<8x120xf32>
    %c0_131 = arith.constant 0 : index
    %c0_132 = arith.constant 0 : index
    %137 = vector.load %arg14[%c0_131, %c0_132] : memref<120x84xf32, #tpu.memory_space<vmem>>, vector<120x84xf32>
    %cst_133 = arith.constant dense<0.000000e+00> : vector<8x84xf32>
    %138 = tpu.matmul %136, %137, %cst_133 {dimension_numbers = #tpu.dot_dimension_numbers<[1], [0], [0], [1], [0, 0, 1, 1], [], []>} : vector<8x120xf32>, vector<120x84xf32>, vector<8x84xf32> -> vector<8x84xf32>
    %c0_134 = arith.constant 0 : index
    %c0_135 = arith.constant 0 : index
    %139 = vector.load %arg15[%c0_134, %c0_135] : memref<1x84xf32, #tpu.memory_space<vmem>>, vector<1x84xf32>
    %140 = vector.broadcast %139 : vector<1x84xf32> to vector<8x84xf32>
    %141 = arith.addf %138, %140 : vector<8x84xf32>
    %cst_136 = arith.constant 0.000000e+00 : f32
    %142 = vector.broadcast %cst_136 : f32 to vector<8x84xf32>
    %143 = arith.maximumf %141, %142 : vector<8x84xf32>
    %c0_137 = arith.constant 0 : index
    %c0_138 = arith.constant 0 : index
    %144 = vector.load %arg16[%c0_137, %c0_138] : memref<84x10xf32, #tpu.memory_space<vmem>>, vector<84x10xf32>
    %cst_139 = arith.constant dense<0.000000e+00> : vector<8x10xf32>
    %145 = tpu.matmul %143, %144, %cst_139 {dimension_numbers = #tpu.dot_dimension_numbers<[1], [0], [0], [1], [0, 0, 1, 1], [], []>} : vector<8x84xf32>, vector<84x10xf32>, vector<8x10xf32> -> vector<8x10xf32>
    %c0_140 = arith.constant 0 : index
    %c0_141 = arith.constant 0 : index
    %146 = vector.load %arg17[%c0_140, %c0_141] : memref<1x10xf32, #tpu.memory_space<vmem>>, vector<1x10xf32>
    %147 = vector.broadcast %146 : vector<1x10xf32> to vector<8x10xf32>
    %148 = arith.addf %145, %147 : vector<8x10xf32>
    %c0_142 = arith.constant 0 : index
    %c0_143 = arith.constant 0 : index
    %149 = vector.load %arg18[%c0_142, %c0_143] : memref<8x10xf32, #tpu.memory_space<vmem>>, vector<8x10xf32>
    tpu.vector_store %arg18[%c0_142, %c0_143], %148 {strides = array<i32>} : memref<8x10xf32, #tpu.memory_space<vmem>>, vector<8x10xf32>,
    return
  }
  func.func @transform_0(%arg0: i32) -> (i32, i32) {
    %c0_i32 = arith.constant 0 : i32
    %c0_i32_0 = arith.constant 0 : i32
    return %arg0, %c0_i32 : i32, i32
  }
  func.func @transform_1(%arg0: i32) -> (i32, i32, i32) {
    %c0_i32 = arith.constant 0 : i32
    %c0_i32_0 = arith.constant 0 : i32
    %c0_i32_1 = arith.constant 0 : i32
    %c0_i32_2 = arith.constant 0 : i32
    return %c0_i32, %c0_i32_0, %c0_i32_1 : i32, i32, i32
  }
  func.func @transform_2(%arg0: i32) -> (i32, i32, i32) {
    %c0_i32 = arith.constant 0 : i32
    %c0_i32_0 = arith.constant 0 : i32
    %c0_i32_1 = arith.constant 0 : i32
    %c0_i32_2 = arith.constant 0 : i32
    return %c0_i32, %c0_i32_0, %c0_i32_1 : i32, i32, i32
  }
  func.func @transform_3(%arg0: i32) -> (i32, i32) {
    %c0_i32 = arith.constant 0 : i32
    %c0_i32_0 = arith.constant 0 : i32
    %c0_i32_1 = arith.constant 0 : i32
    return %c0_i32, %c0_i32_0 : i32, i32
  }
  func.func @transform_4(%arg0: i32) -> (i32, i32, i32) {
    %c0_i32 = arith.constant 0 : i32
    %c0_i32_0 = arith.constant 0 : i32
    %c0_i32_1 = arith.constant 0 : i32
    %c0_i32_2 = arith.constant 0 : i32
    return %c0_i32, %c0_i32_0, %c0_i32_1 : i32, i32, i32
  }
  func.func @transform_5(%arg0: i32) -> (i32, i32, i32) {
    %c0_i32 = arith.constant 0 : i32
    %c0_i32_0 = arith.constant 0 : i32
    %c0_i32_1 = arith.constant 0 : i32
    %c0_i32_2 = arith.constant 0 : i32
    return %c0_i32, %c0_i32_0, %c0_i32_1 : i32, i32, i32
  }
  func.func @transform_6(%arg0: i32) -> (i32, i32, i32) {
    %c0_i32 = arith.constant 0 : i32
    %c0_i32_0 = arith.constant 0 : i32
    %c0_i32_1 = arith.constant 0 : i32
    %c0_i32_2 = arith.constant 0 : i32
    return %c0_i32, %c0_i32_0, %c0_i32_1 : i32, i32, i32
  }
  func.func @transform_7(%arg0: i32) -> (i32, i32, i32) {
    %c0_i32 = arith.constant 0 : i32
    %c0_i32_0 = arith.constant 0 : i32
    %c0_i32_1 = arith.constant 0 : i32
    %c0_i32_2 = arith.constant 0 : i32
    return %c0_i32, %c0_i32_0, %c0_i32_1 : i32, i32, i32
  }
  func.func @transform_8(%arg0: i32) -> (i32, i32) {
    %c0_i32 = arith.constant 0 : i32
    %c0_i32_0 = arith.constant 0 : i32
    %c0_i32_1 = arith.constant 0 : i32
    return %c0_i32, %c0_i32_0 : i32, i32
  }
  func.func @transform_9(%arg0: i32) -> (i32, i32, i32) {
    %c0_i32 = arith.constant 0 : i32
    %c0_i32_0 = arith.constant 0 : i32
    %c0_i32_1 = arith.constant 0 : i32
    %c0_i32_2 = arith.constant 0 : i32
    return %c0_i32, %c0_i32_0, %c0_i32_1 : i32, i32, i32
  }
  func.func @transform_10(%arg0: i32) -> (i32, i32, i32) {
    %c0_i32 = arith.constant 0 : i32
    %c0_i32_0 = arith.constant 0 : i32
    %c0_i32_1 = arith.constant 0 : i32
    %c0_i32_2 = arith.constant 0 : i32
    return %c0_i32, %c0_i32_0, %c0_i32_1 : i32, i32, i32
  }
  func.func @transform_11(%arg0: i32) -> (i32, i32) {
    %c0_i32 = arith.constant 0 : i32
    %c0_i32_0 = arith.constant 0 : i32
    %c0_i32_1 = arith.constant 0 : i32
    return %c0_i32, %c0_i32_0 : i32, i32
  }
  func.func @transform_12(%arg0: i32) -> (i32, i32) {
    %c0_i32 = arith.constant 0 : i32
    %c0_i32_0 = arith.constant 0 : i32
    %c0_i32_1 = arith.constant 0 : i32
    return %c0_i32, %c0_i32_0 : i32, i32
  }
  func.func @transform_13(%arg0: i32) -> (i32, i32) {
    %c0_i32 = arith.constant 0 : i32
    %c0_i32_0 = arith.constant 0 : i32
    %c0_i32_1 = arith.constant 0 : i32
    return %c0_i32, %c0_i32_0 : i32, i32
  }
  func.func @transform_14(%arg0: i32) -> (i32, i32) {
    %c0_i32 = arith.constant 0 : i32
    %c0_i32_0 = arith.constant 0 : i32
    %c0_i32_1 = arith.constant 0 : i32
    return %c0_i32, %c0_i32_0 : i32, i32
  }
  func.func @transform_15(%arg0: i32) -> (i32, i32) {
    %c0_i32 = arith.constant 0 : i32
    %c0_i32_0 = arith.constant 0 : i32
    %c0_i32_1 = arith.constant 0 : i32
    return %c0_i32, %c0_i32_0 : i32, i32
  }
  func.func @transform_16(%arg0: i32) -> (i32, i32) {
    %c0_i32 = arith.constant 0 : i32
    %c0_i32_0 = arith.constant 0 : i32
    %c0_i32_1 = arith.constant 0 : i32
    return %c0_i32, %c0_i32_0 : i32, i32
  }
  func.func @transform_17(%arg0: i32) -> (i32, i32) {
    %c0_i32 = arith.constant 0 : i32
    %c0_i32_0 = arith.constant 0 : i32
    return %arg0, %c0_i32 : i32, i32
  }
}

</mosaic_0001>

<bundles_post_ra>
// kernel: lenet5_forward.1
= control target key start
LH: loop header
LB: loop body
LE: loop exit
PB: predicated region body
PF: predicated region fallthrough
CT: control target
= control target key end

     0   :  { %s13088_s0 = inlined_call_operand.vmem [shape: f32[256,32], index: 0, kind: input, shape index: {}]   ;;  %s13089_s1 = inlined_call_operand.vmem [shape: f32[5,224,256], index: 1, kind: input, shape index: {}]   ;;  %s13090_s2 = inlined_call_operand.hbm [shape: f32[5,32,168], index: 2, kind: input, shape index: {}]   ;;  %s13091_s3 = inlined_call_operand.vmem [shape: f32[1,168], index: 3, kind: input, shape index: {}]   ;;  %s13092_s4 = inlined_call_operand.hbm [shape: f32[2,112,224], index: 4, kind: input, shape index: {}]   ;;  %s13093_s5 = inlined_call_operand.hbm [shape: f32[2,168,84], index: 5, kind: input, shape index: {}]   ;;  %s13094_s6 = inlined_call_operand.hbm [shape: f32[5,80,112], index: 6, kind: input, shape index: {}]   ;;  %s13095_s7 = inlined_call_operand.vmem [shape: f32[5,84,160], index: 7, kind: input, shape index: {}]   ;;  %s13096_s8 = inlined_call_operand.vmem [shape: f32[1,160], index: 8, kind: input, shape index: {}]   ;;  %s13097_s9 = inlined_call_operand.vmem [shape: f32[2,40,80], index: 9, kind: input, shape index: {}]   ;;  %s13098_s10 = inlined_call_operand.hbm [shape: f32[2,160,80], index: 10, kind: input, shape index: {}]   ;;  %s13099_s11 = inlined_call_operand.hbm [shape: f32[400,120], index: 11, kind: input, shape index: {}]   ;;  %s13100_s12 = inlined_call_operand.vmem [shape: f32[1,120], index: 12, kind: input, shape index: {}]   ;;  %s13101_s13 = inlined_call_operand.vmem [shape: f32[120,84], index: 13, kind: input, shape index: {}]   ;;  %s13102_s14 = inlined_call_operand.vmem [shape: f32[1,84], index: 14, kind: input, shape index: {}]   ;;  %s13103_s15 = inlined_call_operand.vmem [shape: f32[84,10], index: 15, kind: input, shape index: {}]   ;;  %s13104_s16 = inlined_call_operand.vmem [shape: f32[1,10], index: 16, kind: input, shape index: {}]   ;;  %s13105_s17 = inlined_call_operand.vmem [shape: f32[8,10], index: 17, kind: output, shape index: {}]  }
   0x1   :  { %13108 = sst [smem:[#allocation16_spill]] %s13088_s0 }
   0x2   :  { %13109 = sst [smem:[#allocation17_spill]] %s13089_s1 }
   0x3   :  { %13110 = sst [smem:[#allocation18_spill]] %s13105_s17 }
   0x4   :  { %22 = vsyncpa [#allocation3], 0 }
   0x5   :  { %23 = vsyncpa [#allocation5], 0 }
   0x6   :  { %24 = vsyncpa [#allocation8], 0 }
   0x7   :  { %25 = vsyncpa [#allocation11], 0  ;;  %s9768_s24 = smov [#allocation4]   ;;  %s9628_s28 = scalar_lea.hbm %s13092_s4, 7168 }
   0x8   :  { %s49_s25 = sshll.u32 %s9768_s24, 4  ;;  %p9629_p0 = scmp.ne.s32.totalorder %s13092_s4, %s9628_s28  ;;  %s50_s25 = int_to_ptr.vmem [resolvable:$true] %s49_s25 }
   0x9   :  { %p9632_p1 = scmp.lt.u32.totalorder %s9628_s28, %s13092_s4 }
   0xb   :  { %p9634_p2 = pnand %p9632_p1, %p9629_p0 }
   0xd   :  { %9637 = shalt.err (!%p9634_p2)
}
   0xe   :  { %s9638_s19 = scalar_lea.vmem %s50_s25, 7168  ;;  %p9643_p4 = scmp.lt.s32.totalorder %s50_s25, %s50_s25 }
   0xf   :  { %p9639_p3 = scmp.ne.s32.totalorder %s50_s25, %s9638_s19  ;;  %p9644_p5 = scmp.lt.s32.totalorder %s9638_s19, %s9638_s19 }
  0x11   :  { %p9645_p6 = por %p9644_p5, %p9643_p4 }
  0x13   :  { %p9646_p7 = pnand %p9645_p6, %p9639_p3 }
  0x15   :  { %9649 = shalt.err (!%p9646_p7)
}
  0x16   :  { %s9769_s1 = smov 256   ;;  %s9770_s20 = smov 16  }
  0x17   :  { %55 = dma.hbm_to_vmem [thread:$0]  %s13092_s4, 7168, %s50_s25, [#allocation5], %s9769_s1, %s9769_s1, %s9770_s20  }
  0x18   :  { %s9771_s23 = smov [#allocation7]   ;;  %s9772_s26 = smov [#allocation2]  }
  0x19   :  { %s73_s24 = sshll.u32 %s9771_s23, 4  ;;  %s35_s27 = sshll.u32 %s9772_s26, 4  ;;  %s74_s24 = int_to_ptr.vmem [resolvable:$true] %s73_s24  ;;  %s36_s27 = int_to_ptr.vmem [resolvable:$true] %s35_s27 }
  0x1a   :  { %s9650_s0 = scalar_lea.hbm %s13094_s6, 6400 }
  0x1b   :  { %p9651_p8 = scmp.ne.s32.totalorder %s13094_s6, %s9650_s0  ;;  %p9654_p9 = scmp.lt.u32.totalorder %s9650_s0, %s13094_s6 }
  0x1d   :  { %p9656_p10 = pnand %p9654_p9, %p9651_p8 }
  0x1f   :  { %9659 = shalt.err (!%p9656_p10)
}
  0x20   :  { %s9660_s4 = scalar_lea.vmem %s74_s24, 6400  ;;  %p9665_p12 = scmp.lt.s32.totalorder %s74_s24, %s74_s24 }
  0x21   :  { %p9661_p11 = scmp.ne.s32.totalorder %s74_s24, %s9660_s4  ;;  %p9666_p13 = scmp.lt.s32.totalorder %s9660_s4, %s9660_s4 }
  0x23   :  { %p9667_p0 = por %p9666_p13, %p9665_p12 }
  0x25   :  { %p9668_p1 = pnand %p9667_p0, %p9661_p11 }
  0x27   :  { %9671 = shalt.err (!%p9668_p1)
}
  0x28   :  { %s9773_s25 = smov 128   ;;  %s9774_s21 = smov 8  }
  0x29   :  { %79 = dma.hbm_to_vmem [thread:$0]  %s13094_s6, 6400, %s74_s24, [#allocation8], %s9773_s25, %s9773_s25, %s9774_s21  }
  0x2a   :  { %s9672_s28 = scalar_lea.hbm %s13090_s2, 5120 }
  0x2b   :  { %p9673_p2 = scmp.ne.s32.totalorder %s13090_s2, %s9672_s28  ;;  %p9676_p3 = scmp.lt.u32.totalorder %s9672_s28, %s13090_s2 }
  0x2d   :  { %p9678_p4 = pnand %p9676_p3, %p9673_p2 }
  0x2f   :  { %9681 = shalt.err (!%p9678_p4)
}
  0x30   :  { %s9682_s19 = scalar_lea.vmem %s36_s27, 5120  ;;  %p9687_p6 = scmp.lt.s32.totalorder %s36_s27, %s36_s27 }
  0x31   :  { %p9683_p5 = scmp.ne.s32.totalorder %s36_s27, %s9682_s19  ;;  %p9688_p7 = scmp.lt.s32.totalorder %s9682_s19, %s9682_s19 }
  0x33   :  { %p9689_p8 = por %p9688_p7, %p9687_p6 }
  0x35   :  { %p9690_p9 = pnand %p9689_p8, %p9683_p5 }
  0x37   :  { %9693 = shalt.err (!%p9690_p9)
}
  0x38   :  { %41 = dma.hbm_to_vmem [thread:$0]  %s13090_s2, 5120, %s36_s27, [#allocation3], %s9769_s1, %s9769_s1, %s9770_s20  }
  0x39   :  { %s9775_s4 = smov [#allocation6]   ;;  %s9776_s23 = smov [#allocation9]  }
  0x3a   :  { %s61_s22 = sshll.u32 %s9775_s4, 4  ;;  %s91_s17 = sshll.u32 %s9776_s23, 4  ;;  %s62_s22 = int_to_ptr.vmem [resolvable:$true] %s61_s22  ;;  %s92_s17 = int_to_ptr.vmem [resolvable:$true] %s91_s17 }
  0x3b   :  { %s9694_s29 = scalar_lea.hbm %s13093_s5, 5376 }
  0x3c   :  { %p9695_p10 = scmp.ne.s32.totalorder %s13093_s5, %s9694_s29  ;;  %p9698_p11 = scmp.lt.u32.totalorder %s9694_s29, %s13093_s5 }
  0x3e   :  { %p9700_p12 = pnand %p9698_p11, %p9695_p10 }
  0x40   :  { %9703 = shalt.err (!%p9700_p12)
}
  0x41   :  { %s9704_s2 = scalar_lea.vmem %s62_s22, 5376  ;;  %p9709_p0 = scmp.lt.s32.totalorder %s62_s22, %s62_s22 }
  0x42   :  { %p9705_p13 = scmp.ne.s32.totalorder %s62_s22, %s9704_s2  ;;  %p9710_p1 = scmp.lt.s32.totalorder %s9704_s2, %s9704_s2 }
  0x44   :  { %p9711_p2 = por %p9710_p1, %p9709_p0 }
  0x46   :  { %p9712_p3 = pnand %p9711_p2, %p9705_p13 }
  0x48   :  { %9715 = shalt.err (!%p9712_p3)
}
  0x49   :  { %67 = dma.hbm_to_vmem [thread:$0]  %s13093_s5, 5376, %s62_s22, [#allocation5], %s9773_s25, %s9773_s25, %s9774_s21  }
  0x4a   :  { %s9716_s24 = scalar_lea.hbm %s13098_s10, 5120 }
  0x4b   :  { %p9717_p4 = scmp.ne.s32.totalorder %s13098_s10, %s9716_s24  ;;  %p9720_p5 = scmp.lt.u32.totalorder %s9716_s24, %s13098_s10 }
  0x4d   :  { %p9722_p6 = pnand %p9720_p5, %p9717_p4 }
  0x4f   :  { %9725 = shalt.err (!%p9722_p6)
}
  0x50   :  { %s9726_s29 = scalar_lea.vmem %s92_s17, 5120  ;;  %p9731_p8 = scmp.lt.s32.totalorder %s92_s17, %s92_s17 }
  0x51   :  { %p9727_p7 = scmp.ne.s32.totalorder %s92_s17, %s9726_s29  ;;  %p9732_p9 = scmp.lt.s32.totalorder %s9726_s29, %s9726_s29 }
  0x53   :  { %p9733_p10 = por %p9732_p9, %p9731_p8 }
  0x55   :  { %p9734_p11 = pnand %p9733_p10, %p9727_p7 }
  0x57   :  { %9737 = shalt.err (!%p9734_p11)
}
  0x58   :  { %97 = dma.hbm_to_vmem [thread:$0]  %s13098_s10, 5120, %s92_s17, [#allocation8], %s9773_s25, %s9773_s25, %s9774_s21  }
  0x59   :  { %s9777_s0 = smov [#allocation10]   ;;  %s9738_s2 = scalar_lea.hbm %s13099_s11, 6400 }
  0x5a   :  { %s103_s30 = sshll.u32 %s9777_s0, 4  ;;  %p9739_p12 = scmp.ne.s32.totalorder %s13099_s11, %s9738_s2  ;;  %s104_s30 = int_to_ptr.vmem [resolvable:$true] %s103_s30 }
  0x5b   :  { %p9742_p13 = scmp.lt.u32.totalorder %s9738_s2, %s13099_s11 }
  0x5d   :  { %p9744_p0 = pnand %p9742_p13, %p9739_p12 }
  0x5f   :  { %9747 = shalt.err (!%p9744_p0)
}
  0x60   :  { %s9748_s24 = scalar_lea.vmem %s104_s30, 6400  ;;  %p9753_p2 = scmp.lt.s32.totalorder %s104_s30, %s104_s30 }
  0x61   :  { %p9749_p1 = scmp.ne.s32.totalorder %s104_s30, %s9748_s24  ;;  %p9754_p3 = scmp.lt.s32.totalorder %s9748_s24, %s9748_s24 }
  0x63   :  { %p9755_p4 = por %p9754_p3, %p9753_p2 }
  0x65   :  { %p9756_p5 = pnand %p9755_p4, %p9749_p1 }
  0x67   :  { %9759 = shalt.err (!%p9756_p5)
}
  0x68   :  { %109 = dma.hbm_to_vmem [thread:$0]  %s13099_s11, 6400, %s104_s30, [#allocation11], %s9773_s25, %s9773_s25, %s9774_s21  }
  0x69   :  { %9760 = dma.done.wait [#allocation3], 5120  }
  0x6a   :  { %9761 = vsyncadd [#allocation3], 4294962176 }
  0x6b   :  { %9762 = dma.done.wait [#allocation5], 12544  }
  0x6c   :  { %9763 = vsyncadd [#allocation5], 4294954752 }
  0x6d   :  { %9764 = dma.done.wait [#allocation8], 11520  }
  0x6e   :  { %9765 = vsyncadd [#allocation8], 4294955776 }
  0x6f   :  { %9766 = dma.done.wait [#allocation11], 6400  }
  0x70   :  { %9767 = vsyncadd [#allocation11], 4294960896  ;;  %v9778_v0 = vmov 0.0|0.0   ;;  %s13111_s26 = sld [smem:[#allocation16_spill]]  ;;  %s13112_s24 = sld [smem:[#allocation17_spill]]  ;;  %v703_v50 = vld [vmem:[#allocation2 + $0x48] sm:$0xff] }
  0x71   :  { %8456 = vmatprep.subr.bf16.mxu1 %v9778_v0  ;;  %8408 = vmatprep.subr.bf16.mxu0 %v9778_v0  ;;  %v705_v51 = vld [vmem:[#allocation2 + $0x58] sm:$0xff]  ;;  %v702_v54 = vld [vmem:[#allocation2 + $0x40] sm:$0xff]  ;;  %v704_v55 = vld [vmem:[#allocation2 + $0x50] sm:$0xff]  ;;  %vm710_vm0 = vcmask 261120   ;;  %vm3429_vm1 = vcmask 785408   ;;  %vm3890_vm2 = vcmask 326656  }
  0x72   :  { %v8504_v53 = vpack.c.bf16 %v705_v51, %v703_v50  ;;  %v707_v56 = vld [vmem:[#allocation2 + $0x68] sm:$0xff]  ;;  %v709_v57 = vld [vmem:[#allocation2 + $0x78] sm:$0xff]  ;;  %v8506_v61 = vpack.c.bf16 %v704_v55, %v702_v54  ;;  %vm4249_vm3 = vcmask 916480   ;;  %vm4627_vm4 = vcmask 1043456   ;;  %s13113_s0 = sld [smem:[#allocation18_spill]] }
  0x73   :  { %v8508_v63 = vpack.c.bf16 %v709_v57, %v707_v56  ;;  %vm4596_vm5 = vcmask 687104   ;;  %vm6057_vm6 = vcmask 654336   ;;  %vm9780_vm7 = vmmov 0  }
  0x74   :  { %vm6984_vm8 = vcmask 982016   ;;  %vm7153_vm9 = vcmask 80896  }
  0x76   :  { %v138_v1 = vld [vmem:[%s13111_s26] sm:$0xff]  ;;  %v139_v2 = vld [vmem:[%s13111_s26 + $0x8] sm:$0xff]  ;;  %v140_v3 = vld [vmem:[%s13111_s26 + $0x10] sm:$0xff] }
  0x77   :  { %v9972_v4 = vpack.c.bf16 %v139_v2, %v138_v1  ;;  %v141_v5 = vld [vmem:[%s13111_s26 + $0x18] sm:$0xff]  ;;  %v142_v7 = vld [vmem:[%s13111_s26 + $0x20] sm:$0xff]  ;;  %v143_v8 = vld [vmem:[%s13111_s26 + $0x28] sm:$0xff] }
  0x78   :  { %v9978_v6 = vpack.c.bf16 %v141_v5, %v140_v3  ;;  %v9990_v9 = vpack.c.bf16 %v143_v8, %v142_v7  ;;  %v144_v10 = vld [vmem:[%s13111_s26 + $0x30] sm:$0xff]  ;;  %v145_v11 = vld [vmem:[%s13111_s26 + $0x38] sm:$0xff]  ;;  %v7164_v12 = vld [vmem:[%s13112_s24 + $0x1c8] sm:$0xff] }
  0x79   :  { %8458 = vmatpush1.bf16.msra.mxu1 %v9972_v4  ;;  %8410 = vmatpush1.bf16.msra.mxu0 %v9972_v4  ;;  %v10005_v13 = vpack.c.bf16 %v145_v11, %v144_v10  ;;  %v146_v14 = vld [vmem:[%s13111_s26 + $0x40] sm:$0xff]  ;;  %v147_v15 = vld [vmem:[%s13111_s26 + $0x48] sm:$0xff]  ;;  %v148_v17 = vld [vmem:[%s13111_s26 + $0x50] sm:$0xff] }
  0x7a   :  { %8459 = vmatprep.subr.bf16.mxu1 %v9778_v0  ;;  %8411 = vmatprep.subr.bf16.mxu0 %v9778_v0  ;;  %v10017_v16 = vpack.c.bf16 %v147_v15, %v146_v14  ;;  %v149_v18 = vld [vmem:[%s13111_s26 + $0x58] sm:$0xff]  ;;  %v150_v20 = vld [vmem:[%s13111_s26 + $0x60] sm:$0xff]  ;;  %v151_v21 = vld [vmem:[%s13111_s26 + $0x68] sm:$0xff] }
  0x7b   :  { %560 = vmatprep.mubr.f32.mxu1 %v7164_v12  ;;  %v10029_v19 = vpack.c.bf16 %v149_v18, %v148_v17  ;;  %v10041_v22 = vpack.c.bf16 %v151_v21, %v150_v20  ;;  %v152_v23 = vld [vmem:[%s13111_s26 + $0x70] sm:$0xff]  ;;  %v153_v24 = vld [vmem:[%s13111_s26 + $0x78] sm:$0xff]  ;;  %v154_v26 = vld [vmem:[%s13111_s26 + $0x80] sm:$0xff] }
  0x7c   :  { %v10053_v25 = vpack.c.bf16 %v153_v24, %v152_v23  ;;  %v155_v27 = vld [vmem:[%s13111_s26 + $0x88] sm:$0xff]  ;;  %v156_v29 = vld [vmem:[%s13111_s26 + $0x90] sm:$0xff]  ;;  %v157_v30 = vld [vmem:[%s13111_s26 + $0x98] sm:$0xff] }
  0x7d   :  { %8461 = vmatpush1.bf16.msra.mxu1 %v9978_v6  ;;  %8413 = vmatpush1.bf16.msra.mxu0 %v9978_v6  ;;  %v10065_v28 = vpack.c.bf16 %v155_v27, %v154_v26  ;;  %v171_v31 = vld [vmem:[%s13112_s24 + $0x8] sm:$0xff]  ;;  %v10080_v32 = vpack.c.bf16 %v157_v30, %v156_v29  ;;  %v158_v33 = vld [vmem:[%s13111_s26 + $0xa0] sm:$0xff]  ;;  %v160_v36 = vld [vmem:[%s13111_s26 + $0xb0] sm:$0xff] }
  0x7e   :  { %8462 = vmatprep.subr.bf16.mxu1 %v9778_v0  ;;  %8414 = vmatprep.subr.bf16.mxu0 %v9778_v0  ;;  %v159_v34 = vld [vmem:[%s13111_s26 + $0xa8] sm:$0xff]  ;;  %v161_v37 = vld [vmem:[%s13111_s26 + $0xb8] sm:$0xff]  ;;  %v162_v39 = vld [vmem:[%s13111_s26 + $0xc0] sm:$0xff] }
  0x7f   :  { %290 = vmatprep.mubr.f32.mxu0 %v171_v31  ;;  %v10092_v35 = vpack.c.bf16 %v159_v34, %v158_v33  ;;  %v10104_v38 = vpack.c.bf16 %v161_v37, %v160_v36  ;;  %v163_v40 = vld [vmem:[%s13111_s26 + $0xc8] sm:$0xff]  ;;  %v164_v42 = vld [vmem:[%s13111_s26 + $0xd0] sm:$0xff]  ;;  %v165_v43 = vld [vmem:[%s13111_s26 + $0xd8] sm:$0xff] }
  0x80   :  { %v10116_v41 = vpack.c.bf16 %v163_v40, %v162_v39  ;;  %v10128_v44 = vpack.c.bf16 %v165_v43, %v164_v42  ;;  %v166_v45 = vld [vmem:[%s13111_s26 + $0xe0] sm:$0xff]  ;;  %v167_v46 = vld [vmem:[%s13111_s26 + $0xe8] sm:$0xff]  ;;  %v168_v48 = vld [vmem:[%s13111_s26 + $0xf0] sm:$0xff] }
  0x81   :  { %8464 = vmatpush1.bf16.msra.mxu1 %v9990_v9  ;;  %8416 = vmatpush1.bf16.msra.mxu0 %v9990_v9  ;;  %v10140_v47 = vpack.c.bf16 %v167_v46, %v166_v45  ;;  %v169_v49 = vld [vmem:[%s13111_s26 + $0xf8] sm:$0xff]  ;;  %v7163_v58 = vld [vmem:[%s13112_s24 + $0x1c0] sm:$0xff]  ;;  %v708_v2 = vld [vmem:[#allocation2 + $0x70] sm:$0xff] }
  0x82   :  { %8465 = vmatprep.subr.bf16.mxu1 %v9778_v0  ;;  %8417 = vmatprep.subr.bf16.mxu0 %v9778_v0  ;;  %v10152_v52 = vpack.c.bf16 %v169_v49, %v168_v48  ;;  %v7166_v59 = vld [vmem:[%s13112_s24 + $0x1d8] sm:$0xff]  ;;  %v170_v60 = vld [vmem:[%s13112_s24] sm:$0xff]  ;;  %v7165_v3 = vld [vmem:[%s13112_s24 + $0x1d0] sm:$0xff] }
  0x83   :  { %v173_v62 = vld [vmem:[%s13112_s24 + $0x18] sm:$0xff]  ;;  %v706_v1 = vld [vmem:[#allocation2 + $0x60] sm:$0xff]  ;;  %v7168_v5 = vld [vmem:[%s13112_s24 + $0x1e8] sm:$0xff] }
  0x84   :  { %v172_v7 = vld [vmem:[%s13112_s24 + $0x10] sm:$0xff]  ;;  %v8510_v8 = vpack.c.bf16 %v708_v2, %v706_v1  ;;  %v175_v10 = vld [vmem:[%s13112_s24 + $0x28] sm:$0xff]  ;;  %v7167_v11 = vld [vmem:[%s13112_s24 + $0x1e0] sm:$0xff] }
  0x85   :  { %8467 = vmatpush1.bf16.msra.mxu1 %v10005_v13  ;;  %8419 = vmatpush1.bf16.msra.mxu0 %v10005_v13  ;;  %v7170_v12 = vld [vmem:[%s13112_s24 + $0x1f8] sm:$0xff]  ;;  %v174_v14 = vld [vmem:[%s13112_s24 + $0x20] sm:$0xff]  ;;  %v7169_v17 = vld [vmem:[%s13112_s24 + $0x1f0] sm:$0xff] }
  0x86   :  { %8468 = vmatprep.subr.bf16.mxu1 %v9778_v0  ;;  %8420 = vmatprep.subr.bf16.mxu0 %v9778_v0  ;;  %v177_v15 = vld [vmem:[%s13112_s24 + $0x38] sm:$0xff]  ;;  %v7172_v18 = vld [vmem:[%s13112_s24 + $0x208] sm:$0xff]  ;;  %v176_v20 = vld [vmem:[%s13112_s24 + $0x30] sm:$0xff] }
  0x87   :  { %v179_v21 = vld [vmem:[%s13112_s24 + $0x48] sm:$0xff]  ;;  %v7171_v23 = vld [vmem:[%s13112_s24 + $0x200] sm:$0xff]  ;;  %v7174_v24 = vld [vmem:[%s13112_s24 + $0x218] sm:$0xff] }
  0x88   :  { %v178_v26 = vld [vmem:[%s13112_s24 + $0x40] sm:$0xff]  ;;  %v181_v27 = vld [vmem:[%s13112_s24 + $0x58] sm:$0xff]  ;;  %v7173_v29 = vld [vmem:[%s13112_s24 + $0x210] sm:$0xff] }
  0x89   :  { %8470 = vmatpush1.bf16.msra.mxu1 %v10017_v16  ;;  %8422 = vmatpush1.bf16.msra.mxu0 %v10017_v16  ;;  %v7176_v30 = vld [vmem:[%s13112_s24 + $0x228] sm:$0xff]  ;;  %v180_v31 = vld [vmem:[%s13112_s24 + $0x50] sm:$0xff]  ;;  %v7175_v34 = vld [vmem:[%s13112_s24 + $0x220] sm:$0xff] }
  0x8a   :  { %8471 = vmatprep.subr.bf16.mxu1 %v9778_v0  ;;  %8423 = vmatprep.subr.bf16.mxu0 %v9778_v0  ;;  %v183_v33 = vld [vmem:[%s13112_s24 + $0x68] sm:$0xff]  ;;  %v7178_v36 = vld [vmem:[%s13112_s24 + $0x238] sm:$0xff]  ;;  %v182_v37 = vld [vmem:[%s13112_s24 + $0x60] sm:$0xff] }
  0x8b   :  { %v185_v39 = vld [vmem:[%s13112_s24 + $0x78] sm:$0xff]  ;;  %v7177_v40 = vld [vmem:[%s13112_s24 + $0x230] sm:$0xff]  ;;  %v7180_v42 = vld [vmem:[%s13112_s24 + $0x248] sm:$0xff] }
  0x8c   :  { %v184_v43 = vld [vmem:[%s13112_s24 + $0x70] sm:$0xff]  ;;  %v187_v45 = vld [vmem:[%s13112_s24 + $0x88] sm:$0xff]  ;;  %v7179_v46 = vld [vmem:[%s13112_s24 + $0x240] sm:$0xff] }
  0x8d   :  { %8473 = vmatpush1.bf16.msra.mxu1 %v10029_v19  ;;  %8425 = vmatpush1.bf16.msra.mxu0 %v10029_v19  ;;  %v7182_v48 = vld [vmem:[%s13112_s24 + $0x258] sm:$0xff]  ;;  %v186_v49 = vld [vmem:[%s13112_s24 + $0x80] sm:$0xff]  ;;  %v7181_v51 = vld [vmem:[%s13112_s24 + $0x250] sm:$0xff] }
  0x8e   :  { %8474 = vmatprep.subr.bf16.mxu1 %v9778_v0  ;;  %8426 = vmatprep.subr.bf16.mxu0 %v9778_v0  ;;  %v189_v50 = vld [vmem:[%s13112_s24 + $0x98] sm:$0xff]  ;;  %v188_v54 = vld [vmem:[%s13112_s24 + $0x90] sm:$0xff]  ;;  %v191_v55 = vld [vmem:[%s13112_s24 + $0xa8] sm:$0xff] }
  0x8f   :  { %v7183_v56 = vld [vmem:[%s13112_s24 + $0x260] sm:$0xff]  ;;  %v7186_v57 = vld [vmem:[%s13112_s24 + $0x278] sm:$0xff] }
  0x90   :  { %v7187_v1 = vld [vmem:[%s13112_s24 + $0x280] sm:$0xff]  ;;  %v7190_v2 = vld [vmem:[%s13112_s24 + $0x298] sm:$0xff] }
  0x91   :  { %8476 = vmatpush1.bf16.msra.mxu1 %v10041_v22  ;;  %8428 = vmatpush1.bf16.msra.mxu0 %v10041_v22 }
  0x92   :  { %8477 = vmatprep.subr.bf16.mxu1 %v9778_v0  ;;  %8429 = vmatprep.subr.bf16.mxu0 %v9778_v0 }
  0x95   :  { %8479 = vmatpush1.bf16.msra.mxu1 %v10053_v25  ;;  %8431 = vmatpush1.bf16.msra.mxu0 %v10053_v25 }
  0x96   :  { %8480 = vmatprep.subr.bf16.mxu1 %v9778_v0  ;;  %8432 = vmatprep.subr.bf16.mxu0 %v9778_v0 }
  0x99   :  { %8482 = vmatpush1.bf16.msra.mxu1 %v10065_v28  ;;  %8434 = vmatpush1.bf16.msra.mxu0 %v10065_v28 }
  0x9a   :  { %8483 = vmatprep.subr.bf16.mxu1 %v9778_v0  ;;  %8435 = vmatprep.subr.bf16.mxu0 %v9778_v0 }
  0x9d   :  { %8485 = vmatpush1.bf16.msra.mxu1 %v10080_v32  ;;  %8437 = vmatpush1.bf16.msra.mxu0 %v10080_v32 }
  0x9e   :  { %8486 = vmatprep.subr.bf16.mxu1 %v9778_v0  ;;  %8438 = vmatprep.subr.bf16.mxu0 %v9778_v0 }
  0xa1   :  { %8488 = vmatpush1.bf16.msra.mxu1 %v10092_v35  ;;  %8440 = vmatpush1.bf16.msra.mxu0 %v10092_v35 }
  0xa2   :  { %8489 = vmatprep.subr.bf16.mxu1 %v9778_v0  ;;  %8441 = vmatprep.subr.bf16.mxu0 %v9778_v0 }
  0xa5   :  { %8491 = vmatpush1.bf16.msra.mxu1 %v10104_v38  ;;  %8443 = vmatpush1.bf16.msra.mxu0 %v10104_v38 }
  0xa6   :  { %8492 = vmatprep.subr.bf16.mxu1 %v9778_v0  ;;  %8444 = vmatprep.subr.bf16.mxu0 %v9778_v0 }
  0xa9   :  { %8494 = vmatpush1.bf16.msra.mxu1 %v10116_v41  ;;  %8446 = vmatpush1.bf16.msra.mxu0 %v10116_v41 }
  0xaa   :  { %8495 = vmatprep.subr.bf16.mxu1 %v9778_v0  ;;  %8447 = vmatprep.subr.bf16.mxu0 %v9778_v0 }
  0xad   :  { %8497 = vmatpush1.bf16.msra.mxu1 %v10128_v44  ;;  %8449 = vmatpush1.bf16.msra.mxu0 %v10128_v44 }
  0xae   :  { %8498 = vmatprep.subr.bf16.mxu1 %v9778_v0  ;;  %8450 = vmatprep.subr.bf16.mxu0 %v9778_v0 }
  0xb1   :  { %8500 = vmatpush1.bf16.msra.mxu1 %v10140_v47  ;;  %8452 = vmatpush1.bf16.msra.mxu0 %v10140_v47 }
  0xb2   :  { %8501 = vmatprep.subr.bf16.mxu1 %v9778_v0  ;;  %8453 = vmatprep.subr.bf16.mxu0 %v9778_v0 }
  0xb5   :  { %8503 = vmatpush1.bf16.msra.mxu1 %v10152_v52  ;;  %8455 = vmatpush1.bf16.msra.mxu0 %v10152_v52 }
  0xb6   :  { %8520 = vmatprep.subr.bf16.mxu1 %v9778_v0  ;;  %8505 = vmatprep.subr.bf16.mxu0 %v8504_v53  ;;  %v7184_v53 = vld [vmem:[%s13112_s24 + $0x268] sm:$0xff] }
  0xb8   :  { %561 = vmatmul.mubr.f32.vlgmr.msra.gmra.mrb[0].mxu1 %v7163_v58  ;;  %291 = vmatmul.mubr.f32.vlgmr.msra.gmra.mrb[0].mxu0 %v170_v60  ;;  %v190_v58 = vld [vmem:[%s13112_s24 + $0xa0] sm:$0xff]  ;;  %v7185_v60 = vld [vmem:[%s13112_s24 + $0x270] sm:$0xff] }
  0xb9   :  { %565 = vmatprep.mubr.f32.mxu1 %v7166_v59  ;;  %295 = vmatprep.mubr.f32.mxu0 %v173_v62  ;;  %v193_v59 = vld [vmem:[%s13112_s24 + $0xb8] sm:$0xff]  ;;  %v192_v62 = vld [vmem:[%s13112_s24 + $0xb0] sm:$0xff] }
  0xba   :  { %8507 = vmatpush1.bf16.msra.mxu0 %v8506_v61  ;;  %8522 = vmatpush1.bf16.msra.mxu1 %v9972_v4  ;;  %v7188_v61 = vld [vmem:[%s13112_s24 + $0x288] sm:$0xff] }
  0xbb   :  { %8509 = vmatprep.subr.bf16.mxu0 %v8508_v63  ;;  %8523 = vmatprep.subr.bf16.mxu1 %v9778_v0  ;;  %v195_v63 = vld [vmem:[%s13112_s24 + $0xc8] sm:$0xff] }
  0xbc   :  { %566 = vmatmul.mubr.f32.gmra.mrb[2].mxu1 %v7165_v3  ;;  %296 = vmatmul.mubr.f32.gmra.mrb[2].mxu0 %v172_v7  ;;  %v194_v3 = vld [vmem:[%s13112_s24 + $0xc0] sm:$0xff]  ;;  %v7189_v7 = vld [vmem:[%s13112_s24 + $0x290] sm:$0xff] }
  0xbd   :  { %570 = vmatprep.mubr.f32.mxu1 %v7168_v5  ;;  %300 = vmatprep.mubr.f32.mxu0 %v175_v10  ;;  %v197_v5 = vld [vmem:[%s13112_s24 + $0xd8] sm:$0xff]  ;;  %v196_v10 = vld [vmem:[%s13112_s24 + $0xd0] sm:$0xff] }
  0xbe   :  { %8511 = vmatpush1.bf16.msra.mxu0 %v8510_v8  ;;  %8525 = vmatpush1.bf16.msra.mxu1 %v9978_v6  ;;  %v7192_v8 = vld [vmem:[%s13112_s24 + $0x2a8] sm:$0xff] }
  0xbf   :  { %8526 = vmatprep.subr.bf16.mxu1 %v9778_v0 }
  0xc0   :  { %571 = vmatmul.mubr.f32.gmra.mrb[4].mxu1 %v7167_v11  ;;  %301 = vmatmul.mubr.f32.gmra.mrb[4].mxu0 %v174_v14  ;;  %v199_v11 = vld [vmem:[%s13112_s24 + $0xe8] sm:$0xff]  ;;  %v7194_v14 = vld [vmem:[%s13112_s24 + $0x2b8] sm:$0xff] }
  0xc1   :  { %575 = vmatprep.mubr.f32.mxu1 %v7170_v12  ;;  %305 = vmatprep.mubr.f32.mxu0 %v177_v15  ;;  %v7191_v12 = vld [vmem:[%s13112_s24 + $0x2a0] sm:$0xff] }
  0xc2   :  { %8528 = vmatpush1.bf16.msra.mxu1 %v9990_v9  ;;  %v198_v15 = vld [vmem:[%s13112_s24 + $0xe0] sm:$0xff] }
  0xc3   :  { %8529 = vmatprep.subr.bf16.mxu1 %v9778_v0 }
  0xc4   :  { %576 = vmatmul.mubr.f32.gmra.mrb[6].mxu1 %v7169_v17  ;;  %306 = vmatmul.mubr.f32.gmra.mrb[6].mxu0 %v176_v20  ;;  %v201_v17 = vld [vmem:[%s13112_s24 + $0xf8] sm:$0xff]  ;;  %v7196_v20 = vld [vmem:[%s13112_s24 + $0x2c8] sm:$0xff] }
  0xc5   :  { %580 = vmatprep.mubr.f32.mxu1 %v7172_v18  ;;  %310 = vmatprep.mubr.f32.mxu0 %v179_v21  ;;  %v7193_v18 = vld [vmem:[%s13112_s24 + $0x2b0] sm:$0xff] }
  0xc6   :  { %8531 = vmatpush1.bf16.msra.mxu1 %v10005_v13  ;;  %v200_v21 = vld [vmem:[%s13112_s24 + $0xf0] sm:$0xff] }
  0xc7   :  { %8532 = vmatprep.subr.bf16.mxu1 %v9778_v0 }
  0xc8   :  { %581 = vmatmul.mubr.f32.gmra.mrb[8].mxu1 %v7171_v23  ;;  %311 = vmatmul.mubr.f32.gmra.mrb[8].mxu0 %v178_v26  ;;  %v203_v23 = vld [vmem:[%s13112_s24 + $0x108] sm:$0xff]  ;;  %v7198_v26 = vld [vmem:[%s13112_s24 + $0x2d8] sm:$0xff] }
  0xc9   :  { %585 = vmatprep.mubr.f32.mxu1 %v7174_v24  ;;  %315 = vmatprep.mubr.f32.mxu0 %v181_v27  ;;  %v7195_v24 = vld [vmem:[%s13112_s24 + $0x2c0] sm:$0xff] }
  0xca   :  { %8534 = vmatpush1.bf16.msra.mxu1 %v10017_v16  ;;  %v202_v27 = vld [vmem:[%s13112_s24 + $0x100] sm:$0xff] }
  0xcb   :  { %8535 = vmatprep.subr.bf16.mxu1 %v9778_v0 }
  0xcc   :  { %586 = vmatmul.mubr.f32.gmra.mrb[10].mxu1 %v7173_v29  ;;  %316 = vmatmul.mubr.f32.gmra.mrb[10].mxu0 %v180_v31  ;;  %v205_v29 = vld [vmem:[%s13112_s24 + $0x118] sm:$0xff]  ;;  %v7200_v31 = vld [vmem:[%s13112_s24 + $0x2e8] sm:$0xff] }
  0xcd   :  { %590 = vmatprep.mubr.f32.mxu1 %v7176_v30  ;;  %320 = vmatprep.mubr.f32.mxu0 %v183_v33  ;;  %v7197_v30 = vld [vmem:[%s13112_s24 + $0x2d0] sm:$0xff] }
  0xce   :  { %8537 = vmatpush1.bf16.msra.mxu1 %v10029_v19  ;;  %v204_v33 = vld [vmem:[%s13112_s24 + $0x110] sm:$0xff] }
  0xcf   :  { %8538 = vmatprep.subr.bf16.mxu1 %v9778_v0 }
  0xd0   :  { %591 = vmatmul.mubr.f32.gmra.mrb[12].mxu1 %v7175_v34  ;;  %321 = vmatmul.mubr.f32.gmra.mrb[12].mxu0 %v182_v37  ;;  %v207_v34 = vld [vmem:[%s13112_s24 + $0x128] sm:$0xff]  ;;  %v7202_v37 = vld [vmem:[%s13112_s24 + $0x2f8] sm:$0xff] }
  0xd1   :  { %595 = vmatprep.mubr.f32.mxu1 %v7178_v36  ;;  %325 = vmatprep.mubr.f32.mxu0 %v185_v39  ;;  %v7199_v36 = vld [vmem:[%s13112_s24 + $0x2e0] sm:$0xff] }
  0xd2   :  { %8540 = vmatpush1.bf16.msra.mxu1 %v10041_v22  ;;  %v206_v39 = vld [vmem:[%s13112_s24 + $0x120] sm:$0xff] }
  0xd3   :  { %8541 = vmatprep.subr.bf16.mxu1 %v9778_v0 }
  0xd4   :  { %596 = vmatmul.mubr.f32.gmra.mrb[14].mxu1 %v7177_v40  ;;  %326 = vmatmul.mubr.f32.gmra.mrb[14].mxu0 %v184_v43  ;;  %v209_v40 = vld [vmem:[%s13112_s24 + $0x138] sm:$0xff]  ;;  %v7204_v43 = vld [vmem:[%s13112_s24 + $0x308] sm:$0xff] }
  0xd5   :  { %600 = vmatprep.mubr.f32.mxu1 %v7180_v42  ;;  %330 = vmatprep.mubr.f32.mxu0 %v187_v45  ;;  %v7201_v42 = vld [vmem:[%s13112_s24 + $0x2f0] sm:$0xff] }
  0xd6   :  { %8543 = vmatpush1.bf16.msra.mxu1 %v10053_v25  ;;  %v208_v45 = vld [vmem:[%s13112_s24 + $0x130] sm:$0xff] }
  0xd7   :  { %8544 = vmatprep.subr.bf16.mxu1 %v9778_v0 }
  0xd8   :  { %601 = vmatmul.mubr.f32.gmra.mrb[16].mxu1 %v7179_v46  ;;  %331 = vmatmul.mubr.f32.gmra.mrb[16].mxu0 %v186_v49  ;;  %v211_v46 = vld [vmem:[%s13112_s24 + $0x148] sm:$0xff]  ;;  %v7206_v49 = vld [vmem:[%s13112_s24 + $0x318] sm:$0xff] }
  0xd9   :  { %605 = vmatprep.mubr.f32.mxu1 %v7182_v48  ;;  %335 = vmatprep.mubr.f32.mxu0 %v189_v50  ;;  %v7203_v48 = vld [vmem:[%s13112_s24 + $0x300] sm:$0xff] }
  0xda   :  { %8546 = vmatpush1.bf16.msra.mxu1 %v10065_v28  ;;  %v210_v50 = vld [vmem:[%s13112_s24 + $0x140] sm:$0xff] }
  0xdb   :  { %8547 = vmatprep.subr.bf16.mxu1 %v9778_v0 }
  0xdc   :  { %606 = vmatmul.mubr.f32.gmra.mrb[18].mxu1 %v7181_v51  ;;  %336 = vmatmul.mubr.f32.gmra.mrb[18].mxu0 %v188_v54  ;;  %v213_v51 = vld [vmem:[%s13112_s24 + $0x158] sm:$0xff]  ;;  %v7208_v54 = vld [vmem:[%s13112_s24 + $0x328] sm:$0xff] }
  0xdd   :  { %610 = vmatprep.mubr.f32.mxu1 %v7184_v53  ;;  %340 = vmatprep.mubr.f32.mxu0 %v191_v55  ;;  %v7205_v53 = vld [vmem:[%s13112_s24 + $0x310] sm:$0xff] }
  0xde   :  { %8549 = vmatpush1.bf16.msra.mxu1 %v10080_v32  ;;  %v212_v55 = vld [vmem:[%s13112_s24 + $0x150] sm:$0xff] }
  0xdf   :  { %8550 = vmatprep.subr.bf16.mxu1 %v9778_v0 }
  0xe0   :  { %611 = vmatmul.mubr.f32.gmra.mrb[20].mxu1 %v7183_v56  ;;  %341 = vmatmul.mubr.f32.gmra.mrb[20].mxu0 %v190_v58  ;;  %v215_v56 = vld [vmem:[%s13112_s24 + $0x168] sm:$0xff]  ;;  %v7210_v58 = vld [vmem:[%s13112_s24 + $0x338] sm:$0xff] }
  0xe1   :  { %615 = vmatprep.mubr.f32.mxu1 %v7186_v57  ;;  %345 = vmatprep.mubr.f32.mxu0 %v193_v59  ;;  %v7207_v57 = vld [vmem:[%s13112_s24 + $0x320] sm:$0xff] }
  0xe2   :  { %8552 = vmatpush1.bf16.msra.mxu1 %v10092_v35  ;;  %v214_v59 = vld [vmem:[%s13112_s24 + $0x160] sm:$0xff] }
  0xe3   :  { %8553 = vmatprep.subr.bf16.mxu1 %v9778_v0 }
  0xe4   :  { %616 = vmatmul.mubr.f32.gmra.mrb[22].mxu1 %v7185_v60  ;;  %346 = vmatmul.mubr.f32.gmra.mrb[22].mxu0 %v192_v62  ;;  %v217_v60 = vld [vmem:[%s13112_s24 + $0x178] sm:$0xff]  ;;  %v7212_v62 = vld [vmem:[%s13112_s24 + $0x348] sm:$0xff] }
  0xe5   :  { %620 = vmatprep.mubr.f32.mxu1 %v7188_v61  ;;  %350 = vmatprep.mubr.f32.mxu0 %v195_v63  ;;  %v7209_v61 = vld [vmem:[%s13112_s24 + $0x330] sm:$0xff] }
  0xe6   :  { %8555 = vmatpush1.bf16.msra.mxu1 %v10104_v38  ;;  %v216_v63 = vld [vmem:[%s13112_s24 + $0x170] sm:$0xff] }
  0xe7   :  { %8556 = vmatprep.subr.bf16.mxu1 %v9778_v0 }
  0xe8   :  { %621 = vmatmul.mubr.f32.gmra.mrb[24].mxu1 %v7187_v1  ;;  %351 = vmatmul.mubr.f32.gmra.mrb[24].mxu0 %v194_v3  ;;  %v219_v1 = vld [vmem:[%s13112_s24 + $0x188] sm:$0xff]  ;;  %v7214_v3 = vld [vmem:[%s13112_s24 + $0x358] sm:$0xff] }
  0xe9   :  { %625 = vmatprep.mubr.f32.mxu1 %v7190_v2  ;;  %355 = vmatprep.mubr.f32.mxu0 %v197_v5  ;;  %v7211_v2 = vld [vmem:[%s13112_s24 + $0x340] sm:$0xff] }
  0xea   :  { %8558 = vmatpush1.bf16.msra.mxu1 %v10116_v41  ;;  %v218_v5 = vld [vmem:[%s13112_s24 + $0x180] sm:$0xff] }
  0xeb   :  { %8559 = vmatprep.subr.bf16.mxu1 %v9778_v0 }
  0xec   :  { %626 = vmatmul.mubr.f32.gmra.mrb[26].mxu1 %v7189_v7  ;;  %356 = vmatmul.mubr.f32.gmra.mrb[26].mxu0 %v196_v10  ;;  %v221_v7 = vld [vmem:[%s13112_s24 + $0x198] sm:$0xff]  ;;  %v7216_v10 = vld [vmem:[%s13112_s24 + $0x368] sm:$0xff] }
  0xed   :  { %630 = vmatprep.mubr.f32.mxu1 %v7192_v8  ;;  %360 = vmatprep.mubr.f32.mxu0 %v199_v11  ;;  %v7213_v8 = vld [vmem:[%s13112_s24 + $0x350] sm:$0xff] }
  0xee   :  { %8561 = vmatpush1.bf16.msra.mxu1 %v10128_v44  ;;  %v220_v11 = vld [vmem:[%s13112_s24 + $0x190] sm:$0xff] }
  0xef   :  { %8562 = vmatprep.subr.bf16.mxu1 %v9778_v0 }
  0xf0   :  { %631 = vmatmul.mubr.f32.gmra.mrb[28].mxu1 %v7191_v12  ;;  %361 = vmatmul.mubr.f32.gmra.mrb[28].mxu0 %v198_v15  ;;  %v223_v12 = vld [vmem:[%s13112_s24 + $0x1a8] sm:$0xff]  ;;  %v7218_v15 = vld [vmem:[%s13112_s24 + $0x378] sm:$0xff] }
  0xf1   :  { %635 = vmatprep.mubr.f32.mxu1 %v7194_v14  ;;  %365 = vmatprep.mubr.f32.mxu0 %v201_v17  ;;  %v7215_v14 = vld [vmem:[%s13112_s24 + $0x360] sm:$0xff] }
  0xf2   :  { %8564 = vmatpush1.bf16.msra.mxu1 %v10140_v47  ;;  %v222_v17 = vld [vmem:[%s13112_s24 + $0x1a0] sm:$0xff] }
  0xf3   :  { %8565 = vmatprep.subr.bf16.mxu1 %v9778_v0 }
  0xf4   :  { %636 = vmatmul.mubr.f32.gmra.mrb[30].mxu1 %v7193_v18  ;;  %366 = vmatmul.mubr.f32.gmra.mrb[30].mxu0 %v200_v21  ;;  %v225_v18 = vld [vmem:[%s13112_s24 + $0x1b8] sm:$0xff] }
  0xf5   :  { %640 = vmatprep.mubr.f32.mxu1 %v7196_v20  ;;  %370 = vmatprep.mubr.f32.mxu0 %v203_v23  ;;  %v432_v20 = vld [vmem:[#allocation2 + $0x8] sm:$0xff]  ;;  %v434_v21 = vld [vmem:[#allocation2 + $0x18] sm:$0xff]  ;;  %v7217_v23 = vld [vmem:[%s13112_s24 + $0x370] sm:$0xff] }
  0xf6   :  { %8567 = vmatpush1.bf16.msra.mxu1 %v10152_v52 }
  0xf7   :  { %8576 = vmatprep.subr.bf16.mxu1 %v9778_v0 }
  0xf8   :  { %641 = vmatmul.mubr.f32.gmra.mrb[32].mxu1 %v7195_v24  ;;  %371 = vmatmul.mubr.f32.gmra.mrb[32].mxu0 %v202_v27  ;;  %v8512_v24 = vpack.c.bf16 %v434_v21, %v432_v20  ;;  %v7276_v27 = vld [vmem:[%s13112_s24 + $0x388] sm:$0xff]  ;;  %v7315_v20 = vld [vmem:[%s13112_s24 + $0x4c0] sm:$0xff]  ;;  %v7318_v21 = vld [vmem:[%s13112_s24 + $0x4d8] sm:$0xff] }
  0xf9   :  { %645 = vmatprep.mubr.f32.mxu1 %v7198_v26  ;;  %375 = vmatprep.mubr.f32.mxu0 %v205_v29  ;;  %v224_v26 = vld [vmem:[%s13112_s24 + $0x1b0] sm:$0xff]  ;;  %v7275_v29 = vld [vmem:[%s13112_s24 + $0x380] sm:$0xff] }
  0xfa   :  { %8513 = vmatprep.subr.bf16.mxu0 %v8512_v24  ;;  %v7320_v24 = vld [vmem:[%s13112_s24 + $0x4e8] sm:$0xff] }
  0xfc   :  { %646 = vmatmul.mubr.f32.gmra.mrb[34].mxu1 %v7197_v30  ;;  %376 = vmatmul.mubr.f32.gmra.mrb[34].mxu0 %v204_v33  ;;  %v9779_v30 = vmov 0.0   ;;  %v7277_v33 = vld [vmem:[%s13112_s24 + $0x390] sm:$0xff] }
  0xfd   :  { %650 = vmatprep.mubr.f32.mxu1 %v7200_v31  ;;  %380 = vmatprep.mubr.f32.mxu0 %v207_v34  ;;  %v7278_v31 = vld [vmem:[%s13112_s24 + $0x398] sm:$0xff]  ;;  %v7280_v34 = vld [vmem:[%s13112_s24 + $0x3a8] sm:$0xff] }
 0x100   :  { %651 = vmatmul.mubr.f32.gmra.mrb[36].mxu1 %v7199_v36  ;;  %381 = vmatmul.mubr.f32.gmra.mrb[36].mxu0 %v206_v39  ;;  %v7279_v36 = vld [vmem:[%s13112_s24 + $0x3a0] sm:$0xff]  ;;  %v7281_v39 = vld [vmem:[%s13112_s24 + $0x3b0] sm:$0xff] }
 0x101   :  { %655 = vmatprep.mubr.f32.mxu1 %v7202_v37  ;;  %385 = vmatprep.mubr.f32.mxu0 %v209_v40  ;;  %v7282_v37 = vld [vmem:[%s13112_s24 + $0x3b8] sm:$0xff]  ;;  %v7284_v40 = vld [vmem:[%s13112_s24 + $0x3c8] sm:$0xff] }
 0x104   :  { %656 = vmatmul.mubr.f32.gmra.mrb[38].mxu1 %v7201_v42  ;;  %386 = vmatmul.mubr.f32.gmra.mrb[38].mxu0 %v208_v45  ;;  %v7283_v42 = vld [vmem:[%s13112_s24 + $0x3c0] sm:$0xff]  ;;  %v7285_v45 = vld [vmem:[%s13112_s24 + $0x3d0] sm:$0xff] }
 0x105   :  { %660 = vmatprep.mubr.f32.mxu1 %v7204_v43  ;;  %390 = vmatprep.mubr.f32.mxu0 %v211_v46  ;;  %v7286_v43 = vld [vmem:[%s13112_s24 + $0x3d8] sm:$0xff]  ;;  %v7288_v46 = vld [vmem:[%s13112_s24 + $0x3e8] sm:$0xff] }
 0x108   :  { %661 = vmatmul.mubr.f32.gmra.mrb[40].mxu1 %v7203_v48  ;;  %391 = vmatmul.mubr.f32.gmra.mrb[40].mxu0 %v210_v50  ;;  %v7287_v48 = vld [vmem:[%s13112_s24 + $0x3e0] sm:$0xff]  ;;  %v7289_v50 = vld [vmem:[%s13112_s24 + $0x3f0] sm:$0xff] }
 0x109   :  { %665 = vmatprep.mubr.f32.mxu1 %v7206_v49  ;;  %395 = vmatprep.mubr.f32.mxu0 %v213_v51  ;;  %v7290_v49 = vld [vmem:[%s13112_s24 + $0x3f8] sm:$0xff]  ;;  %v7292_v51 = vld [vmem:[%s13112_s24 + $0x408] sm:$0xff] }
 0x10c   :  { %666 = vmatmul.mubr.f32.gmra.mrb[42].mxu1 %v7205_v53  ;;  %396 = vmatmul.mubr.f32.gmra.mrb[42].mxu0 %v212_v55  ;;  %v7291_v53 = vld [vmem:[%s13112_s24 + $0x400] sm:$0xff]  ;;  %v7293_v55 = vld [vmem:[%s13112_s24 + $0x410] sm:$0xff] }
 0x10d   :  { %670 = vmatprep.mubr.f32.mxu1 %v7208_v54  ;;  %400 = vmatprep.mubr.f32.mxu0 %v215_v56  ;;  %v7294_v54 = vld [vmem:[%s13112_s24 + $0x418] sm:$0xff]  ;;  %v7296_v56 = vld [vmem:[%s13112_s24 + $0x428] sm:$0xff] }
 0x110   :  { %671 = vmatmul.mubr.f32.gmra.mrb[44].mxu1 %v7207_v57  ;;  %401 = vmatmul.mubr.f32.gmra.mrb[44].mxu0 %v214_v59  ;;  %v7295_v57 = vld [vmem:[%s13112_s24 + $0x420] sm:$0xff]  ;;  %v7297_v59 = vld [vmem:[%s13112_s24 + $0x430] sm:$0xff] }
 0x111   :  { %675 = vmatprep.mubr.f32.mxu1 %v7210_v58  ;;  %405 = vmatprep.mubr.f32.mxu0 %v217_v60  ;;  %v7298_v58 = vld [vmem:[%s13112_s24 + $0x438] sm:$0xff]  ;;  %v7300_v60 = vld [vmem:[%s13112_s24 + $0x448] sm:$0xff] }
 0x114   :  { %676 = vmatmul.mubr.f32.gmra.mrb[46].mxu1 %v7209_v61  ;;  %406 = vmatmul.mubr.f32.gmra.mrb[46].mxu0 %v216_v63  ;;  %v7299_v61 = vld [vmem:[%s13112_s24 + $0x440] sm:$0xff]  ;;  %v7301_v63 = vld [vmem:[%s13112_s24 + $0x450] sm:$0xff] }
 0x115   :  { %680 = vmatprep.mubr.f32.mxu1 %v7212_v62  ;;  %410 = vmatprep.mubr.f32.mxu0 %v219_v1  ;;  %v7302_v62 = vld [vmem:[%s13112_s24 + $0x458] sm:$0xff]  ;;  %v7304_v1 = vld [vmem:[%s13112_s24 + $0x468] sm:$0xff] }
 0x118   :  { %681 = vmatmul.mubr.f32.gmra.mrb[48].mxu1 %v7211_v2  ;;  %411 = vmatmul.mubr.f32.gmra.mrb[48].mxu0 %v218_v5  ;;  %v7303_v2 = vld [vmem:[%s13112_s24 + $0x460] sm:$0xff]  ;;  %v7305_v5 = vld [vmem:[%s13112_s24 + $0x470] sm:$0xff] }
 0x119   :  { %685 = vmatprep.mubr.f32.mxu1 %v7214_v3  ;;  %415 = vmatprep.mubr.f32.mxu0 %v221_v7  ;;  %v7306_v3 = vld [vmem:[%s13112_s24 + $0x478] sm:$0xff]  ;;  %v7308_v7 = vld [vmem:[%s13112_s24 + $0x488] sm:$0xff] }
 0x11c   :  { %686 = vmatmul.mubr.f32.gmra.mrb[50].mxu1 %v7213_v8  ;;  %416 = vmatmul.mubr.f32.gmra.mrb[50].mxu0 %v220_v11  ;;  %v7307_v8 = vld [vmem:[%s13112_s24 + $0x480] sm:$0xff]  ;;  %v7309_v11 = vld [vmem:[%s13112_s24 + $0x490] sm:$0xff] }
 0x11d   :  { %690 = vmatprep.mubr.f32.mxu1 %v7216_v10  ;;  %420 = vmatprep.mubr.f32.mxu0 %v223_v12  ;;  %v7310_v10 = vld [vmem:[%s13112_s24 + $0x498] sm:$0xff]  ;;  %v7312_v12 = vld [vmem:[%s13112_s24 + $0x4a8] sm:$0xff] }
 0x120   :  { %691 = vmatmul.mubr.f32.gmra.mrb[52].mxu1 %v7215_v14  ;;  %421 = vmatmul.mubr.f32.gmra.mrb[52].mxu0 %v222_v17  ;;  %v7311_v14 = vld [vmem:[%s13112_s24 + $0x4a0] sm:$0xff]  ;;  %v7313_v17 = vld [vmem:[%s13112_s24 + $0x4b0] sm:$0xff] }
 0x121   :  { %695 = vmatprep.mubr.f32.mxu1 %v7218_v15  ;;  %425 = vmatprep.mubr.f32.mxu0 %v225_v18  ;;  %v7314_v15 = vld [vmem:[%s13112_s24 + $0x4b8] sm:$0xff]  ;;  %v7316_v18 = vld [vmem:[%s13112_s24 + $0x4c8] sm:$0xff] }
 0x124   :  { %696 = vmatmul.mubr.f32.gmra.mrb[54].mxu1 %v7217_v23  ;;  %426 = vmatmul.mubr.f32.gmra.mrb[54].mxu0 %v224_v26  ;;  %v7317_v23 = vld [vmem:[%s13112_s24 + $0x4d0] sm:$0xff]  ;;  %v7319_v26 = vld [vmem:[%s13112_s24 + $0x4e0] sm:$0xff] }
 0x125   :  { %1466 = vmatprep.mubr.f32.mxu1 %v7276_v27  ;;  %859 = vmatprep.mubr.f32.mxu0 %v9779_v30  ;;  %v7322_v27 = vld [vmem:[%s13112_s24 + $0x4f8] sm:$0xff] }
 0x128   :  { %1467 = vmatmul.mubr.f32.vlgmr.msra.gmra.mrb[56].mxu1 %v7275_v29  ;;  %v7321_v29 = vld [vmem:[%s13112_s24 + $0x4f0] sm:$0xff] }
 0x129   :  { %1471 = vmatprep.mubr.f32.mxu1 %v7278_v31  ;;  %8578 = vmatpush1.bf16.msra.mxu1 %v9972_v4  ;;  %v7324_v31 = vld [vmem:[%s13112_s24 + $0x508] sm:$0xff] }
 0x12a   :  { %8579 = vmatprep.subr.bf16.mxu1 %v9778_v0 }
 0x12c   :  { %1472 = vmatmul.mubr.f32.gmra.mrb[58].mxu1 %v7277_v33  ;;  %v7323_v33 = vld [vmem:[%s13112_s24 + $0x500] sm:$0xff] }
 0x12d   :  { %1476 = vmatprep.mubr.f32.mxu1 %v7280_v34  ;;  %8581 = vmatpush1.bf16.msra.mxu1 %v9978_v6  ;;  %v431_v34 = vld [vmem:[#allocation2] sm:$0xff] }
 0x12e   :  { %8582 = vmatprep.subr.bf16.mxu1 %v9778_v0 }
 0x130   :  { %1477 = vmatmul.mubr.f32.gmra.mrb[60].mxu1 %v7279_v36  ;;  %v433_v36 = vld [vmem:[#allocation2 + $0x10] sm:$0xff] }
 0x131   :  { %1481 = vmatprep.mubr.f32.mxu1 %v7282_v37  ;;  %8584 = vmatpush1.bf16.msra.mxu1 %v9990_v9  ;;  %v7326_v37 = vld [vmem:[%s13112_s24 + $0x518] sm:$0xff] }
 0x132   :  { %8585 = vmatprep.subr.bf16.mxu1 %v9778_v0 }
 0x134   :  { %1482 = vmatmul.mubr.f32.gmra.mrb[62].mxu1 %v7281_v39  ;;  %v436_v39 = vld [vmem:[#allocation2 + $0x28] sm:$0xff] }
 0x135   :  { %1486 = vmatprep.mubr.f32.mxu1 %v7284_v40  ;;  %8587 = vmatpush1.bf16.msra.mxu1 %v10005_v13  ;;  %v438_v40 = vld [vmem:[#allocation2 + $0x38] sm:$0xff] }
 0x136   :  { %8588 = vmatprep.subr.bf16.mxu1 %v9778_v0 }
 0x138   :  { %1487 = vmatmul.mubr.f32.gmra.mrb[64].mxu1 %v7283_v42  ;;  %v8514_v42 = vpack.c.bf16 %v433_v36, %v431_v34 }
 0x139   :  { %1491 = vmatprep.mubr.f32.mxu1 %v7286_v43  ;;  %8590 = vmatpush1.bf16.msra.mxu1 %v10017_v16  ;;  %v7325_v43 = vld [vmem:[%s13112_s24 + $0x510] sm:$0xff] }
 0x13a   :  { %8591 = vmatprep.subr.bf16.mxu1 %v9778_v0 }
 0x13c   :  { %1492 = vmatmul.mubr.f32.gmra.mrb[66].mxu1 %v7285_v45  ;;  %v8516_v45 = vpack.c.bf16 %v438_v40, %v436_v39 }
 0x13d   :  { %1496 = vmatprep.mubr.f32.mxu1 %v7288_v46  ;;  %8593 = vmatpush1.bf16.msra.mxu1 %v10029_v19  ;;  %v435_v46 = vld [vmem:[#allocation2 + $0x20] sm:$0xff] }
 0x13e   :  { %8594 = vmatprep.subr.bf16.mxu1 %v9778_v0 }
 0x140   :  { %1497 = vmatmul.mubr.f32.gmra.mrb[68].mxu1 %v7287_v48  ;;  %v437_v48 = vld [vmem:[#allocation2 + $0x30] sm:$0xff] }
 0x141   :  { %1501 = vmatprep.mubr.f32.mxu1 %v7290_v49  ;;  %8596 = vmatpush1.bf16.msra.mxu1 %v10041_v22 }
 0x142   :  { %8597 = vmatprep.subr.bf16.mxu1 %v9778_v0 }
 0x144   :  { %1502 = vmatmul.mubr.f32.gmra.mrb[70].mxu1 %v7289_v50  ;;  %v7328_v50 = vld [vmem:[%s13112_s24 + $0x528] sm:$0xff] }
 0x145   :  { %1506 = vmatprep.mubr.f32.mxu1 %v7292_v51  ;;  %8599 = vmatpush1.bf16.msra.mxu1 %v10053_v25 }
 0x146   :  { %8600 = vmatprep.subr.bf16.mxu1 %v9778_v0 }
 0x148   :  { %1507 = vmatmul.mubr.f32.gmra.mrb[72].mxu1 %v7291_v53 }
 0x149   :  { %1511 = vmatprep.mubr.f32.mxu1 %v7294_v54  ;;  %8602 = vmatpush1.bf16.msra.mxu1 %v10065_v28  ;;  %v8518_v54 = vpack.c.bf16 %v437_v48, %v435_v46 }
 0x14a   :  { %8603 = vmatprep.subr.bf16.mxu1 %v9778_v0 }
 0x14c   :  { %1512 = vmatmul.mubr.f32.gmra.mrb[74].mxu1 %v7293_v55 }
 0x14d   :  { %1516 = vmatprep.mubr.f32.mxu1 %v7296_v56  ;;  %8605 = vmatpush1.bf16.msra.mxu1 %v10080_v32  ;;  %v7327_v56 = vld [vmem:[%s13112_s24 + $0x520] sm:$0xff] }
 0x14e   :  { %8606 = vmatprep.subr.bf16.mxu1 %v9778_v0 }
 0x150   :  { %1517 = vmatmul.mubr.f32.gmra.mrb[76].mxu1 %v7295_v57 }
 0x151   :  { %1521 = vmatprep.mubr.f32.mxu1 %v7298_v58  ;;  %8608 = vmatpush1.bf16.msra.mxu1 %v10092_v35  ;;  %v7330_v58 = vld [vmem:[%s13112_s24 + $0x538] sm:$0xff] }
 0x152   :  { %8609 = vmatprep.subr.bf16.mxu1 %v9778_v0 }
 0x154   :  { %1522 = vmatmul.mubr.f32.gmra.mrb[78].mxu1 %v7297_v59 }
 0x155   :  { %1526 = vmatprep.mubr.f32.mxu1 %v7300_v60  ;;  %8611 = vmatpush1.bf16.msra.mxu1 %v10104_v38 }
 0x156   :  { %8612 = vmatprep.subr.bf16.mxu1 %v9778_v0 }
 0x158   :  { %1527 = vmatmul.mubr.f32.gmra.mrb[80].mxu1 %v7299_v61  ;;  %v1609_v61 = vld [vmem:[#allocation2 + $0x88] sm:$0xff] }
 0x159   :  { %1531 = vmatprep.mubr.f32.mxu1 %v7302_v62  ;;  %8614 = vmatpush1.bf16.msra.mxu1 %v10116_v41  ;;  %v1611_v62 = vld [vmem:[#allocation2 + $0x98] sm:$0xff] }
 0x15a   :  { %8615 = vmatprep.subr.bf16.mxu1 %v9778_v0 }
 0x15c   :  { %1532 = vmatmul.mubr.f32.gmra.mrb[82].mxu1 %v7301_v63 }
 0x15d   :  { %1536 = vmatprep.mubr.f32.mxu1 %v7304_v1  ;;  %8617 = vmatpush1.bf16.msra.mxu1 %v10128_v44  ;;  %v7329_v1 = vld [vmem:[%s13112_s24 + $0x530] sm:$0xff] }
 0x15e   :  { %8618 = vmatprep.subr.bf16.mxu1 %v9778_v0 }
 0x160   :  { %1537 = vmatmul.mubr.f32.gmra.mrb[84].mxu1 %v7303_v2  ;;  %v8568_v2 = vpack.c.bf16 %v1611_v62, %v1609_v61 }
 0x161   :  { %1541 = vmatprep.mubr.f32.mxu1 %v7306_v3  ;;  %8620 = vmatpush1.bf16.msra.mxu1 %v10140_v47  ;;  %v7360_v3 = vld [vmem:[%s13112_s24 + $0x548] sm:$0xff] }
 0x162   :  { %8621 = vmatprep.subr.bf16.mxu1 %v9778_v0 }
 0x164   :  { %1542 = vmatmul.mubr.f32.gmra.mrb[86].mxu1 %v7305_v5 }
 0x165   :  { %1546 = vmatprep.mubr.f32.mxu1 %v7308_v7  ;;  %8623 = vmatpush1.bf16.msra.mxu1 %v10152_v52 }
 0x166   :  { %8632 = vmatprep.subr.bf16.mxu1 %v9778_v0 }
 0x168   :  { %1547 = vmatmul.mubr.f32.gmra.mrb[88].mxu1 %v7307_v8 }
 0x169   :  { %1551 = vmatprep.mubr.f32.mxu1 %v7310_v10 }
 0x16c   :  { %1552 = vmatmul.mubr.f32.gmra.mrb[90].mxu1 %v7309_v11  ;;  %v7359_v11 = vld [vmem:[%s13112_s24 + $0x540] sm:$0xff] }
 0x16d   :  { %1556 = vmatprep.mubr.f32.mxu1 %v7312_v12  ;;  %v7362_v12 = vld [vmem:[%s13112_s24 + $0x558] sm:$0xff] }
 0x170   :  { %1557 = vmatmul.mubr.f32.gmra.mrb[92].mxu1 %v7311_v14 }
 0x171   :  { %1561 = vmatprep.mubr.f32.mxu1 %v7314_v15 }
 0x174   :  { %1562 = vmatmul.mubr.f32.gmra.mrb[94].mxu1 %v7313_v17 }
 0x175   :  { %1566 = vmatprep.mubr.f32.mxu1 %v7316_v18 }
 0x178   :  { %1567 = vmatmul.mubr.f32.gmra.mrb[96].mxu1 %v7315_v20  ;;  %v7361_v20 = vld [vmem:[%s13112_s24 + $0x550] sm:$0xff] }
 0x179   :  { %1571 = vmatprep.mubr.f32.mxu1 %v7318_v21  ;;  %v7364_v21 = vld [vmem:[%s13112_s24 + $0x568] sm:$0xff] }
 0x17c   :  { %1572 = vmatmul.mubr.f32.gmra.mrb[98].mxu1 %v7317_v23 }
 0x17d   :  { %1576 = vmatprep.mubr.f32.mxu1 %v7320_v24 }
 0x180   :  { %1577 = vmatmul.mubr.f32.gmra.mrb[100].mxu1 %v7319_v26 }
 0x181   :  { %1581 = vmatprep.mubr.f32.mxu1 %v7322_v27 }
 0x184   :  { %1582 = vmatmul.mubr.f32.gmra.mrb[102].mxu1 %v7321_v29  ;;  %v7363_v29 = vld [vmem:[%s13112_s24 + $0x560] sm:$0xff] }
 0x185   :  { %1586 = vmatprep.mubr.f32.mxu1 %v7324_v31 }
 0x188   :  { %1587 = vmatmul.mubr.f32.gmra.mrb[104].mxu1 %v7323_v33 }
 0x189   :  { %1591 = vmatprep.mubr.f32.mxu1 %v7326_v37  ;;  %v7365_v37 = vld [vmem:[%s13112_s24 + $0x570] sm:$0xff] }
 0x18b   :  { %v562_v49 = vpop.f32.mrb[0].mxu1  ;;  %v10715_v53 = vpop.f32.mrb[0].mxu0 }
 0x18c   :  { %v564_v51 = vpop.f32.mrb[1].mxu1  ;;  %7219 = vmatmul.mubr.msk.f32.vlgmr.msra.gmra.mrb[56].mxu0 %vm710_vm0, %v562_v49  ;;  %1592 = vmatmul.mubr.f32.gmra.mrb[106].mxu1 %v7325_v43  ;;  %v294_v55 = vpop.f32.mrb[1].mxu0 }
 0x18d   :  { %865 = vmatprep.mubr.f32.mxu0 %v9779_v30  ;;  %8515 = vmatpush1.bf16.msra.mxu0 %v8514_v42  ;;  %v7369_v51 = vld [vmem:[%s13112_s24 + $0x590] sm:$0xff] }
 0x18e   :  { %8517 = vmatprep.subr.bf16.mxu0 %v8516_v45  ;;  %1596 = vmatprep.mubr.f32.mxu1 %v7328_v50  ;;  %v7367_v45 = vld [vmem:[%s13112_s24 + $0x580] sm:$0xff] }
 0x18f   :  { %v567_v57 = vpop.f32.mrb[2].mxu1  ;;  %v10725_v60 = vpop.f32.mrb[2].mxu0 }
 0x190   :  { %v569_v59 = vpop.f32.mrb[3].mxu1  ;;  %7220 = vmatmul.mubr.msk.f32.gmra.mrb[58].mxu0 %vm710_vm0, %v567_v57  ;;  %1597 = vmatmul.mubr.f32.gmra.mrb[108].mxu1 %v7327_v56  ;;  %v299_v63 = vpop.f32.mrb[3].mxu0 }
 0x191   :  { %871 = vmatprep.mubr.f32.mxu0 %v9779_v30  ;;  %8519 = vmatpush1.bf16.msra.mxu0 %v8518_v54 }
 0x192   :  { %1601 = vmatprep.mubr.f32.mxu1 %v7330_v58  ;;  %8569 = vmatprep.subr.bf16.mxu0 %v8568_v2  ;;  %v7371_v58 = vld [vmem:[%s13112_s24 + $0x5a0] sm:$0xff] }
 0x193   :  { %v572_v5 = vpop.f32.mrb[4].mxu1  ;;  %v10735_v8 = vpop.f32.mrb[4].mxu0 }
 0x194   :  { %v574_v7 = vpop.f32.mrb[5].mxu1  ;;  %7221 = vmatmul.mubr.msk.f32.gmra.mrb[60].mxu0 %vm710_vm0, %v572_v5  ;;  %1602 = vmatmul.mubr.f32.gmra.mrb[110].mxu1 %v7329_v1  ;;  %v304_v10 = vpop.f32.mrb[5].mxu0  ;;  %v7373_v1 = vld [vmem:[%s13112_s24 + $0x5b0] sm:$0xff] }
 0x195   :  { %877 = vmatprep.mubr.f32.mxu0 %v9779_v30  ;;  %2110 = vmatprep.mubr.f32.mxu1 %v7360_v3  ;;  %v7375_v10 = vld [vmem:[%s13112_s24 + $0x5c0] sm:$0xff] }
 0x197   :  { %v577_v14 = vpop.f32.mrb[6].mxu1  ;;  %v10745_v17 = vpop.f32.mrb[6].mxu0 }
 0x198   :  { %v579_v15 = vpop.f32.mrb[7].mxu1  ;;  %7222 = vmatmul.mubr.msk.f32.gmra.mrb[62].mxu0 %vm710_vm0, %v577_v14  ;;  %2111 = vmatmul.mubr.f32.vlgmr.msra.gmra.mrb[112].mxu1 %v7359_v11  ;;  %v309_v18 = vpop.f32.mrb[7].mxu0 }
 0x199   :  { %883 = vmatprep.mubr.f32.mxu0 %v9779_v30  ;;  %2115 = vmatprep.mubr.f32.mxu1 %v7362_v12  ;;  %v7377_v18 = vld [vmem:[%s13112_s24 + $0x5d0] sm:$0xff] }
 0x19a   :  { %8634 = vmatpush1.bf16.msra.mxu1 %v9972_v4  ;;  %v7366_v4 = vld [vmem:[%s13112_s24 + $0x578] sm:$0xff] }
 0x19b   :  { %v582_v23 = vpop.f32.mrb[8].mxu1  ;;  %8635 = vmatprep.subr.bf16.mxu1 %v9778_v0  ;;  %v10757_v26 = vpop.f32.mrb[8].mxu0 }
 0x19c   :  { %v584_v24 = vpop.f32.mrb[9].mxu1  ;;  %7223 = vmatmul.mubr.msk.f32.gmra.mrb[64].mxu0 %vm710_vm0, %v582_v23  ;;  %2116 = vmatmul.mubr.f32.gmra.mrb[114].mxu1 %v7361_v20  ;;  %v314_v27 = vpop.f32.mrb[9].mxu0 }
 0x19d   :  { %889 = vmatprep.mubr.f32.mxu0 %v9779_v30  ;;  %2120 = vmatprep.mubr.f32.mxu1 %v7364_v21  ;;  %v7379_v27 = vld [vmem:[%s13112_s24 + $0x5e0] sm:$0xff] }
 0x19e   :  { %8637 = vmatpush1.bf16.msra.mxu1 %v9978_v6  ;;  %v7368_v6 = vld [vmem:[%s13112_s24 + $0x588] sm:$0xff] }
 0x19f   :  { %v587_v31 = vpop.f32.mrb[10].mxu1  ;;  %8638 = vmatprep.subr.bf16.mxu1 %v9778_v0  ;;  %v10769_v34 = vpop.f32.mrb[10].mxu0 }
 0x1a0   :  { %v589_v33 = vpop.f32.mrb[11].mxu1  ;;  %7224 = vmatmul.mubr.msk.f32.gmra.mrb[66].mxu0 %vm710_vm0, %v587_v31  ;;  %2121 = vmatmul.mubr.f32.gmra.mrb[116].mxu1 %v7363_v29  ;;  %v319_v36 = vpop.f32.mrb[11].mxu0 }
 0x1a1   :  { %895 = vmatprep.mubr.f32.mxu0 %v9779_v30  ;;  %2125 = vmatprep.mubr.f32.mxu1 %v7366_v4  ;;  %v7381_v36 = vld [vmem:[%s13112_s24 + $0x5f0] sm:$0xff] }
 0x1a2   :  { %8640 = vmatpush1.bf16.msra.mxu1 %v9990_v9  ;;  %v7370_v9 = vld [vmem:[%s13112_s24 + $0x598] sm:$0xff] }
 0x1a3   :  { %v592_v39 = vpop.f32.mrb[12].mxu1  ;;  %8641 = vmatprep.subr.bf16.mxu1 %v9778_v0  ;;  %v10781_v42 = vpop.f32.mrb[12].mxu0 }
 0x1a4   :  { %v594_v40 = vpop.f32.mrb[13].mxu1  ;;  %7225 = vmatmul.mubr.msk.f32.gmra.mrb[68].mxu0 %vm710_vm0, %v592_v39  ;;  %2126 = vmatmul.mubr.f32.gmra.mrb[118].mxu1 %v7365_v37  ;;  %v324_v43 = vpop.f32.mrb[13].mxu0 }
 0x1a5   :  { %901 = vmatprep.mubr.f32.mxu0 %v9779_v30  ;;  %2130 = vmatprep.mubr.f32.mxu1 %v7368_v6  ;;  %v7383_v43 = vld [vmem:[%s13112_s24 + $0x600] sm:$0xff] }
 0x1a6   :  { %8643 = vmatpush1.bf16.msra.mxu1 %v10005_v13  ;;  %v7372_v13 = vld [vmem:[%s13112_s24 + $0x5a8] sm:$0xff] }
 0x1a7   :  { %v597_v46 = vpop.f32.mrb[14].mxu1  ;;  %8644 = vmatprep.subr.bf16.mxu1 %v9778_v0  ;;  %v10793_v49 = vpop.f32.mrb[14].mxu0 }
 0x1a8   :  { %v599_v48 = vpop.f32.mrb[15].mxu1  ;;  %7226 = vmatmul.mubr.msk.f32.gmra.mrb[70].mxu0 %vm710_vm0, %v597_v46  ;;  %2131 = vmatmul.mubr.f32.gmra.mrb[120].mxu1 %v7367_v45  ;;  %v329_v50 = vpop.f32.mrb[15].mxu0 }
 0x1a9   :  { %907 = vmatprep.mubr.f32.mxu0 %v9779_v30  ;;  %2135 = vmatprep.mubr.f32.mxu1 %v7370_v9  ;;  %v7385_v50 = vld [vmem:[%s13112_s24 + $0x610] sm:$0xff] }
 0x1aa   :  { %8646 = vmatpush1.bf16.msra.mxu1 %v10017_v16  ;;  %v7374_v16 = vld [vmem:[%s13112_s24 + $0x5b8] sm:$0xff] }
 0x1ab   :  { %v602_v54 = vpop.f32.mrb[16].mxu1  ;;  %8647 = vmatprep.subr.bf16.mxu1 %v9778_v0  ;;  %v10805_v56 = vpop.f32.mrb[16].mxu0 }
 0x1ac   :  { %v604_v55 = vpop.f32.mrb[17].mxu1  ;;  %7227 = vmatmul.mubr.msk.f32.gmra.mrb[72].mxu0 %vm710_vm0, %v602_v54  ;;  %2136 = vmatmul.mubr.f32.gmra.mrb[122].mxu1 %v7369_v51  ;;  %v334_v57 = vpop.f32.mrb[17].mxu0 }
 0x1ad   :  { %913 = vmatprep.mubr.f32.mxu0 %v9779_v30  ;;  %2140 = vmatprep.mubr.f32.mxu1 %v7372_v13  ;;  %v7387_v57 = vld [vmem:[%s13112_s24 + $0x620] sm:$0xff] }
 0x1ae   :  { %8649 = vmatpush1.bf16.msra.mxu1 %v10029_v19  ;;  %v7376_v19 = vld [vmem:[%s13112_s24 + $0x5c8] sm:$0xff] }
 0x1af   :  { %v607_v59 = vpop.f32.mrb[18].mxu1  ;;  %8650 = vmatprep.subr.bf16.mxu1 %v9778_v0  ;;  %v10817_v62 = vpop.f32.mrb[18].mxu0 }
 0x1b0   :  { %v609_v61 = vpop.f32.mrb[19].mxu1  ;;  %7228 = vmatmul.mubr.msk.f32.gmra.mrb[74].mxu0 %vm710_vm0, %v607_v59  ;;  %2141 = vmatmul.mubr.f32.gmra.mrb[124].mxu1 %v7371_v58  ;;  %v339_v63 = vpop.f32.mrb[19].mxu0 }
 0x1b1   :  { %919 = vmatprep.mubr.f32.mxu0 %v9779_v30  ;;  %2145 = vmatprep.mubr.f32.mxu1 %v7374_v16  ;;  %v7389_v63 = vld [vmem:[%s13112_s24 + $0x630] sm:$0xff] }
 0x1b2   :  { %8652 = vmatpush1.bf16.msra.mxu1 %v10041_v22  ;;  %v7378_v22 = vld [vmem:[%s13112_s24 + $0x5d8] sm:$0xff] }
 0x1b3   :  { %v612_v2 = vpop.f32.mrb[20].mxu1  ;;  %8653 = vmatprep.subr.bf16.mxu1 %v9778_v0  ;;  %v10829_v5 = vpop.f32.mrb[20].mxu0 }
 0x1b4   :  { %v614_v3 = vpop.f32.mrb[21].mxu1  ;;  %7229 = vmatmul.mubr.msk.f32.gmra.mrb[76].mxu0 %vm710_vm0, %v612_v2  ;;  %2146 = vmatmul.mubr.f32.gmra.mrb[126].mxu1 %v7373_v1  ;;  %v344_v7 = vpop.f32.mrb[21].mxu0 }
 0x1b5   :  { %925 = vmatprep.mubr.f32.mxu0 %v9779_v30  ;;  %2150 = vmatprep.mubr.f32.mxu1 %v7376_v19  ;;  %v7391_v7 = vld [vmem:[%s13112_s24 + $0x640] sm:$0xff] }
 0x1b6   :  { %8655 = vmatpush1.bf16.msra.mxu1 %v10053_v25  ;;  %v7380_v25 = vld [vmem:[%s13112_s24 + $0x5e8] sm:$0xff] }
 0x1b7   :  { %v617_v11 = vpop.f32.mrb[22].mxu1  ;;  %8656 = vmatprep.subr.bf16.mxu1 %v9778_v0  ;;  %v10841_v14 = vpop.f32.mrb[22].mxu0 }
 0x1b8   :  { %v619_v12 = vpop.f32.mrb[23].mxu1  ;;  %7230 = vmatmul.mubr.msk.f32.gmra.mrb[78].mxu0 %vm710_vm0, %v617_v11  ;;  %2151 = vmatmul.mubr.f32.gmra.mrb[128].mxu1 %v7375_v10  ;;  %v349_v15 = vpop.f32.mrb[23].mxu0 }
 0x1b9   :  { %931 = vmatprep.mubr.f32.mxu0 %v9779_v30  ;;  %2155 = vmatprep.mubr.f32.mxu1 %v7378_v22  ;;  %v7393_v15 = vld [vmem:[%s13112_s24 + $0x650] sm:$0xff] }
 0x1ba   :  { %8658 = vmatpush1.bf16.msra.mxu1 %v10065_v28  ;;  %v7382_v28 = vld [vmem:[%s13112_s24 + $0x5f8] sm:$0xff] }
 0x1bb   :  { %v622_v20 = vpop.f32.mrb[24].mxu1  ;;  %8659 = vmatprep.subr.bf16.mxu1 %v9778_v0  ;;  %v10853_v23 = vpop.f32.mrb[24].mxu0 }
 0x1bc   :  { %v624_v21 = vpop.f32.mrb[25].mxu1  ;;  %7231 = vmatmul.mubr.msk.f32.gmra.mrb[80].mxu0 %vm710_vm0, %v622_v20  ;;  %2156 = vmatmul.mubr.f32.gmra.mrb[130].mxu1 %v7377_v18  ;;  %v354_v24 = vpop.f32.mrb[25].mxu0  ;;  %v7396_v18 = vld [vmem:[%s13112_s24 + $0x668] sm:$0xff] }
 0x1bd   :  { %937 = vmatprep.mubr.f32.mxu0 %v9779_v30  ;;  %2160 = vmatprep.mubr.f32.mxu1 %v7380_v25  ;;  %v7395_v24 = vld [vmem:[%s13112_s24 + $0x660] sm:$0xff] }
 0x1be   :  { %8661 = vmatpush1.bf16.msra.mxu1 %v10080_v32  ;;  %v7384_v32 = vld [vmem:[%s13112_s24 + $0x608] sm:$0xff] }
 0x1bf   :  { %v627_v29 = vpop.f32.mrb[26].mxu1  ;;  %8662 = vmatprep.subr.bf16.mxu1 %v9778_v0  ;;  %v10865_v31 = vpop.f32.mrb[26].mxu0 }
 0x1c0   :  { %v629_v4 = vpop.f32.mrb[27].mxu1  ;;  %7232 = vmatmul.mubr.msk.f32.gmra.mrb[82].mxu0 %vm710_vm0, %v627_v29  ;;  %2161 = vmatmul.mubr.f32.gmra.mrb[132].mxu1 %v7379_v27  ;;  %v359_v33 = vpop.f32.mrb[27].mxu0  ;;  %v7398_v27 = vld [vmem:[%s13112_s24 + $0x678] sm:$0xff] }
 0x1c1   :  { %943 = vmatprep.mubr.f32.mxu0 %v9779_v30  ;;  %2165 = vmatprep.mubr.f32.mxu1 %v7382_v28 }
 0x1c2   :  { %8664 = vmatpush1.bf16.msra.mxu1 %v10092_v35  ;;  %v7386_v35 = vld [vmem:[%s13112_s24 + $0x618] sm:$0xff] }
 0x1c3   :  { %v632_v37 = vpop.f32.mrb[28].mxu1  ;;  %8665 = vmatprep.subr.bf16.mxu1 %v9778_v0  ;;  %v10877_v39 = vpop.f32.mrb[28].mxu0 }
 0x1c4   :  { %v634_v6 = vpop.f32.mrb[29].mxu1  ;;  %7233 = vmatmul.mubr.msk.f32.gmra.mrb[84].mxu0 %vm710_vm0, %v632_v37  ;;  %2166 = vmatmul.mubr.f32.gmra.mrb[134].mxu1 %v7381_v36  ;;  %v364_v40 = vpop.f32.mrb[29].mxu0  ;;  %v7397_v36 = vld [vmem:[%s13112_s24 + $0x670] sm:$0xff] }
 0x1c5   :  { %949 = vmatprep.mubr.f32.mxu0 %v9779_v30  ;;  %2170 = vmatprep.mubr.f32.mxu1 %v7384_v32  ;;  %v7400_v32 = vld [vmem:[%s13112_s24 + $0x688] sm:$0xff] }
 0x1c6   :  { %8667 = vmatpush1.bf16.msra.mxu1 %v10104_v38  ;;  %v7388_v38 = vld [vmem:[%s13112_s24 + $0x628] sm:$0xff] }
 0x1c7   :  { %v637_v45 = vpop.f32.mrb[30].mxu1  ;;  %8668 = vmatprep.subr.bf16.mxu1 %v9778_v0  ;;  %v10889_v46 = vpop.f32.mrb[30].mxu0 }
 0x1c8   :  { %v639_v9 = vpop.f32.mrb[31].mxu1  ;;  %7234 = vmatmul.mubr.msk.f32.gmra.mrb[86].mxu0 %vm710_vm0, %v637_v45  ;;  %2171 = vmatmul.mubr.f32.gmra.mrb[136].mxu1 %v7383_v43  ;;  %v369_v48 = vpop.f32.mrb[31].mxu0  ;;  %v7402_v45 = vld [vmem:[%s13112_s24 + $0x698] sm:$0xff] }
 0x1c9   :  { %955 = vmatprep.mubr.f32.mxu0 %v9779_v30  ;;  %2175 = vmatprep.mubr.f32.mxu1 %v7386_v35  ;;  %v7399_v35 = vld [vmem:[%s13112_s24 + $0x680] sm:$0xff] }
 0x1ca   :  { %8670 = vmatpush1.bf16.msra.mxu1 %v10116_v41  ;;  %v7390_v41 = vld [vmem:[%s13112_s24 + $0x638] sm:$0xff] }
 0x1cb   :  { %v642_v51 = vpop.f32.mrb[32].mxu1  ;;  %8671 = vmatprep.subr.bf16.mxu1 %v9778_v0  ;;  %v10901_v54 = vpop.f32.mrb[32].mxu0 }
 0x1cc   :  { %v644_v13 = vpop.f32.mrb[33].mxu1  ;;  %7235 = vmatmul.mubr.msk.f32.gmra.mrb[88].mxu0 %vm710_vm0, %v642_v51  ;;  %2176 = vmatmul.mubr.f32.gmra.mrb[138].mxu1 %v7385_v50  ;;  %v374_v55 = vpop.f32.mrb[33].mxu0  ;;  %v7401_v51 = vld [vmem:[%s13112_s24 + $0x690] sm:$0xff] }
 0x1cd   :  { %961 = vmatprep.mubr.f32.mxu0 %v9779_v30  ;;  %2180 = vmatprep.mubr.f32.mxu1 %v7388_v38  ;;  %v7404_v13 = vld [vmem:[%s13112_s24 + $0x6a8] sm:$0xff] }
 0x1ce   :  { %8673 = vmatpush1.bf16.msra.mxu1 %v10128_v44  ;;  %v7392_v44 = vld [vmem:[%s13112_s24 + $0x648] sm:$0xff] }
 0x1cf   :  { %v647_v58 = vpop.f32.mrb[34].mxu1  ;;  %8674 = vmatprep.subr.bf16.mxu1 %v9778_v0  ;;  %v10913_v59 = vpop.f32.mrb[34].mxu0 }
 0x1d0   :  { %v649_v16 = vpop.f32.mrb[35].mxu1  ;;  %7236 = vmatmul.mubr.msk.f32.gmra.mrb[90].mxu0 %vm710_vm0, %v647_v58  ;;  %2181 = vmatmul.mubr.f32.gmra.mrb[140].mxu1 %v7387_v57  ;;  %v379_v61 = vpop.f32.mrb[35].mxu0 }
 0x1d1   :  { %967 = vmatprep.mubr.f32.mxu0 %v9779_v30  ;;  %2185 = vmatprep.mubr.f32.mxu1 %v7390_v41  ;;  %v7403_v16 = vld [vmem:[%s13112_s24 + $0x6a0] sm:$0xff]  ;;  %v7406_v61 = vld [vmem:[%s13112_s24 + $0x6b8] sm:$0xff] }
 0x1d2   :  { %8676 = vmatpush1.bf16.msra.mxu1 %v10140_v47  ;;  %v7394_v47 = vld [vmem:[%s13112_s24 + $0x658] sm:$0xff] }
 0x1d3   :  { %v652_v1 = vpop.f32.mrb[36].mxu1  ;;  %8677 = vmatprep.subr.bf16.mxu1 %v9778_v0  ;;  %v10925_v2 = vpop.f32.mrb[36].mxu0 }
 0x1d4   :  { %v654_v19 = vpop.f32.mrb[37].mxu1  ;;  %7237 = vmatmul.mubr.msk.f32.gmra.mrb[92].mxu0 %vm710_vm0, %v652_v1  ;;  %2186 = vmatmul.mubr.f32.gmra.mrb[142].mxu1 %v7389_v63  ;;  %v384_v3 = vpop.f32.mrb[37].mxu0 }
 0x1d5   :  { %973 = vmatprep.mubr.f32.mxu0 %v9779_v30  ;;  %2190 = vmatprep.mubr.f32.mxu1 %v7392_v44  ;;  %v7405_v3 = vld [vmem:[%s13112_s24 + $0x6b0] sm:$0xff] }
 0x1d6   :  { %8679 = vmatpush1.bf16.msra.mxu1 %v10152_v52 }
 0x1d7   :  { %v657_v10 = vpop.f32.mrb[38].mxu1  ;;  %v10936_v11 = vpop.f32.mrb[38].mxu0 }
 0x1d8   :  { %v659_v22 = vpop.f32.mrb[39].mxu1  ;;  %7238 = vmatmul.mubr.msk.f32.gmra.mrb[94].mxu0 %vm710_vm0, %v657_v10  ;;  %2191 = vmatmul.mubr.f32.gmra.mrb[144].mxu1 %v7391_v7  ;;  %v389_v12 = vpop.f32.mrb[39].mxu0  ;;  %v7408_v7 = vld [vmem:[%s13112_s24 + $0x6c8] sm:$0xff] }
 0x1d9   :  { %979 = vmatprep.mubr.f32.mxu0 %v9779_v30  ;;  %2195 = vmatprep.mubr.f32.mxu1 %v7394_v47 }
 0x1db   :  { %v662_v52 = vpop.f32.mrb[40].mxu1  ;;  %v10946_v20 = vpop.f32.mrb[40].mxu0 }
 0x1dc   :  { %v664_v25 = vpop.f32.mrb[41].mxu1  ;;  %7239 = vmatmul.mubr.msk.f32.gmra.mrb[96].mxu0 %vm710_vm0, %v662_v52  ;;  %2196 = vmatmul.mubr.f32.gmra.mrb[146].mxu1 %v7393_v15  ;;  %v394_v21 = vpop.f32.mrb[41].mxu0  ;;  %v7407_v15 = vld [vmem:[%s13112_s24 + $0x6c0] sm:$0xff]  ;;  %v1610_v52 = vld [vmem:[#allocation2 + $0x90] sm:$0xff] }
 0x1dd   :  { %985 = vmatprep.mubr.f32.mxu0 %v9779_v30  ;;  %2200 = vmatprep.mubr.f32.mxu1 %v7396_v18  ;;  %v1608_v18 = vld [vmem:[#allocation2 + $0x80] sm:$0xff]  ;;  %v7410_v25 = vld [vmem:[%s13112_s24 + $0x6d8] sm:$0xff] }
 0x1df   :  { %v667_v28 = vpop.f32.mrb[42].mxu1  ;;  %v10956_v4 = vpop.f32.mrb[42].mxu0 }
 0x1e0   :  { %v669_v29 = vpop.f32.mrb[43].mxu1  ;;  %7240 = vmatmul.mubr.msk.f32.gmra.mrb[98].mxu0 %vm710_vm0, %v667_v28  ;;  %2201 = vmatmul.mubr.f32.gmra.mrb[148].mxu1 %v7395_v24  ;;  %v399_v33 = vpop.f32.mrb[43].mxu0  ;;  %v1613_v24 = vld [vmem:[#allocation2 + $0xa8] sm:$0xff] }
 0x1e1   :  { %991 = vmatprep.mubr.f32.mxu0 %v9779_v30  ;;  %2205 = vmatprep.mubr.f32.mxu1 %v7398_v27  ;;  %v1615_v27 = vld [vmem:[#allocation2 + $0xb8] sm:$0xff]  ;;  %v8570_v33 = vpack.c.bf16 %v1610_v52, %v1608_v18 }
 0x1e3   :  { %v672_v37 = vpop.f32.mrb[44].mxu1  ;;  %v10966_v40 = vpop.f32.mrb[44].mxu0 }
 0x1e4   :  { %v674_v6 = vpop.f32.mrb[45].mxu1  ;;  %7241 = vmatmul.mubr.msk.f32.gmra.mrb[100].mxu0 %vm710_vm0, %v672_v37  ;;  %2206 = vmatmul.mubr.f32.gmra.mrb[150].mxu1 %v7397_v36  ;;  %v404_v43 = vpop.f32.mrb[45].mxu0  ;;  %v8572_v37 = vpack.c.bf16 %v1615_v27, %v1613_v24  ;;  %v7454_v27 = vld [vmem:[%s13112_s24 + $0x758] sm:$0xff] }
 0x1e5   :  { %997 = vmatprep.mubr.f32.mxu0 %v9779_v30  ;;  %2210 = vmatprep.mubr.f32.mxu1 %v7400_v32  ;;  %v7409_v32 = vld [vmem:[%s13112_s24 + $0x6d0] sm:$0xff]  ;;  %v1612_v6 = vld [vmem:[#allocation2 + $0xa0] sm:$0xff] }
 0x1e6   :  { %v1614_v43 = vld [vmem:[#allocation2 + $0xb0] sm:$0xff] }
 0x1e7   :  { %v677_v9 = vpop.f32.mrb[46].mxu1  ;;  %v10976_v50 = vpop.f32.mrb[46].mxu0 }
 0x1e8   :  { %v679_v48 = vpop.f32.mrb[47].mxu1  ;;  %7242 = vmatmul.mubr.msk.f32.gmra.mrb[102].mxu0 %vm710_vm0, %v677_v9  ;;  %2211 = vmatmul.mubr.f32.gmra.mrb[152].mxu1 %v7399_v35  ;;  %v409_v38 = vpop.f32.mrb[47].mxu0 }
 0x1e9   :  { %1003 = vmatprep.mubr.f32.mxu0 %v9779_v30  ;;  %2215 = vmatprep.mubr.f32.mxu1 %v7402_v45  ;;  %v7412_v45 = vld [vmem:[%s13112_s24 + $0x6e8] sm:$0xff]  ;;  %v8574_v48 = vpack.c.bf16 %v1614_v43, %v1612_v6  ;;  %v7411_v38 = vld [vmem:[%s13112_s24 + $0x6e0] sm:$0xff]  ;;  %v7458_v6 = vld [vmem:[%s13112_s24 + $0x778] sm:$0xff] }
 0x1eb   :  { %v682_v55 = vpop.f32.mrb[48].mxu1  ;;  %v10986_v41 = vpop.f32.mrb[48].mxu0 }
 0x1ec   :  { %v684_v57 = vpop.f32.mrb[49].mxu1  ;;  %7243 = vmatmul.mubr.msk.f32.gmra.mrb[104].mxu0 %vm710_vm0, %v682_v55  ;;  %2216 = vmatmul.mubr.f32.gmra.mrb[154].mxu1 %v7401_v51  ;;  %v414_v58 = vpop.f32.mrb[49].mxu0  ;;  %v2253_v55 = vld [vmem:[#allocation2 + $0xc8] sm:$0xff] }
 0x1ed   :  { %1009 = vmatprep.mubr.f32.mxu0 %v9779_v30  ;;  %2220 = vmatprep.mubr.f32.mxu1 %v7404_v13  ;;  %v7414_v13 = vld [vmem:[%s13112_s24 + $0x6f8] sm:$0xff]  ;;  %v7413_v58 = vld [vmem:[%s13112_s24 + $0x6f0] sm:$0xff] }
 0x1ee   :  { %v2255_v57 = vld [vmem:[#allocation2 + $0xd8] sm:$0xff] }
 0x1ef   :  { %v687_v63 = vpop.f32.mrb[50].mxu1  ;;  %v10996_v1 = vpop.f32.mrb[50].mxu0 }
 0x1f0   :  { %v689_v44 = vpop.f32.mrb[51].mxu1  ;;  %7244 = vmatmul.mubr.msk.f32.gmra.mrb[106].mxu0 %vm710_vm0, %v687_v63  ;;  %2221 = vmatmul.mubr.f32.gmra.mrb[156].mxu1 %v7403_v16  ;;  %v419_v19 = vpop.f32.mrb[51].mxu0  ;;  %v8624_v16 = vpack.c.bf16 %v2255_v57, %v2253_v55  ;;  %v7464_v57 = vld [vmem:[%s13112_s24 + $0x7a8] sm:$0xff] }
 0x1f1   :  { %1015 = vmatprep.mubr.f32.mxu0 %v9779_v30  ;;  %2225 = vmatprep.mubr.f32.mxu1 %v7406_v61  ;;  %v7444_v61 = vld [vmem:[%s13112_s24 + $0x708] sm:$0xff]  ;;  %v7443_v44 = vld [vmem:[%s13112_s24 + $0x700] sm:$0xff]  ;;  %v7446_v19 = vld [vmem:[%s13112_s24 + $0x718] sm:$0xff] }
 0x1f3   :  { %v692_v47 = vpop.f32.mrb[52].mxu1  ;;  %v11006_v22 = vpop.f32.mrb[52].mxu0 }
 0x1f4   :  { %v694_v10 = vpop.f32.mrb[53].mxu1  ;;  %7245 = vmatmul.mubr.msk.f32.gmra.mrb[108].mxu0 %vm710_vm0, %v692_v47  ;;  %2226 = vmatmul.mubr.f32.gmra.mrb[158].mxu1 %v7405_v3  ;;  %v424_v12 = vpop.f32.mrb[53].mxu0  ;;  %v7448_v47 = vld [vmem:[%s13112_s24 + $0x728] sm:$0xff] }
 0x1f5   :  { %1021 = vmatprep.mubr.f32.mxu0 %v9779_v30  ;;  %2230 = vmatprep.mubr.f32.mxu1 %v7408_v7 }
 0x1f7   :  { %v697_v21 = vpop.f32.mrb[54].mxu1  ;;  %v11016_v29 = vpop.f32.mrb[54].mxu0 }
 0x1f8   :  { %v699_v28 = vpop.f32.mrb[55].mxu1  ;;  %7246 = vmatmul.mubr.msk.f32.gmra.mrb[110].mxu0 %vm710_vm0, %v697_v21  ;;  %2231 = vmatmul.mubr.f32.gmra.mrb[160].mxu1 %v7407_v15  ;;  %v429_v36 = vpop.f32.mrb[55].mxu0  ;;  %v7450_v15 = vld [vmem:[%s13112_s24 + $0x738] sm:$0xff] }
 0x1f9   :  { %1176 = vmatprep.mubr.f32.mxu0 %v9779_v30  ;;  %2235 = vmatprep.mubr.f32.mxu1 %v7410_v25  ;;  %v7452_v25 = vld [vmem:[%s13112_s24 + $0x748] sm:$0xff] }
 0x1fa   :  { %v7456_v36 = vld [vmem:[%s13112_s24 + $0x768] sm:$0xff] }
 0x1fb   :  { %v11022_v35 = vpop.f32.mrb[56].mxu1 }
 0x1fc   :  { %7247 = vmatmul.mubr.msk.f32.vlgmr.msra.gmra.mrb[56].mxu0 %vm710_vm0, %v10715_v53  ;;  %v1470_v9 = vpop.f32.mrb[57].mxu1  ;;  %2236 = vmatmul.mubr.f32.gmra.mrb[162].mxu1 %v7409_v32 }
 0x1fd   :  { %1182 = vmatprep.mubr.f32.mxu0 %v9779_v30  ;;  %8571 = vmatpush1.bf16.msra.mxu0 %v8570_v33  ;;  %v7460_v9 = vld [vmem:[%s13112_s24 + $0x788] sm:$0xff] }
 0x1fe   :  { %8573 = vmatprep.subr.bf16.mxu0 %v8572_v37  ;;  %2240 = vmatprep.mubr.f32.mxu1 %v7412_v45 }
 0x1ff   :  { %v11033_v51 = vpop.f32.mrb[58].mxu1 }
 0x200   :  { %7248 = vmatmul.mubr.msk.f32.gmra.mrb[58].mxu0 %vm710_vm0, %v10725_v60  ;;  %v1475_v53 = vpop.f32.mrb[59].mxu1  ;;  %2241 = vmatmul.mubr.f32.gmra.mrb[164].mxu1 %v7411_v38 }
 0x201   :  { %1188 = vmatprep.mubr.f32.mxu0 %v9779_v30  ;;  %8575 = vmatpush1.bf16.msra.mxu0 %v8574_v48 }
 0x202   :  { %2245 = vmatprep.mubr.f32.mxu1 %v7414_v13  ;;  %8625 = vmatprep.subr.bf16.mxu0 %v8624_v16  ;;  %v7462_v13 = vld [vmem:[%s13112_s24 + $0x798] sm:$0xff] }
 0x203   :  { %v11047_v63 = vpop.f32.mrb[60].mxu1 }
 0x204   :  { %7249 = vmatmul.mubr.msk.f32.gmra.mrb[60].mxu0 %vm710_vm0, %v10735_v8  ;;  %v1480_v60 = vpop.f32.mrb[61].mxu1  ;;  %2246 = vmatmul.mubr.f32.gmra.mrb[166].mxu1 %v7413_v58  ;;  %v7445_v8 = vld [vmem:[%s13112_s24 + $0x710] sm:$0xff] }
 0x205   :  { %1194 = vmatprep.mubr.f32.mxu0 %v9779_v30  ;;  %2754 = vmatprep.mubr.f32.mxu1 %v7444_v61  ;;  %v7466_v61 = vld [vmem:[%s13112_s24 + $0x7b8] sm:$0xff] }
 0x207   :  { %v11058_v3 = vpop.f32.mrb[62].mxu1 }
 0x208   :  { %7250 = vmatmul.mubr.msk.f32.gmra.mrb[62].mxu0 %vm710_vm0, %v10745_v17  ;;  %v1485_v7 = vpop.f32.mrb[63].mxu1  ;;  %2755 = vmatmul.mubr.f32.vlgmr.msra.gmra.mrb[168].mxu1 %v7443_v44  ;;  %v7447_v17 = vld [vmem:[%s13112_s24 + $0x720] sm:$0xff] }
 0x209   :  { %1200 = vmatprep.mubr.f32.mxu0 %v9779_v30  ;;  %2759 = vmatprep.mubr.f32.mxu1 %v7446_v19  ;;  %v7468_v19 = vld [vmem:[%s13112_s24 + $0x7c8] sm:$0xff] }
 0x20b   :  { %v11069_v10 = vpop.f32.mrb[64].mxu1 }
 0x20c   :  { %7251 = vmatmul.mubr.msk.f32.gmra.mrb[64].mxu0 %vm710_vm0, %v10757_v26  ;;  %v1490_v12 = vpop.f32.mrb[65].mxu1  ;;  %2760 = vmatmul.mubr.f32.gmra.mrb[170].mxu1 %v7445_v8  ;;  %v7449_v26 = vld [vmem:[%s13112_s24 + $0x730] sm:$0xff] }
 0x20d   :  { %1206 = vmatprep.mubr.f32.mxu0 %v9779_v30  ;;  %2764 = vmatprep.mubr.f32.mxu1 %v7448_v47  ;;  %v7470_v47 = vld [vmem:[%s13112_s24 + $0x7d8] sm:$0xff] }
 0x20f   :  { %v11080_v18 = vpop.f32.mrb[66].mxu1 }
 0x210   :  { %7252 = vmatmul.mubr.msk.f32.gmra.mrb[66].mxu0 %vm710_vm0, %v10769_v34  ;;  %v1495_v52 = vpop.f32.mrb[67].mxu1  ;;  %2765 = vmatmul.mubr.f32.gmra.mrb[172].mxu1 %v7447_v17  ;;  %v7451_v34 = vld [vmem:[%s13112_s24 + $0x740] sm:$0xff] }
 0x211   :  { %1212 = vmatprep.mubr.f32.mxu0 %v9779_v30  ;;  %2769 = vmatprep.mubr.f32.mxu1 %v7450_v15  ;;  %v7472_v15 = vld [vmem:[%s13112_s24 + $0x7e8] sm:$0xff] }
 0x213   :  { %v11091_v21 = vpop.f32.mrb[68].mxu1 }
 0x214   :  { %7253 = vmatmul.mubr.msk.f32.gmra.mrb[68].mxu0 %vm710_vm0, %v10781_v42  ;;  %v1500_v24 = vpop.f32.mrb[69].mxu1  ;;  %2770 = vmatmul.mubr.f32.gmra.mrb[174].mxu1 %v7449_v26  ;;  %v7453_v42 = vld [vmem:[%s13112_s24 + $0x750] sm:$0xff] }
 0x215   :  { %1218 = vmatprep.mubr.f32.mxu0 %v9779_v30  ;;  %2774 = vmatprep.mubr.f32.mxu1 %v7452_v25  ;;  %v7474_v25 = vld [vmem:[%s13112_s24 + $0x7f8] sm:$0xff] }
 0x217   :  { %v11102_v28 = vpop.f32.mrb[70].mxu1 }
 0x218   :  { %7254 = vmatmul.mubr.msk.f32.gmra.mrb[70].mxu0 %vm710_vm0, %v10793_v49  ;;  %v1505_v33 = vpop.f32.mrb[71].mxu1  ;;  %2775 = vmatmul.mubr.f32.gmra.mrb[176].mxu1 %v7451_v34  ;;  %v7455_v49 = vld [vmem:[%s13112_s24 + $0x760] sm:$0xff] }
 0x219   :  { %1224 = vmatprep.mubr.f32.mxu0 %v9779_v30  ;;  %2779 = vmatprep.mubr.f32.mxu1 %v7454_v27  ;;  %v7476_v27 = vld [vmem:[%s13112_s24 + $0x808] sm:$0xff] }
 0x21b   :  { %v11113_v32 = vpop.f32.mrb[72].mxu1 }
 0x21c   :  { %7255 = vmatmul.mubr.msk.f32.gmra.mrb[72].mxu0 %vm710_vm0, %v10805_v56  ;;  %v1510_v37 = vpop.f32.mrb[73].mxu1  ;;  %2780 = vmatmul.mubr.f32.gmra.mrb[178].mxu1 %v7453_v42  ;;  %v7457_v56 = vld [vmem:[%s13112_s24 + $0x770] sm:$0xff] }
 0x21d   :  { %1230 = vmatprep.mubr.f32.mxu0 %v9779_v30  ;;  %2784 = vmatprep.mubr.f32.mxu1 %v7456_v36  ;;  %v7478_v36 = vld [vmem:[%s13112_s24 + $0x818] sm:$0xff] }
 0x21f   :  { %v11124_v43 = vpop.f32.mrb[74].mxu1 }
 0x220   :  { %7256 = vmatmul.mubr.msk.f32.gmra.mrb[74].mxu0 %vm710_vm0, %v10817_v62  ;;  %v1515_v45 = vpop.f32.mrb[75].mxu1  ;;  %2785 = vmatmul.mubr.f32.gmra.mrb[180].mxu1 %v7455_v49  ;;  %v7459_v62 = vld [vmem:[%s13112_s24 + $0x780] sm:$0xff] }
 0x221   :  { %1236 = vmatprep.mubr.f32.mxu0 %v9779_v30  ;;  %2789 = vmatprep.mubr.f32.mxu1 %v7458_v6  ;;  %v7480_v6 = vld [vmem:[%s13112_s24 + $0x828] sm:$0xff] }
 0x223   :  { %v11135_v48 = vpop.f32.mrb[76].mxu1 }
 0x224   :  { %7257 = vmatmul.mubr.msk.f32.gmra.mrb[76].mxu0 %vm710_vm0, %v10829_v5  ;;  %v1520_v38 = vpop.f32.mrb[77].mxu1  ;;  %2790 = vmatmul.mubr.f32.gmra.mrb[182].mxu1 %v7457_v56  ;;  %v7461_v5 = vld [vmem:[%s13112_s24 + $0x790] sm:$0xff] }
 0x225   :  { %1242 = vmatprep.mubr.f32.mxu0 %v9779_v30  ;;  %2794 = vmatprep.mubr.f32.mxu1 %v7460_v9  ;;  %v7482_v9 = vld [vmem:[%s13112_s24 + $0x838] sm:$0xff] }
 0x227   :  { %v11146_v53 = vpop.f32.mrb[78].mxu1 }
 0x228   :  { %7258 = vmatmul.mubr.msk.f32.gmra.mrb[78].mxu0 %vm710_vm0, %v10841_v14  ;;  %v1525_v55 = vpop.f32.mrb[79].mxu1  ;;  %2795 = vmatmul.mubr.f32.gmra.mrb[184].mxu1 %v7459_v62  ;;  %v7463_v14 = vld [vmem:[%s13112_s24 + $0x7a0] sm:$0xff] }
 0x229   :  { %1248 = vmatprep.mubr.f32.mxu0 %v9779_v30  ;;  %2799 = vmatprep.mubr.f32.mxu1 %v7462_v13  ;;  %v7484_v13 = vld [vmem:[%s13112_s24 + $0x848] sm:$0xff] }
 0x22b   :  { %v11157_v58 = vpop.f32.mrb[80].mxu1 }
 0x22c   :  { %7259 = vmatmul.mubr.msk.f32.gmra.mrb[80].mxu0 %vm710_vm0, %v10853_v23  ;;  %v1530_v16 = vpop.f32.mrb[81].mxu1  ;;  %2800 = vmatmul.mubr.f32.gmra.mrb[186].mxu1 %v7461_v5  ;;  %v7465_v23 = vld [vmem:[%s13112_s24 + $0x7b0] sm:$0xff] }
 0x22d   :  { %1254 = vmatprep.mubr.f32.mxu0 %v9779_v30  ;;  %2804 = vmatprep.mubr.f32.mxu1 %v7464_v57  ;;  %v7486_v57 = vld [vmem:[%s13112_s24 + $0x858] sm:$0xff] }
 0x22f   :  { %v11168_v60 = vpop.f32.mrb[82].mxu1 }
 0x230   :  { %7260 = vmatmul.mubr.msk.f32.gmra.mrb[82].mxu0 %vm710_vm0, %v10865_v31  ;;  %v1535_v44 = vpop.f32.mrb[83].mxu1  ;;  %2805 = vmatmul.mubr.f32.gmra.mrb[188].mxu1 %v7463_v14  ;;  %v7467_v31 = vld [vmem:[%s13112_s24 + $0x7c0] sm:$0xff] }
 0x231   :  { %1260 = vmatprep.mubr.f32.mxu0 %v9779_v30  ;;  %2809 = vmatprep.mubr.f32.mxu1 %v7466_v61  ;;  %v7488_v61 = vld [vmem:[%s13112_s24 + $0x868] sm:$0xff] }
 0x233   :  { %v11179_v7 = vpop.f32.mrb[84].mxu1 }
 0x234   :  { %7261 = vmatmul.mubr.msk.f32.gmra.mrb[84].mxu0 %vm710_vm0, %v10877_v39  ;;  %v1540_v8 = vpop.f32.mrb[85].mxu1  ;;  %2810 = vmatmul.mubr.f32.gmra.mrb[190].mxu1 %v7465_v23  ;;  %v7469_v39 = vld [vmem:[%s13112_s24 + $0x7d0] sm:$0xff] }
 0x235   :  { %1266 = vmatprep.mubr.f32.mxu0 %v9779_v30  ;;  %2814 = vmatprep.mubr.f32.mxu1 %v7468_v19  ;;  %v7490_v19 = vld [vmem:[%s13112_s24 + $0x878] sm:$0xff] }
 0x237   :  { %v11190_v12 = vpop.f32.mrb[86].mxu1 }
 0x238   :  { %7262 = vmatmul.mubr.msk.f32.gmra.mrb[86].mxu0 %vm710_vm0, %v10889_v46  ;;  %v1545_v17 = vpop.f32.mrb[87].mxu1  ;;  %2815 = vmatmul.mubr.f32.gmra.mrb[192].mxu1 %v7467_v31  ;;  %v7471_v46 = vld [vmem:[%s13112_s24 + $0x7e0] sm:$0xff] }
 0x239   :  { %1272 = vmatprep.mubr.f32.mxu0 %v9779_v30  ;;  %2819 = vmatprep.mubr.f32.mxu1 %v7470_v47  ;;  %v7492_v47 = vld [vmem:[%s13112_s24 + $0x888] sm:$0xff] }
 0x23b   :  { %v11201_v52 = vpop.f32.mrb[88].mxu1 }
 0x23c   :  { %7263 = vmatmul.mubr.msk.f32.gmra.mrb[88].mxu0 %vm710_vm0, %v10901_v54  ;;  %v1550_v26 = vpop.f32.mrb[89].mxu1  ;;  %2820 = vmatmul.mubr.f32.gmra.mrb[194].mxu1 %v7469_v39  ;;  %v7473_v54 = vld [vmem:[%s13112_s24 + $0x7f0] sm:$0xff] }
 0x23d   :  { %1278 = vmatprep.mubr.f32.mxu0 %v9779_v30  ;;  %2824 = vmatprep.mubr.f32.mxu1 %v7472_v15  ;;  %v2252_v15 = vld [vmem:[#allocation2 + $0xc0] sm:$0xff]  ;;  %v2254_v26 = vld [vmem:[#allocation2 + $0xd0] sm:$0xff] }
 0x23f   :  { %v11212_v24 = vpop.f32.mrb[90].mxu1 }
 0x240   :  { %7264 = vmatmul.mubr.msk.f32.gmra.mrb[90].mxu0 %vm710_vm0, %v10913_v59  ;;  %v1555_v34 = vpop.f32.mrb[91].mxu1  ;;  %2825 = vmatmul.mubr.f32.gmra.mrb[196].mxu1 %v7471_v46  ;;  %v7475_v59 = vld [vmem:[%s13112_s24 + $0x800] sm:$0xff]  ;;  %v7494_v46 = vld [vmem:[%s13112_s24 + $0x898] sm:$0xff] }
 0x241   :  { %1284 = vmatprep.mubr.f32.mxu0 %v9779_v30  ;;  %2829 = vmatprep.mubr.f32.mxu1 %v7474_v25  ;;  %v2257_v25 = vld [vmem:[#allocation2 + $0xe8] sm:$0xff]  ;;  %v2259_v34 = vld [vmem:[#allocation2 + $0xf8] sm:$0xff] }
 0x243   :  { %v11223_v33 = vpop.f32.mrb[92].mxu1 }
 0x244   :  { %7265 = vmatmul.mubr.msk.f32.gmra.mrb[92].mxu0 %vm710_vm0, %v10925_v2  ;;  %v1560_v42 = vpop.f32.mrb[93].mxu1  ;;  %2830 = vmatmul.mubr.f32.gmra.mrb[198].mxu1 %v7473_v54  ;;  %v7477_v2 = vld [vmem:[%s13112_s24 + $0x810] sm:$0xff] }
 0x245   :  { %1290 = vmatprep.mubr.f32.mxu0 %v9779_v30  ;;  %2834 = vmatprep.mubr.f32.mxu1 %v7476_v27  ;;  %v8626_v27 = vpack.c.bf16 %v2254_v26, %v2252_v15  ;;  %v7493_v42 = vld [vmem:[%s13112_s24 + $0x890] sm:$0xff] }
 0x247   :  { %v11234_v37 = vpop.f32.mrb[94].mxu1 }
 0x248   :  { %7266 = vmatmul.mubr.msk.f32.gmra.mrb[94].mxu0 %vm710_vm0, %v10936_v11  ;;  %v1565_v49 = vpop.f32.mrb[95].mxu1  ;;  %2835 = vmatmul.mubr.f32.gmra.mrb[200].mxu1 %v7475_v59  ;;  %v7479_v11 = vld [vmem:[%s13112_s24 + $0x820] sm:$0xff]  ;;  %v8628_v59 = vpack.c.bf16 %v2259_v34, %v2257_v25 }
 0x249   :  { %1296 = vmatprep.mubr.f32.mxu0 %v9779_v30  ;;  %2839 = vmatprep.mubr.f32.mxu1 %v7478_v36  ;;  %v2256_v36 = vld [vmem:[#allocation2 + $0xe0] sm:$0xff]  ;;  %v2258_v49 = vld [vmem:[#allocation2 + $0xf0] sm:$0xff] }
 0x24b   :  { %v11245_v45 = vpop.f32.mrb[96].mxu1 }
 0x24c   :  { %7267 = vmatmul.mubr.msk.f32.gmra.mrb[96].mxu0 %vm710_vm0, %v10946_v20  ;;  %v1570_v56 = vpop.f32.mrb[97].mxu1  ;;  %2840 = vmatmul.mubr.f32.gmra.mrb[202].mxu1 %v7477_v2  ;;  %v7481_v20 = vld [vmem:[%s13112_s24 + $0x830] sm:$0xff] }
 0x24d   :  { %1302 = vmatprep.mubr.f32.mxu0 %v9779_v30  ;;  %2844 = vmatprep.mubr.f32.mxu1 %v7480_v6  ;;  %v7496_v6 = vld [vmem:[%s13112_s24 + $0x8a8] sm:$0xff]  ;;  %v8630_v56 = vpack.c.bf16 %v2258_v49, %v2256_v36 }
 0x24f   :  { %v11256_v38 = vpop.f32.mrb[98].mxu1 }
 0x250   :  { %7268 = vmatmul.mubr.msk.f32.gmra.mrb[98].mxu0 %vm710_vm0, %v10956_v4  ;;  %v1575_v62 = vpop.f32.mrb[99].mxu1  ;;  %2845 = vmatmul.mubr.f32.gmra.mrb[204].mxu1 %v7479_v11  ;;  %v7483_v4 = vld [vmem:[%s13112_s24 + $0x840] sm:$0xff] }
 0x251   :  { %1308 = vmatprep.mubr.f32.mxu0 %v9779_v30  ;;  %2849 = vmatprep.mubr.f32.mxu1 %v7482_v9  ;;  %v7495_v11 = vld [vmem:[%s13112_s24 + $0x8a0] sm:$0xff]  ;;  %v7498_v62 = vld [vmem:[%s13112_s24 + $0x8b8] sm:$0xff] }
 0x253   :  { %v11267_v55 = vpop.f32.mrb[100].mxu1 }
 0x254   :  { %7269 = vmatmul.mubr.msk.f32.gmra.mrb[100].mxu0 %vm710_vm0, %v10966_v40  ;;  %v1580_v5 = vpop.f32.mrb[101].mxu1  ;;  %2850 = vmatmul.mubr.f32.gmra.mrb[206].mxu1 %v7481_v20  ;;  %v7485_v40 = vld [vmem:[%s13112_s24 + $0x850] sm:$0xff]  ;;  %v2897_v20 = vld [vmem:[#allocation2 + $0x108] sm:$0xff] }
 0x255   :  { %1314 = vmatprep.mubr.f32.mxu0 %v9779_v30  ;;  %2854 = vmatprep.mubr.f32.mxu1 %v7484_v13  ;;  %v2899_v13 = vld [vmem:[#allocation2 + $0x118] sm:$0xff]  ;;  %v7497_v5 = vld [vmem:[%s13112_s24 + $0x8b0] sm:$0xff] }
 0x257   :  { %v11278_v16 = vpop.f32.mrb[102].mxu1 }
 0x258   :  { %7270 = vmatmul.mubr.msk.f32.gmra.mrb[102].mxu0 %vm710_vm0, %v10976_v50  ;;  %v1585_v14 = vpop.f32.mrb[103].mxu1  ;;  %2855 = vmatmul.mubr.f32.gmra.mrb[208].mxu1 %v7483_v4  ;;  %v7487_v50 = vld [vmem:[%s13112_s24 + $0x860] sm:$0xff]  ;;  %v8680_v4 = vpack.c.bf16 %v2899_v13, %v2897_v20  ;;  %v2903_v20 = vld [vmem:[#allocation2 + $0x138] sm:$0xff] }
 0x259   :  { %1320 = vmatprep.mubr.f32.mxu0 %v9779_v30  ;;  %2859 = vmatprep.mubr.f32.mxu1 %v7486_v57 }
 0x25b   :  { %v11289_v44 = vpop.f32.mrb[104].mxu1 }
 0x25c   :  { %7271 = vmatmul.mubr.msk.f32.gmra.mrb[104].mxu0 %vm710_vm0, %v10986_v41  ;;  %v1590_v23 = vpop.f32.mrb[105].mxu1  ;;  %2860 = vmatmul.mubr.f32.gmra.mrb[210].mxu1 %v7485_v40  ;;  %v7489_v41 = vld [vmem:[%s13112_s24 + $0x870] sm:$0xff] }
 0x25d   :  { %1326 = vmatprep.mubr.f32.mxu0 %v9779_v30  ;;  %2864 = vmatprep.mubr.f32.mxu1 %v7488_v61 }
 0x25f   :  { %v11300_v8 = vpop.f32.mrb[106].mxu1 }
 0x260   :  { %7272 = vmatmul.mubr.msk.f32.gmra.mrb[106].mxu0 %vm710_vm0, %v10996_v1  ;;  %v1595_v31 = vpop.f32.mrb[107].mxu1  ;;  %2865 = vmatmul.mubr.f32.gmra.mrb[212].mxu1 %v7487_v50  ;;  %v7491_v1 = vld [vmem:[%s13112_s24 + $0x880] sm:$0xff] }
 0x261   :  { %1332 = vmatprep.mubr.f32.mxu0 %v9779_v30  ;;  %2869 = vmatprep.mubr.f32.mxu1 %v7490_v19 }
 0x263   :  { %v11311_v17 = vpop.f32.mrb[108].mxu1 }
 0x264   :  { %7273 = vmatmul.mubr.msk.f32.gmra.mrb[108].mxu0 %vm710_vm0, %v11006_v22  ;;  %v1600_v39 = vpop.f32.mrb[109].mxu1  ;;  %2870 = vmatmul.mubr.f32.gmra.mrb[214].mxu1 %v7489_v41 }
 0x265   :  { %1338 = vmatprep.mubr.f32.mxu0 %v9779_v30  ;;  %2874 = vmatprep.mubr.f32.mxu1 %v7492_v47 }
 0x267   :  { %v11322_v54 = vpop.f32.mrb[110].mxu1 }
 0x268   :  { %7274 = vmatmul.mubr.msk.f32.gmra.mrb[110].mxu0 %vm710_vm0, %v11016_v29  ;;  %v1605_v22 = vpop.f32.mrb[111].mxu1  ;;  %2875 = vmatmul.mubr.f32.gmra.mrb[216].mxu1 %v7491_v1 }
 0x269   :  { %1764 = vmatprep.mubr.f32.mxu0 %v9779_v30  ;;  %2879 = vmatprep.mubr.f32.mxu1 %v7494_v46 }
 0x26b   :  { %v11330_v2 = vpop.f32.mrb[112].mxu1 }
 0x26c   :  { %7331 = vmatmul.mubr.msk.f32.vlgmr.msra.gmra.mrb[56].mxu0 %vm710_vm0, %v11022_v35  ;;  %v2114_v29 = vpop.f32.mrb[113].mxu1  ;;  %2880 = vmatmul.mubr.f32.gmra.mrb[218].mxu1 %v7493_v42 }
 0x26d   :  { %1770 = vmatprep.mubr.f32.mxu0 %v9779_v30  ;;  %8627 = vmatpush1.bf16.msra.mxu0 %v8626_v27 }
 0x26e   :  { %8629 = vmatprep.subr.bf16.mxu0 %v8628_v59  ;;  %2884 = vmatprep.mubr.f32.mxu1 %v7496_v6 }
 0x26f   :  { %v11341_v9 = vpop.f32.mrb[114].mxu1 }
 0x270   :  { %7332 = vmatmul.mubr.msk.f32.gmra.mrb[58].mxu0 %vm710_vm0, %v11033_v51  ;;  %v2119_v35 = vpop.f32.mrb[115].mxu1  ;;  %2885 = vmatmul.mubr.f32.gmra.mrb[220].mxu1 %v7495_v11 }
 0x271   :  { %1776 = vmatprep.mubr.f32.mxu0 %v9779_v30  ;;  %8631 = vmatpush1.bf16.msra.mxu0 %v8630_v56  ;;  %v2901_v35 = vld [vmem:[#allocation2 + $0x128] sm:$0xff] }
 0x272   :  { %2889 = vmatprep.mubr.f32.mxu1 %v7498_v62  ;;  %8681 = vmatprep.subr.bf16.mxu0 %v8680_v4  ;;  %v2898_v62 = vld [vmem:[#allocation2 + $0x110] sm:$0xff]  ;;  %v8684_v4 = vpack.c.bf16 %v2903_v20, %v2901_v35 }
 0x273   :  { %v11352_v57 = vpop.f32.mrb[116].mxu1 }
 0x274   :  { %7333 = vmatmul.mubr.msk.f32.gmra.mrb[60].mxu0 %vm710_vm0, %v11047_v63  ;;  %v2124_v51 = vpop.f32.mrb[117].mxu1  ;;  %2890 = vmatmul.mubr.f32.gmra.mrb[222].mxu1 %v7497_v5 }
 0x275   :  { %1782 = vmatprep.mubr.f32.mxu0 %v9779_v30  ;;  %v2900_v51 = vld [vmem:[#allocation2 + $0x120] sm:$0xff] }
 0x277   :  { %v11357_v14 = vpop.f32.mrb[118].mxu1 }
 0x278   :  { %7334 = vmatmul.mubr.msk.f32.gmra.mrb[62].mxu0 %vm710_vm0, %v11058_v3  ;;  %v2129_v40 = vpop.f32.mrb[119].mxu1 }
 0x279   :  { %1788 = vmatprep.mubr.f32.mxu0 %v9779_v30  ;;  %v2902_v40 = vld [vmem:[#allocation2 + $0x130] sm:$0xff] }
 0x27b   :  { %v11362_v61 = vpop.f32.mrb[120].mxu1 }
 0x27c   :  { %7335 = vmatmul.mubr.msk.f32.gmra.mrb[64].mxu0 %vm710_vm0, %v11069_v10  ;;  %v2134_v23 = vpop.f32.mrb[121].mxu1 }
 0x27d   :  { %1794 = vmatprep.mubr.f32.mxu0 %v9779_v30 }
 0x27f   :  { %v11367_v63 = vpop.f32.mrb[122].mxu1 }
 0x280   :  { %7336 = vmatmul.mubr.msk.f32.gmra.mrb[66].mxu0 %vm710_vm0, %v11080_v18  ;;  %v2139_v50 = vpop.f32.mrb[123].mxu1 }
 0x281   :  { %1800 = vmatprep.mubr.f32.mxu0 %v9779_v30  ;;  %v8686_v50 = vpack.c.bf16 %v2902_v40, %v2900_v51  ;;  %v3277_v40 = vld [vmem:[%s13091_s3] sm:$0x3] }
 0x283   :  { %v11372_v3 = vpop.f32.mrb[124].mxu1 }
 0x284   :  { %7337 = vmatmul.mubr.msk.f32.gmra.mrb[68].mxu0 %vm710_vm0, %v11091_v21  ;;  %v2144_v19 = vpop.f32.mrb[125].mxu1 }
 0x285   :  { %1806 = vmatprep.mubr.f32.mxu0 %v9779_v30 }
 0x287   :  { %v11377_v10 = vpop.f32.mrb[126].mxu1 }
 0x288   :  { %7338 = vmatmul.mubr.msk.f32.gmra.mrb[70].mxu0 %vm710_vm0, %v11102_v28  ;;  %v2149_v31 = vpop.f32.mrb[127].mxu1 }
 0x289   :  { %1812 = vmatprep.mubr.f32.mxu0 %v9779_v30 }
 0x28b   :  { %v11382_v18 = vpop.f32.mrb[128].mxu1 }
 0x28c   :  { %7339 = vmatmul.mubr.msk.f32.gmra.mrb[72].mxu0 %vm710_vm0, %v11113_v32  ;;  %v2154_v41 = vpop.f32.mrb[129].mxu1 }
 0x28d   :  { %1818 = vmatprep.mubr.f32.mxu0 %v9779_v30 }
 0x28f   :  { %v11387_v21 = vpop.f32.mrb[130].mxu1 }
 0x290   :  { %7340 = vmatmul.mubr.msk.f32.gmra.mrb[74].mxu0 %vm710_vm0, %v11124_v43  ;;  %v2159_v47 = vpop.f32.mrb[131].mxu1 }
 0x291   :  { %1824 = vmatprep.mubr.f32.mxu0 %v9779_v30 }
 0x293   :  { %v11392_v28 = vpop.f32.mrb[132].mxu1 }
 0x294   :  { %7341 = vmatmul.mubr.msk.f32.gmra.mrb[76].mxu0 %vm710_vm0, %v11135_v48  ;;  %v2164_v39 = vpop.f32.mrb[133].mxu1 }
 0x295   :  { %1830 = vmatprep.mubr.f32.mxu0 %v9779_v30 }
 0x297   :  { %v11397_v32 = vpop.f32.mrb[134].mxu1 }
 0x298   :  { %7342 = vmatmul.mubr.msk.f32.gmra.mrb[78].mxu0 %vm710_vm0, %v11146_v53  ;;  %v2169_v1 = vpop.f32.mrb[135].mxu1 }
 0x299   :  { %1836 = vmatprep.mubr.f32.mxu0 %v9779_v30 }
 0x29b   :  { %v11402_v43 = vpop.f32.mrb[136].mxu1 }
 0x29c   :  { %7343 = vmatmul.mubr.msk.f32.gmra.mrb[80].mxu0 %vm710_vm0, %v11157_v58  ;;  %v2174_v15 = vpop.f32.mrb[137].mxu1 }
 0x29d   :  { %1842 = vmatprep.mubr.f32.mxu0 %v9779_v30 }
 0x29f   :  { %v11407_v48 = vpop.f32.mrb[138].mxu1 }
 0x2a0   :  { %7344 = vmatmul.mubr.msk.f32.gmra.mrb[82].mxu0 %vm710_vm0, %v11168_v60  ;;  %v2179_v26 = vpop.f32.mrb[139].mxu1 }
 0x2a1   :  { %1848 = vmatprep.mubr.f32.mxu0 %v9779_v30 }
 0x2a3   :  { %v11412_v53 = vpop.f32.mrb[140].mxu1 }
 0x2a4   :  { %7345 = vmatmul.mubr.msk.f32.gmra.mrb[84].mxu0 %vm710_vm0, %v11179_v7  ;;  %v2184_v46 = vpop.f32.mrb[141].mxu1 }
 0x2a5   :  { %1854 = vmatprep.mubr.f32.mxu0 %v9779_v30 }
 0x2a7   :  { %v11417_v58 = vpop.f32.mrb[142].mxu1 }
 0x2a8   :  { %7346 = vmatmul.mubr.msk.f32.gmra.mrb[86].mxu0 %vm710_vm0, %v11190_v12  ;;  %v2189_v25 = vpop.f32.mrb[143].mxu1 }
 0x2a9   :  { %1860 = vmatprep.mubr.f32.mxu0 %v9779_v30 }
 0x2ab   :  { %v11422_v60 = vpop.f32.mrb[144].mxu1 }
 0x2ac   :  { %7347 = vmatmul.mubr.msk.f32.gmra.mrb[88].mxu0 %vm710_vm0, %v11201_v52  ;;  %v2194_v34 = vpop.f32.mrb[145].mxu1 }
 0x2ad   :  { %1866 = vmatprep.mubr.f32.mxu0 %v9779_v30 }
 0x2af   :  { %v11427_v7 = vpop.f32.mrb[146].mxu1 }
 0x2b0   :  { %7348 = vmatmul.mubr.msk.f32.gmra.mrb[90].mxu0 %vm710_vm0, %v11212_v24  ;;  %v2199_v22 = vpop.f32.mrb[147].mxu1 }
 0x2b1   :  { %1872 = vmatprep.mubr.f32.mxu0 %v9779_v30 }
 0x2b3   :  { %v11432_v12 = vpop.f32.mrb[148].mxu1 }
 0x2b4   :  { %7349 = vmatmul.mubr.msk.f32.gmra.mrb[92].mxu0 %vm710_vm0, %v11223_v33  ;;  %v2204_v27 = vpop.f32.mrb[149].mxu1 }
 0x2b5   :  { %1878 = vmatprep.mubr.f32.mxu0 %v9779_v30 }
 0x2b7   :  { %v11437_v52 = vpop.f32.mrb[150].mxu1 }
 0x2b8   :  { %7350 = vmatmul.mubr.msk.f32.gmra.mrb[94].mxu0 %vm710_vm0, %v11234_v37  ;;  %v2209_v42 = vpop.f32.mrb[151].mxu1 }
 0x2b9   :  { %1884 = vmatprep.mubr.f32.mxu0 %v9779_v30 }
 0x2bb   :  { %v11442_v24 = vpop.f32.mrb[152].mxu1 }
 0x2bc   :  { %7351 = vmatmul.mubr.msk.f32.gmra.mrb[96].mxu0 %vm710_vm0, %v11245_v45  ;;  %v2214_v59 = vpop.f32.mrb[153].mxu1 }
 0x2bd   :  { %1890 = vmatprep.mubr.f32.mxu0 %v9779_v30 }
 0x2bf   :  { %v11447_v33 = vpop.f32.mrb[154].mxu1 }
 0x2c0   :  { %7352 = vmatmul.mubr.msk.f32.gmra.mrb[98].mxu0 %vm710_vm0, %v11256_v38  ;;  %v2219_v36 = vpop.f32.mrb[155].mxu1 }
 0x2c1   :  { %1896 = vmatprep.mubr.f32.mxu0 %v9779_v30 }
 0x2c3   :  { %v11452_v37 = vpop.f32.mrb[156].mxu1 }
 0x2c4   :  { %7353 = vmatmul.mubr.msk.f32.gmra.mrb[100].mxu0 %vm710_vm0, %v11267_v55  ;;  %v2224_v49 = vpop.f32.mrb[157].mxu1 }
 0x2c5   :  { %1902 = vmatprep.mubr.f32.mxu0 %v9779_v30 }
 0x2c7   :  { %v11457_v45 = vpop.f32.mrb[158].mxu1 }
 0x2c8   :  { %7354 = vmatmul.mubr.msk.f32.gmra.mrb[102].mxu0 %vm710_vm0, %v11278_v16  ;;  %v2229_v6 = vpop.f32.mrb[159].mxu1 }
 0x2c9   :  { %1908 = vmatprep.mubr.f32.mxu0 %v9779_v30 }
 0x2cb   :  { %v11462_v38 = vpop.f32.mrb[160].mxu1 }
 0x2cc   :  { %7355 = vmatmul.mubr.msk.f32.gmra.mrb[104].mxu0 %vm710_vm0, %v11289_v44  ;;  %v2234_v29 = vpop.f32.mrb[161].mxu1  ;;  %v2896_v44 = vld [vmem:[#allocation2 + $0x100] sm:$0xff] }
 0x2cd   :  { %1914 = vmatprep.mubr.f32.mxu0 %v9779_v30  ;;  %v8682_v5 = vpack.c.bf16 %v2898_v62, %v2896_v44 }
 0x2cf   :  { %v11467_v55 = vpop.f32.mrb[162].mxu1 }
 0x2d0   :  { %7356 = vmatmul.mubr.msk.f32.gmra.mrb[106].mxu0 %vm710_vm0, %v11300_v8  ;;  %v2239_v56 = vpop.f32.mrb[163].mxu1 }
 0x2d1   :  { %1920 = vmatprep.mubr.f32.mxu0 %v9779_v30 }
 0x2d3   :  { %v11472_v16 = vpop.f32.mrb[164].mxu1 }
 0x2d4   :  { %7357 = vmatmul.mubr.msk.f32.gmra.mrb[108].mxu0 %vm710_vm0, %v11311_v17  ;;  %v2244_v11 = vpop.f32.mrb[165].mxu1 }
 0x2d5   :  { %1926 = vmatprep.mubr.f32.mxu0 %v9779_v30 }
 0x2d7   :  { %v11477_v13 = vpop.f32.mrb[166].mxu1 }
 0x2d8   :  { %7358 = vmatmul.mubr.msk.f32.gmra.mrb[110].mxu0 %vm710_vm0, %v11322_v54  ;;  %v2249_v8 = vpop.f32.mrb[167].mxu1 }
 0x2d9   :  { %2408 = vmatprep.mubr.f32.mxu0 %v9779_v30 }
 0x2db   :  { %v11482_v17 = vpop.f32.mrb[168].mxu1 }
 0x2dc   :  { %7415 = vmatmul.mubr.msk.f32.vlgmr.msra.gmra.mrb[56].mxu0 %vm710_vm0, %v11330_v2  ;;  %v2758_v23 = vpop.f32.mrb[169].mxu1 }
 0x2dd   :  { %2414 = vmatprep.mubr.f32.mxu0 %v9779_v30  ;;  %8683 = vmatpush1.bf16.msra.mxu0 %v8682_v5 }
 0x2de   :  { %8685 = vmatprep.subr.bf16.mxu0 %v8684_v4 }
 0x2df   :  { %v11487_v19 = vpop.f32.mrb[170].mxu1 }
 0x2e0   :  { %7416 = vmatmul.mubr.msk.f32.gmra.mrb[58].mxu0 %vm710_vm0, %v11341_v9  ;;  %v2763_v54 = vpop.f32.mrb[171].mxu1 }
 0x2e1   :  { %2420 = vmatprep.mubr.f32.mxu0 %v9779_v30  ;;  %8687 = vmatpush1.bf16.msra.mxu0 %v8686_v50 }
 0x2e3   :  { %v11492_v31 = vpop.f32.mrb[172].mxu1 }
 0x2e4   :  { %7417 = vmatmul.mubr.msk.f32.gmra.mrb[60].mxu0 %vm710_vm0, %v11352_v57  ;;  %v2768_v2 = vpop.f32.mrb[173].mxu1 }
 0x2e5   :  { %2426 = vmatprep.mubr.f32.mxu0 %v9779_v30 }
 0x2e7   :  { %v11497_v41 = vpop.f32.mrb[174].mxu1 }
 0x2e8   :  { %7418 = vmatmul.mubr.msk.f32.gmra.mrb[62].mxu0 %vm710_vm0, %v11357_v14  ;;  %v2773_v47 = vpop.f32.mrb[175].mxu1 }
 0x2e9   :  { %2432 = vmatprep.mubr.f32.mxu0 %v9779_v30 }
 0x2eb   :  { %v11502_v9 = vpop.f32.mrb[176].mxu1 }
 0x2ec   :  { %7419 = vmatmul.mubr.msk.f32.gmra.mrb[64].mxu0 %vm710_vm0, %v11362_v61  ;;  %v2778_v39 = vpop.f32.mrb[177].mxu1 }
 0x2ed   :  { %2438 = vmatprep.mubr.f32.mxu0 %v9779_v30 }
 0x2ef   :  { %v11507_v57 = vpop.f32.mrb[178].mxu1 }
 0x2f0   :  { %7420 = vmatmul.mubr.msk.f32.gmra.mrb[66].mxu0 %vm710_vm0, %v11367_v63  ;;  %v2783_v1 = vpop.f32.mrb[179].mxu1 }
 0x2f1   :  { %2444 = vmatprep.mubr.f32.mxu0 %v9779_v30 }
 0x2f3   :  { %v11512_v14 = vpop.f32.mrb[180].mxu1 }
 0x2f4   :  { %7421 = vmatmul.mubr.msk.f32.gmra.mrb[68].mxu0 %vm710_vm0, %v11372_v3  ;;  %v2788_v15 = vpop.f32.mrb[181].mxu1 }
 0x2f5   :  { %2450 = vmatprep.mubr.f32.mxu0 %v9779_v30 }
 0x2f7   :  { %v11517_v61 = vpop.f32.mrb[182].mxu1 }
 0x2f8   :  { %7422 = vmatmul.mubr.msk.f32.gmra.mrb[70].mxu0 %vm710_vm0, %v11377_v10  ;;  %v2793_v26 = vpop.f32.mrb[183].mxu1 }
 0x2f9   :  { %2456 = vmatprep.mubr.f32.mxu0 %v9779_v30 }
 0x2fb   :  { %v11522_v63 = vpop.f32.mrb[184].mxu1 }
 0x2fc   :  { %7423 = vmatmul.mubr.msk.f32.gmra.mrb[72].mxu0 %vm710_vm0, %v11382_v18  ;;  %v2798_v46 = vpop.f32.mrb[185].mxu1 }
 0x2fd   :  { %2462 = vmatprep.mubr.f32.mxu0 %v9779_v30 }
 0x2ff   :  { %v11527_v3 = vpop.f32.mrb[186].mxu1 }
 0x300   :  { %7424 = vmatmul.mubr.msk.f32.gmra.mrb[74].mxu0 %vm710_vm0, %v11387_v21  ;;  %v2803_v25 = vpop.f32.mrb[187].mxu1 }
 0x301   :  { %2468 = vmatprep.mubr.f32.mxu0 %v9779_v30 }
 0x303   :  { %v11532_v10 = vpop.f32.mrb[188].mxu1 }
 0x304   :  { %7425 = vmatmul.mubr.msk.f32.gmra.mrb[76].mxu0 %vm710_vm0, %v11392_v28  ;;  %v2808_v34 = vpop.f32.mrb[189].mxu1 }
 0x305   :  { %2474 = vmatprep.mubr.f32.mxu0 %v9779_v30 }
 0x307   :  { %v11537_v18 = vpop.f32.mrb[190].mxu1 }
 0x308   :  { %7426 = vmatmul.mubr.msk.f32.gmra.mrb[78].mxu0 %vm710_vm0, %v11397_v32  ;;  %v2813_v22 = vpop.f32.mrb[191].mxu1 }
 0x309   :  { %2480 = vmatprep.mubr.f32.mxu0 %v9779_v30 }
 0x30b   :  { %v11542_v21 = vpop.f32.mrb[192].mxu1 }
 0x30c   :  { %7427 = vmatmul.mubr.msk.f32.gmra.mrb[80].mxu0 %vm710_vm0, %v11402_v43  ;;  %v2818_v27 = vpop.f32.mrb[193].mxu1 }
 0x30d   :  { %2486 = vmatprep.mubr.f32.mxu0 %v9779_v30 }
 0x30f   :  { %v11547_v28 = vpop.f32.mrb[194].mxu1 }
 0x310   :  { %7428 = vmatmul.mubr.msk.f32.gmra.mrb[82].mxu0 %vm710_vm0, %v11407_v48  ;;  %v2823_v42 = vpop.f32.mrb[195].mxu1 }
 0x311   :  { %2492 = vmatprep.mubr.f32.mxu0 %v9779_v30 }
 0x313   :  { %v11552_v32 = vpop.f32.mrb[196].mxu1 }
 0x314   :  { %7429 = vmatmul.mubr.msk.f32.gmra.mrb[84].mxu0 %vm710_vm0, %v11412_v53  ;;  %v2828_v59 = vpop.f32.mrb[197].mxu1 }
 0x315   :  { %2498 = vmatprep.mubr.f32.mxu0 %v9779_v30 }
 0x317   :  { %v11557_v43 = vpop.f32.mrb[198].mxu1 }
 0x318   :  { %7430 = vmatmul.mubr.msk.f32.gmra.mrb[86].mxu0 %vm710_vm0, %v11417_v58  ;;  %v2833_v36 = vpop.f32.mrb[199].mxu1 }
 0x319   :  { %2504 = vmatprep.mubr.f32.mxu0 %v9779_v30 }
 0x31b   :  { %v11562_v48 = vpop.f32.mrb[200].mxu1 }
 0x31c   :  { %7431 = vmatmul.mubr.msk.f32.gmra.mrb[88].mxu0 %vm710_vm0, %v11422_v60  ;;  %v2838_v49 = vpop.f32.mrb[201].mxu1 }
 0x31d   :  { %2510 = vmatprep.mubr.f32.mxu0 %v9779_v30 }
 0x31f   :  { %v11567_v53 = vpop.f32.mrb[202].mxu1 }
 0x320   :  { %7432 = vmatmul.mubr.msk.f32.gmra.mrb[90].mxu0 %vm710_vm0, %v11427_v7  ;;  %v2843_v6 = vpop.f32.mrb[203].mxu1 }
 0x321   :  { %2516 = vmatprep.mubr.f32.mxu0 %v9779_v30 }
 0x323   :  { %v11572_v58 = vpop.f32.mrb[204].mxu1 }
 0x324   :  { %7433 = vmatmul.mubr.msk.f32.gmra.mrb[92].mxu0 %vm710_vm0, %v11432_v12  ;;  %v2848_v29 = vpop.f32.mrb[205].mxu1 }
 0x325   :  { %2522 = vmatprep.mubr.f32.mxu0 %v9779_v30 }
 0x327   :  { %v11577_v60 = vpop.f32.mrb[206].mxu1 }
 0x328   :  { %7434 = vmatmul.mubr.msk.f32.gmra.mrb[94].mxu0 %vm710_vm0, %v11437_v52  ;;  %v2853_v56 = vpop.f32.mrb[207].mxu1 }
 0x329   :  { %2528 = vmatprep.mubr.f32.mxu0 %v9779_v30 }
 0x32b   :  { %v11582_v7 = vpop.f32.mrb[208].mxu1 }
 0x32c   :  { %7435 = vmatmul.mubr.msk.f32.gmra.mrb[96].mxu0 %vm710_vm0, %v11442_v24  ;;  %v2858_v11 = vpop.f32.mrb[209].mxu1 }
 0x32d   :  { %2534 = vmatprep.mubr.f32.mxu0 %v9779_v30 }
 0x32f   :  { %v11587_v12 = vpop.f32.mrb[210].mxu1 }
 0x330   :  { %7436 = vmatmul.mubr.msk.f32.gmra.mrb[98].mxu0 %vm710_vm0, %v11447_v33  ;;  %v2863_v44 = vpop.f32.mrb[211].mxu1 }
 0x331   :  { %2540 = vmatprep.mubr.f32.mxu0 %v9779_v30 }
 0x333   :  { %v11592_v52 = vpop.f32.mrb[212].mxu1 }
 0x334   :  { %7437 = vmatmul.mubr.msk.f32.gmra.mrb[100].mxu0 %vm710_vm0, %v11452_v37  ;;  %v2868_v62 = vpop.f32.mrb[213].mxu1 }
 0x335   :  { %2546 = vmatprep.mubr.f32.mxu0 %v9779_v30 }
 0x337   :  { %v11597_v24 = vpop.f32.mrb[214].mxu1 }
 0x338   :  { %7438 = vmatmul.mubr.msk.f32.gmra.mrb[102].mxu0 %vm710_vm0, %v11457_v45  ;;  %v2873_v35 = vpop.f32.mrb[215].mxu1 }
 0x339   :  { %2552 = vmatprep.mubr.f32.mxu0 %v9779_v30 }
 0x33b   :  { %v11602_v33 = vpop.f32.mrb[216].mxu1 }
 0x33c   :  { %7439 = vmatmul.mubr.msk.f32.gmra.mrb[104].mxu0 %vm710_vm0, %v11462_v38  ;;  %v2878_v20 = vpop.f32.mrb[217].mxu1 }
 0x33d   :  { %2558 = vmatprep.mubr.f32.mxu0 %v9779_v30 }
 0x33f   :  { %v2881_v37 = vpop.f32.mrb[218].mxu1 }
 0x340   :  { %7440 = vmatmul.mubr.msk.f32.gmra.mrb[106].mxu0 %vm710_vm0, %v11467_v55  ;;  %v2883_v8 = vpop.f32.mrb[219].mxu1  ;;  %v3279_v55 = vlaneseq }
 0x341   :  { %2564 = vmatprep.mubr.f32.mxu0 %v9779_v30 }
 0x343   :  { %v2886_v5 = vpop.f32.mrb[220].mxu1 }
 0x344   :  { %7441 = vmatmul.mubr.msk.f32.gmra.mrb[108].mxu0 %vm710_vm0, %v11472_v16  ;;  %v2888_v45 = vpop.f32.mrb[221].mxu1  ;;  %v3402_v16 = vld [vmem:[#allocation4 + $0x8] sm:$0xff] }
 0x345   :  { %2570 = vmatprep.mubr.f32.mxu0 %v9779_v30  ;;  %7527 = vmatprep.mubr.msk.f32.mxu1 %vm3429_vm1, %v3402_v16 }
 0x347   :  { %v2891_v4 = vpop.f32.mrb[222].mxu1 }
 0x348   :  { %7442 = vmatmul.mubr.msk.f32.gmra.mrb[110].mxu0 %vm710_vm0, %v11477_v13  ;;  %v2893_v38 = vpop.f32.mrb[223].mxu1  ;;  %v11696_v13 = vshrl.u32 %v3279_v55, 7 }
 0x349   :  { %3052 = vmatprep.mubr.f32.mxu0 %v9779_v30 }
 0x34a   :  { %v3281_v51 = vsub.s32 0, %v11696_v13 }
 0x34c   :  { %7499 = vmatmul.mubr.msk.f32.vlgmr.msra.gmra.mrb[56].mxu0 %vm710_vm0, %v11482_v17  ;;  %v3285_v17 = vsub.s32 1, %v11696_v13  ;;  %v11706_v23 = vrot.slane %v3277_v40, %v3281_v51 }
 0x34d   :  { %3058 = vmatprep.mubr.f32.mxu0 %v9779_v30 }
 0x350   :  { %7500 = vmatmul.mubr.msk.f32.gmra.mrb[58].mxu0 %vm710_vm0, %v11487_v19  ;;  %v11710_v19 = vrot.slane %v3277_v40, %v3285_v17 }
 0x351   :  { %3064 = vmatprep.mubr.f32.mxu0 %v9779_v30 }
 0x354   :  { %7501 = vmatmul.mubr.msk.f32.gmra.mrb[60].mxu0 %vm710_vm0, %v11492_v31 }
 0x355   :  { %3070 = vmatprep.mubr.f32.mxu0 %v9779_v30 }
 0x358   :  { %7502 = vmatmul.mubr.msk.f32.gmra.mrb[62].mxu0 %vm710_vm0, %v11497_v41 }
 0x359   :  { %3076 = vmatprep.mubr.f32.mxu0 %v9779_v30 }
 0x35c   :  { %7503 = vmatmul.mubr.msk.f32.gmra.mrb[64].mxu0 %vm710_vm0, %v11502_v9 }
 0x35d   :  { %3082 = vmatprep.mubr.f32.mxu0 %v9779_v30 }
 0x360   :  { %7504 = vmatmul.mubr.msk.f32.gmra.mrb[66].mxu0 %vm710_vm0, %v11507_v57 }
 0x361   :  { %3088 = vmatprep.mubr.f32.mxu0 %v9779_v30 }
 0x364   :  { %7505 = vmatmul.mubr.msk.f32.gmra.mrb[68].mxu0 %vm710_vm0, %v11512_v14 }
 0x365   :  { %3094 = vmatprep.mubr.f32.mxu0 %v9779_v30 }
 0x368   :  { %7506 = vmatmul.mubr.msk.f32.gmra.mrb[70].mxu0 %vm710_vm0, %v11517_v61 }
 0x369   :  { %3100 = vmatprep.mubr.f32.mxu0 %v9779_v30 }
 0x36c   :  { %7507 = vmatmul.mubr.msk.f32.gmra.mrb[72].mxu0 %vm710_vm0, %v11522_v63 }
 0x36d   :  { %3106 = vmatprep.mubr.f32.mxu0 %v9779_v30 }
 0x370   :  { %7508 = vmatmul.mubr.msk.f32.gmra.mrb[74].mxu0 %vm710_vm0, %v11527_v3 }
 0x371   :  { %3112 = vmatprep.mubr.f32.mxu0 %v9779_v30 }
 0x374   :  { %7509 = vmatmul.mubr.msk.f32.gmra.mrb[76].mxu0 %vm710_vm0, %v11532_v10 }
 0x375   :  { %3118 = vmatprep.mubr.f32.mxu0 %v9779_v30 }
 0x378   :  { %7510 = vmatmul.mubr.msk.f32.gmra.mrb[78].mxu0 %vm710_vm0, %v11537_v18 }
 0x379   :  { %3124 = vmatprep.mubr.f32.mxu0 %v9779_v30 }
 0x37c   :  { %7511 = vmatmul.mubr.msk.f32.gmra.mrb[80].mxu0 %vm710_vm0, %v11542_v21 }
 0x37d   :  { %3130 = vmatprep.mubr.f32.mxu0 %v9779_v30 }
 0x380   :  { %7512 = vmatmul.mubr.msk.f32.gmra.mrb[82].mxu0 %vm710_vm0, %v11547_v28 }
 0x381   :  { %3136 = vmatprep.mubr.f32.mxu0 %v9779_v30 }
 0x384   :  { %7513 = vmatmul.mubr.msk.f32.gmra.mrb[84].mxu0 %vm710_vm0, %v11552_v32 }
 0x385   :  { %3142 = vmatprep.mubr.f32.mxu0 %v9779_v30 }
 0x388   :  { %7514 = vmatmul.mubr.msk.f32.gmra.mrb[86].mxu0 %vm710_vm0, %v11557_v43 }
 0x389   :  { %3148 = vmatprep.mubr.f32.mxu0 %v9779_v30 }
 0x38c   :  { %7515 = vmatmul.mubr.msk.f32.gmra.mrb[88].mxu0 %vm710_vm0, %v11562_v48 }
 0x38d   :  { %3154 = vmatprep.mubr.f32.mxu0 %v9779_v30 }
 0x390   :  { %7516 = vmatmul.mubr.msk.f32.gmra.mrb[90].mxu0 %vm710_vm0, %v11567_v53 }
 0x391   :  { %3160 = vmatprep.mubr.f32.mxu0 %v9779_v30 }
 0x394   :  { %7517 = vmatmul.mubr.msk.f32.gmra.mrb[92].mxu0 %vm710_vm0, %v11572_v58 }
 0x395   :  { %3166 = vmatprep.mubr.f32.mxu0 %v9779_v30 }
 0x398   :  { %7518 = vmatmul.mubr.msk.f32.gmra.mrb[94].mxu0 %vm710_vm0, %v11577_v60 }
 0x399   :  { %3172 = vmatprep.mubr.f32.mxu0 %v9779_v30 }
 0x39c   :  { %7519 = vmatmul.mubr.msk.f32.gmra.mrb[96].mxu0 %vm710_vm0, %v11582_v7 }
 0x39d   :  { %3178 = vmatprep.mubr.f32.mxu0 %v9779_v30 }
 0x3a0   :  { %7520 = vmatmul.mubr.msk.f32.gmra.mrb[98].mxu0 %vm710_vm0, %v11587_v12 }
 0x3a1   :  { %3184 = vmatprep.mubr.f32.mxu0 %v9779_v30 }
 0x3a4   :  { %7521 = vmatmul.mubr.msk.f32.gmra.mrb[100].mxu0 %vm710_vm0, %v11592_v52 }
 0x3a5   :  { %3190 = vmatprep.mubr.f32.mxu0 %v9779_v30 }
 0x3a8   :  { %7522 = vmatmul.mubr.msk.f32.gmra.mrb[102].mxu0 %vm710_vm0, %v11597_v24 }
 0x3a9   :  { %3196 = vmatprep.mubr.f32.mxu0 %v9779_v30 }
 0x3ac   :  { %7523 = vmatmul.mubr.msk.f32.gmra.mrb[104].mxu0 %vm710_vm0, %v11602_v33 }
 0x3ad   :  { %3202 = vmatprep.mubr.f32.mxu0 %v9779_v30 }
 0x3b0   :  { %7524 = vmatmul.mubr.msk.f32.gmra.mrb[106].mxu0 %vm710_vm0, %v2881_v37 }
 0x3b1   :  { %3208 = vmatprep.mubr.f32.mxu0 %v9779_v30 }
 0x3b4   :  { %7525 = vmatmul.mubr.msk.f32.gmra.mrb[108].mxu0 %vm710_vm0, %v2886_v5 }
 0x3b5   :  { %3214 = vmatprep.mubr.f32.mxu0 %v9779_v30 }
 0x3b8   :  { %7526 = vmatmul.mubr.msk.f32.gmra.mrb[110].mxu0 %vm710_vm0, %v2891_v4 }
 0x41f   :  { %v3054_v50 = vpop.f32.mrb[56].mxu0 }
 0x420   :  { %v3056_v54 = vpop.f32.mrb[57].mxu0  ;;  %v3289_v31 = vadd.f32 %v11706_v23, %v3054_v50 }
 0x421   :  { %v3290_v2 = vadd.f32 %v11710_v19, %v3056_v54 }
 0x422   :  { %v3345_v57 = vmax.f32 %v3289_v31, 0.0 }
 0x423   :  { %v3060_v41 = vpop.f32.mrb[58].mxu0  ;;  %v3346_v14 = vmax.f32 %v3290_v2, 0.0 }
 0x424   :  { %v3291_v47 = vadd.f32 %v11706_v23, %v3060_v41  ;;  %v3062_v9 = vpop.f32.mrb[59].mxu0 }
 0x425   :  { %v3292_v39 = vadd.f32 %v11710_v19, %v3062_v9 }
 0x426   :  { %v3347_v1 = vmax.f32 %v3291_v47, 0.0 }
 0x427   :  { %v3348_v15 = vmax.f32 %v3292_v39, 0.0  ;;  %v3066_v61 = vpop.f32.mrb[60].mxu0 }
 0x428   :  { %v11716_v26 = vpack.c.bf16 %v3347_v1, %v3345_v57  ;;  %v3068_v63 = vpop.f32.mrb[61].mxu0  ;;  %v3293_v3 = vadd.f32 %v11706_v23, %v3066_v61 }
 0x429   :  { %v11718_v46 = vpack.c.bf16 %v3348_v15, %v3346_v14  ;;  %v3294_v25 = vadd.f32 %v11710_v19, %v3068_v63 }
 0x42a   :  { %v3349_v21 = vmax.f32 %v3293_v3, 0.0 }
 0x42b   :  { %v3072_v10 = vpop.f32.mrb[62].mxu0  ;;  %8689 = vmatprep.subr.bf16.mxu1 %v11718_v46  ;;  %v3350_v28 = vmax.f32 %v3294_v25, 0.0 }
 0x42c   :  { %v3295_v34 = vadd.f32 %v11706_v23, %v3072_v10  ;;  %v3074_v18 = vpop.f32.mrb[63].mxu0  ;;  %8691 = vmatpush1.bf16.msra.mxu1 %v11716_v26 }
 0x42d   :  { %v3296_v22 = vadd.f32 %v11710_v19, %v3074_v18 }
 0x42e   :  { %v3351_v27 = vmax.f32 %v3295_v34, 0.0 }
 0x42f   :  { %v3352_v42 = vmax.f32 %v3296_v22, 0.0  ;;  %v3078_v32 = vpop.f32.mrb[64].mxu0 }
 0x430   :  { %v11726_v59 = vpack.c.bf16 %v3351_v27, %v3349_v21  ;;  %v3080_v43 = vpop.f32.mrb[65].mxu0  ;;  %v3297_v48 = vadd.f32 %v11706_v23, %v3078_v32 }
 0x431   :  { %v11728_v36 = vpack.c.bf16 %v3352_v42, %v3350_v28  ;;  %v3298_v49 = vadd.f32 %v11710_v19, %v3080_v43 }
 0x432   :  { %v3353_v60 = vmax.f32 %v3297_v48, 0.0 }
 0x433   :  { %v3084_v53 = vpop.f32.mrb[66].mxu0  ;;  %8693 = vmatprep.subr.bf16.mxu1 %v11728_v36  ;;  %v3354_v7 = vmax.f32 %v3298_v49, 0.0 }
 0x434   :  { %v3299_v6 = vadd.f32 %v11706_v23, %v3084_v53  ;;  %v3086_v58 = vpop.f32.mrb[67].mxu0  ;;  %8695 = vmatpush1.bf16.msra.mxu1 %v11726_v59 }
 0x435   :  { %v3300_v29 = vadd.f32 %v11710_v19, %v3086_v58 }
 0x436   :  { %v3355_v56 = vmax.f32 %v3299_v6, 0.0 }
 0x437   :  { %v3356_v11 = vmax.f32 %v3300_v29, 0.0  ;;  %v3090_v12 = vpop.f32.mrb[68].mxu0 }
 0x438   :  { %v11736_v44 = vpack.c.bf16 %v3355_v56, %v3353_v60  ;;  %v3092_v52 = vpop.f32.mrb[69].mxu0  ;;  %v3301_v24 = vadd.f32 %v11706_v23, %v3090_v12 }
 0x439   :  { %v11738_v62 = vpack.c.bf16 %v3356_v11, %v3354_v7  ;;  %v3302_v35 = vadd.f32 %v11710_v19, %v3092_v52 }
 0x43a   :  { %v3357_v5 = vmax.f32 %v3301_v24, 0.0 }
 0x43b   :  { %v3096_v33 = vpop.f32.mrb[70].mxu0  ;;  %8697 = vmatprep.subr.bf16.mxu1 %v11738_v62  ;;  %v3358_v4 = vmax.f32 %v3302_v35, 0.0 }
 0x43c   :  { %v3303_v20 = vadd.f32 %v11706_v23, %v3096_v33  ;;  %v3098_v37 = vpop.f32.mrb[71].mxu0  ;;  %8699 = vmatpush1.bf16.msra.mxu1 %v11736_v44 }
 0x43d   :  { %v3304_v8 = vadd.f32 %v11710_v19, %v3098_v37 }
 0x43e   :  { %v3359_v45 = vmax.f32 %v3303_v20, 0.0 }
 0x43f   :  { %v3360_v38 = vmax.f32 %v3304_v8, 0.0  ;;  %v3102_v55 = vpop.f32.mrb[72].mxu0 }
 0x440   :  { %v11746_v16 = vpack.c.bf16 %v3359_v45, %v3357_v5  ;;  %v3104_v40 = vpop.f32.mrb[73].mxu0  ;;  %v3305_v54 = vadd.f32 %v11706_v23, %v3102_v55 }
 0x441   :  { %v11748_v50 = vpack.c.bf16 %v3360_v38, %v3358_v4  ;;  %v3306_v31 = vadd.f32 %v11710_v19, %v3104_v40 }
 0x442   :  { %v3361_v39 = vmax.f32 %v3305_v54, 0.0 }
 0x443   :  { %v3108_v2 = vpop.f32.mrb[74].mxu0  ;;  %8701 = vmatprep.subr.bf16.mxu1 %v11748_v50  ;;  %v3362_v1 = vmax.f32 %v3306_v31, 0.0 }
 0x444   :  { %v3307_v41 = vadd.f32 %v11706_v23, %v3108_v2  ;;  %v3110_v47 = vpop.f32.mrb[75].mxu0  ;;  %8703 = vmatpush1.bf16.msra.mxu1 %v11746_v16 }
 0x445   :  { %v3308_v9 = vadd.f32 %v11710_v19, %v3110_v47 }
 0x446   :  { %v3363_v57 = vmax.f32 %v3307_v41, 0.0 }
 0x447   :  { %v3364_v14 = vmax.f32 %v3308_v9, 0.0  ;;  %v3114_v15 = vpop.f32.mrb[76].mxu0 }
 0x448   :  { %v11756_v61 = vpack.c.bf16 %v3363_v57, %v3361_v39  ;;  %v3116_v63 = vpop.f32.mrb[77].mxu0  ;;  %v3309_v25 = vadd.f32 %v11706_v23, %v3114_v15 }
 0x449   :  { %v11758_v3 = vpack.c.bf16 %v3364_v14, %v3362_v1  ;;  %v3310_v10 = vadd.f32 %v11710_v19, %v3116_v63 }
 0x44a   :  { %v3365_v27 = vmax.f32 %v3309_v25, 0.0 }
 0x44b   :  { %v3120_v34 = vpop.f32.mrb[78].mxu0  ;;  %8705 = vmatprep.subr.bf16.mxu1 %v11758_v3  ;;  %v3366_v42 = vmax.f32 %v3310_v10, 0.0 }
 0x44c   :  { %v3311_v18 = vadd.f32 %v11706_v23, %v3120_v34  ;;  %v3122_v22 = vpop.f32.mrb[79].mxu0  ;;  %8707 = vmatpush1.bf16.msra.mxu1 %v11756_v61 }
 0x44d   :  { %v3312_v21 = vadd.f32 %v11710_v19, %v3122_v22 }
 0x44e   :  { %v3367_v28 = vmax.f32 %v3311_v18, 0.0 }
 0x44f   :  { %v3368_v32 = vmax.f32 %v3312_v21, 0.0  ;;  %v3126_v43 = vpop.f32.mrb[80].mxu0 }
 0x450   :  { %v11766_v48 = vpack.c.bf16 %v3367_v28, %v3365_v27  ;;  %v3128_v49 = vpop.f32.mrb[81].mxu0  ;;  %v3313_v6 = vadd.f32 %v11706_v23, %v3126_v43 }
 0x451   :  { %v11768_v53 = vpack.c.bf16 %v3368_v32, %v3366_v42  ;;  %v3314_v58 = vadd.f32 %v11710_v19, %v3128_v49 }
 0x452   :  { %v3369_v11 = vmax.f32 %v3313_v6, 0.0 }
 0x453   :  { %v3132_v29 = vpop.f32.mrb[82].mxu0  ;;  %8709 = vmatprep.subr.bf16.mxu1 %v11768_v53  ;;  %v3370_v52 = vmax.f32 %v3314_v58, 0.0 }
 0x454   :  { %v3315_v60 = vadd.f32 %v11706_v23, %v3132_v29  ;;  %v3134_v56 = vpop.f32.mrb[83].mxu0  ;;  %8711 = vmatpush1.bf16.msra.mxu1 %v11766_v48 }
 0x455   :  { %v3316_v7 = vadd.f32 %v11710_v19, %v3134_v56 }
 0x456   :  { %v3371_v12 = vmax.f32 %v3315_v60, 0.0 }
 0x457   :  { %v3372_v24 = vmax.f32 %v3316_v7, 0.0  ;;  %v3138_v35 = vpop.f32.mrb[84].mxu0 }
 0x458   :  { %v11776_v33 = vpack.c.bf16 %v3371_v12, %v3369_v11  ;;  %v3140_v20 = vpop.f32.mrb[85].mxu0  ;;  %v3317_v8 = vadd.f32 %v11706_v23, %v3138_v35 }
 0x459   :  { %v11778_v37 = vpack.c.bf16 %v3372_v24, %v3370_v52  ;;  %v3318_v5 = vadd.f32 %v11710_v19, %v3140_v20 }
 0x45a   :  { %v3373_v40 = vmax.f32 %v3317_v8, 0.0 }
 0x45b   :  { %v3144_v45 = vpop.f32.mrb[86].mxu0  ;;  %8713 = vmatprep.subr.bf16.mxu1 %v11778_v37  ;;  %v3374_v31 = vmax.f32 %v3318_v5, 0.0 }
 0x45c   :  { %v3319_v4 = vadd.f32 %v11706_v23, %v3144_v45  ;;  %v3146_v38 = vpop.f32.mrb[87].mxu0  ;;  %8715 = vmatpush1.bf16.msra.mxu1 %v11776_v33 }
 0x45d   :  { %v3320_v55 = vadd.f32 %v11710_v19, %v3146_v38 }
 0x45e   :  { %v3375_v54 = vmax.f32 %v3319_v4, 0.0 }
 0x45f   :  { %v3376_v2 = vmax.f32 %v3320_v55, 0.0  ;;  %v3150_v41 = vpop.f32.mrb[88].mxu0 }
 0x460   :  { %v11786_v47 = vpack.c.bf16 %v3375_v54, %v3373_v40  ;;  %v3152_v9 = vpop.f32.mrb[89].mxu0  ;;  %v3321_v57 = vadd.f32 %v11706_v23, %v3150_v41 }
 0x461   :  { %v11788_v39 = vpack.c.bf16 %v3376_v2, %v3374_v31  ;;  %v3322_v1 = vadd.f32 %v11710_v19, %v3152_v9 }
 0x462   :  { %v3377_v10 = vmax.f32 %v3321_v57, 0.0 }
 0x463   :  { %v3156_v14 = vpop.f32.mrb[90].mxu0  ;;  %8717 = vmatprep.subr.bf16.mxu1 %v11788_v39  ;;  %v3378_v18 = vmax.f32 %v3322_v1, 0.0 }
 0x464   :  { %v3323_v15 = vadd.f32 %v11706_v23, %v3156_v14  ;;  %v3158_v63 = vpop.f32.mrb[91].mxu0  ;;  %8719 = vmatpush1.bf16.msra.mxu1 %v11786_v47 }
 0x465   :  { %v3324_v25 = vadd.f32 %v11710_v19, %v3158_v63 }
 0x466   :  { %v3379_v34 = vmax.f32 %v3323_v15, 0.0 }
 0x467   :  { %v3380_v22 = vmax.f32 %v3324_v25, 0.0  ;;  %v3162_v21 = vpop.f32.mrb[92].mxu0 }
 0x468   :  { %v11796_v27 = vpack.c.bf16 %v3379_v34, %v3377_v10  ;;  %v3164_v28 = vpop.f32.mrb[93].mxu0  ;;  %v3325_v32 = vadd.f32 %v11706_v23, %v3162_v21 }
 0x469   :  { %v11798_v42 = vpack.c.bf16 %v3380_v22, %v3378_v18  ;;  %v3326_v43 = vadd.f32 %v11710_v19, %v3164_v28 }
 0x46a   :  { %v3381_v60 = vmax.f32 %v3325_v32, 0.0 }
 0x46b   :  { %v3168_v49 = vpop.f32.mrb[94].mxu0  ;;  %8721 = vmatprep.subr.bf16.mxu1 %v11798_v42  ;;  %v3382_v7 = vmax.f32 %v3326_v43, 0.0 }
 0x46c   :  { %v3327_v6 = vadd.f32 %v11706_v23, %v3168_v49  ;;  %v3170_v58 = vpop.f32.mrb[95].mxu0  ;;  %8723 = vmatpush1.bf16.msra.mxu1 %v11796_v27 }
 0x46d   :  { %v3328_v29 = vadd.f32 %v11710_v19, %v3170_v58 }
 0x46e   :  { %v3383_v56 = vmax.f32 %v3327_v6, 0.0 }
 0x46f   :  { %v3384_v11 = vmax.f32 %v3328_v29, 0.0  ;;  %v3174_v12 = vpop.f32.mrb[96].mxu0 }
 0x470   :  { %v11806_v52 = vpack.c.bf16 %v3383_v56, %v3381_v60  ;;  %v3176_v24 = vpop.f32.mrb[97].mxu0  ;;  %v3329_v20 = vadd.f32 %v11706_v23, %v3174_v12 }
 0x471   :  { %v11808_v35 = vpack.c.bf16 %v3384_v11, %v3382_v7  ;;  %v3330_v8 = vadd.f32 %v11710_v19, %v3176_v24 }
 0x472   :  { %v3385_v55 = vmax.f32 %v3329_v20, 0.0 }
 0x473   :  { %v3180_v5 = vpop.f32.mrb[98].mxu0  ;;  %8725 = vmatprep.subr.bf16.mxu1 %v11808_v35  ;;  %v3386_v54 = vmax.f32 %v3330_v8, 0.0 }
 0x474   :  { %v3331_v45 = vadd.f32 %v11706_v23, %v3180_v5  ;;  %v3182_v4 = vpop.f32.mrb[99].mxu0  ;;  %8727 = vmatpush1.bf16.msra.mxu1 %v11806_v52 }
 0x475   :  { %v3332_v38 = vadd.f32 %v11710_v19, %v3182_v4 }
 0x476   :  { %v3387_v40 = vmax.f32 %v3331_v45, 0.0 }
 0x477   :  { %v3388_v31 = vmax.f32 %v3332_v38, 0.0  ;;  %v3186_v2 = vpop.f32.mrb[100].mxu0 }
 0x478   :  { %v11816_v41 = vpack.c.bf16 %v3387_v40, %v3385_v55  ;;  %v3188_v9 = vpop.f32.mrb[101].mxu0  ;;  %v3333_v1 = vadd.f32 %v11706_v23, %v3186_v2 }
 0x479   :  { %v11818_v57 = vpack.c.bf16 %v3388_v31, %v3386_v54  ;;  %v3334_v14 = vadd.f32 %v11710_v19, %v3188_v9 }
 0x47a   :  { %v3389_v34 = vmax.f32 %v3333_v1, 0.0 }
 0x47b   :  { %v3192_v15 = vpop.f32.mrb[102].mxu0  ;;  %8729 = vmatprep.subr.bf16.mxu1 %v11818_v57  ;;  %v3390_v22 = vmax.f32 %v3334_v14, 0.0 }
 0x47c   :  { %v3335_v63 = vadd.f32 %v11706_v23, %v3192_v15  ;;  %v3194_v25 = vpop.f32.mrb[103].mxu0  ;;  %8731 = vmatpush1.bf16.msra.mxu1 %v11816_v41 }
 0x47d   :  { %v3336_v10 = vadd.f32 %v11710_v19, %v3194_v25 }
 0x47e   :  { %v3391_v18 = vmax.f32 %v3335_v63, 0.0 }
 0x47f   :  { %v3392_v21 = vmax.f32 %v3336_v10, 0.0  ;;  %v3198_v28 = vpop.f32.mrb[104].mxu0  ;;  %v3401_v10 = vld [vmem:[#allocation4] sm:$0xff] }
 0x480   :  { %v11826_v32 = vpack.c.bf16 %v3391_v18, %v3389_v34  ;;  %v3200_v43 = vpop.f32.mrb[105].mxu0  ;;  %v3337_v6 = vadd.f32 %v11706_v23, %v3198_v28  ;;  %v3406_v34 = vld [vmem:[#allocation4 + $0x28] sm:$0xff]  ;;  %v3405_v18 = vld [vmem:[#allocation4 + $0x20] sm:$0xff]  ;;  %v3625_v28 = vld [vmem:[#allocation4 + $0xf8] sm:$0xff] }
 0x481   :  { %v11828_v49 = vpack.c.bf16 %v3392_v21, %v3390_v22  ;;  %v3338_v58 = vadd.f32 %v11710_v19, %v3200_v43  ;;  %v3408_v22 = vld [vmem:[#allocation4 + $0x38] sm:$0xff]  ;;  %v3622_v21 = vld [vmem:[#allocation4 + $0xe0] sm:$0xff]  ;;  %v3627_v43 = vld [vmem:[#allocation4 + $0x108] sm:$0xff] }
 0x482   :  { %v3393_v11 = vmax.f32 %v3337_v6, 0.0  ;;  %v3629_v6 = vld [vmem:[#allocation4 + $0x118] sm:$0xff] }
 0x483   :  { %v3204_v29 = vpop.f32.mrb[106].mxu0  ;;  %8733 = vmatprep.subr.bf16.mxu1 %v11828_v49  ;;  %v3394_v24 = vmax.f32 %v3338_v58, 0.0  ;;  %v3628_v58 = vld [vmem:[#allocation4 + $0x110] sm:$0xff] }
 0x484   :  { %v3339_v60 = vadd.f32 %v11706_v23, %v3204_v29  ;;  %v3206_v56 = vpop.f32.mrb[107].mxu0  ;;  %8735 = vmatpush1.bf16.msra.mxu1 %v11826_v32  ;;  %v3631_v29 = vld [vmem:[#allocation4 + $0x128] sm:$0xff] }
 0x485   :  { %v3340_v7 = vadd.f32 %v11710_v19, %v3206_v56  ;;  %v3633_v56 = vld [vmem:[#allocation4 + $0x138] sm:$0xff] }
 0x486   :  { %v3395_v12 = vmax.f32 %v3339_v60, 0.0  ;;  %v3630_v60 = vld [vmem:[#allocation4 + $0x120] sm:$0xff] }
 0x487   :  { %v3396_v20 = vmax.f32 %v3340_v7, 0.0  ;;  %v3210_v8 = vpop.f32.mrb[108].mxu0  ;;  %v3632_v7 = vld [vmem:[#allocation4 + $0x130] sm:$0xff] }
 0x488   :  { %v11836_v5 = vpack.c.bf16 %v3395_v12, %v3393_v11  ;;  %v3212_v45 = vpop.f32.mrb[109].mxu0  ;;  %v3341_v38 = vadd.f32 %v11706_v23, %v3210_v8  ;;  %v3635_v11 = vld [vmem:[#allocation4 + $0x148] sm:$0xff]  ;;  %v3634_v12 = vld [vmem:[#allocation4 + $0x140] sm:$0xff] }
 0x489   :  { %v11838_v4 = vpack.c.bf16 %v3396_v20, %v3394_v24  ;;  %v3342_v55 = vadd.f32 %v11710_v19, %v3212_v45  ;;  %v3637_v24 = vld [vmem:[#allocation4 + $0x158] sm:$0xff]  ;;  %v3636_v20 = vld [vmem:[#allocation4 + $0x150] sm:$0xff]  ;;  %v3639_v8 = vld [vmem:[#allocation4 + $0x168] sm:$0xff] }
 0x48a   :  { %v3397_v9 = vmax.f32 %v3341_v38, 0.0  ;;  %v3641_v45 = vld [vmem:[#allocation4 + $0x178] sm:$0xff]  ;;  %v3643_v38 = vld [vmem:[#allocation4 + $0x188] sm:$0xff] }
 0x48b   :  { %v3216_v40 = vpop.f32.mrb[110].mxu0  ;;  %8737 = vmatprep.subr.bf16.mxu1 %v11838_v4  ;;  %v3398_v14 = vmax.f32 %v3342_v55, 0.0  ;;  %v3642_v55 = vld [vmem:[#allocation4 + $0x180] sm:$0xff] }
 0x48c   :  { %v3343_v54 = vadd.f32 %v11706_v23, %v3216_v40  ;;  %v3218_v31 = vpop.f32.mrb[111].mxu0  ;;  %8739 = vmatpush1.bf16.msra.mxu1 %v11836_v5  ;;  %v3404_v23 = vld [vmem:[#allocation4 + $0x18] sm:$0xff] }
 0x48d   :  { %v3344_v2 = vadd.f32 %v11710_v19, %v3218_v31  ;;  %v3403_v19 = vld [vmem:[#allocation4 + $0x10] sm:$0xff]  ;;  %v3645_v40 = vld [vmem:[#allocation4 + $0x198] sm:$0xff]  ;;  %v3647_v31 = vld [vmem:[#allocation4 + $0x1a8] sm:$0xff] }
 0x48e   :  { %v3399_v1 = vmax.f32 %v3343_v54, 0.0  ;;  %v3644_v54 = vld [vmem:[#allocation4 + $0x190] sm:$0xff] }
 0x48f   :  { %v3400_v15 = vmax.f32 %v3344_v2, 0.0  ;;  %v3869_v2 = vld [vmem:[#allocation6] sm:$0xff] }
 0x490   :  { %v11846_v63 = vpack.c.bf16 %v3399_v1, %v3397_v9  ;;  %v3870_v9 = vld [vmem:[#allocation6 + $0x8] sm:$0xff]  ;;  %v3646_v1 = vld [vmem:[#allocation4 + $0x1a0] sm:$0xff] }
 0x491   :  { %v11848_v25 = vpack.c.bf16 %v3400_v15, %v3398_v14  ;;  %v8801_v14 = vpack.c.bf16 %v3870_v9, %v3869_v2  ;;  %v3649_v15 = vld [vmem:[#allocation4 + $0x1b8] sm:$0xff] }
 0x493   :  { %8741 = vmatprep.subr.bf16.mxu1 %v11848_v25 }
 0x494   :  { %8743 = vmatpush1.bf16.msra.mxu1 %v11846_v63 }
 0x495   :  { %8745 = vmatprep.subr.bf16.mxu1 %v11718_v46  ;;  %v3410_v46 = vld [vmem:[#allocation4 + $0x48] sm:$0xff] }
 0x497   :  { %3537 = vmatmul.mubr.f32.vlgmr.msra.gmra.mrb[224].mxu1 %v3401_v10  ;;  %v3648_v10 = vld [vmem:[#allocation4 + $0x1b0] sm:$0xff] }
 0x498   :  { %8747 = vmatpush1.bf16.msra.mxu1 %v11716_v26  ;;  %7528 = vmatprep.mubr.msk.f32.mxu1 %vm3429_vm1, %v3404_v23  ;;  %v3407_v26 = vld [vmem:[#allocation4 + $0x30] sm:$0xff] }
 0x499   :  { %8749 = vmatprep.subr.bf16.mxu1 %v11728_v36  ;;  %v3412_v36 = vld [vmem:[#allocation4 + $0x58] sm:$0xff] }
 0x49b   :  { %3543 = vmatmul.mubr.f32.gmra.mrb[226].mxu1 %v3403_v19  ;;  %v3873_v19 = vld [vmem:[#allocation6 + $0x20] sm:$0xff] }
 0x49c   :  { %8751 = vmatpush1.bf16.msra.mxu1 %v11726_v59  ;;  %7529 = vmatprep.mubr.msk.f32.mxu1 %vm3429_vm1, %v3406_v34  ;;  %v3409_v59 = vld [vmem:[#allocation4 + $0x40] sm:$0xff]  ;;  %v3874_v34 = vld [vmem:[#allocation6 + $0x28] sm:$0xff] }
 0x49d   :  { %8753 = vmatprep.subr.bf16.mxu1 %v11738_v62  ;;  %v3414_v62 = vld [vmem:[#allocation4 + $0x68] sm:$0xff] }
 0x49f   :  { %3549 = vmatmul.mubr.f32.gmra.mrb[228].mxu1 %v3405_v18  ;;  %v8807_v18 = vpack.c.bf16 %v3874_v34, %v3873_v19  ;;  %v4071_v34 = vld [vmem:[#allocation6 + $0xb8] sm:$0xff] }
 0x4a0   :  { %8755 = vmatpush1.bf16.msra.mxu1 %v11736_v44  ;;  %7530 = vmatprep.mubr.msk.f32.mxu1 %vm3429_vm1, %v3408_v22  ;;  %v3411_v44 = vld [vmem:[#allocation4 + $0x50] sm:$0xff] }
 0x4a1   :  { %8757 = vmatprep.subr.bf16.mxu1 %v11748_v50  ;;  %v3416_v50 = vld [vmem:[#allocation4 + $0x78] sm:$0xff]  ;;  %v3875_v22 = vld [vmem:[#allocation6 + $0x30] sm:$0xff] }
 0x4a3   :  { %3555 = vmatmul.mubr.f32.gmra.mrb[230].mxu1 %v3407_v26  ;;  %v3876_v26 = vld [vmem:[#allocation6 + $0x38] sm:$0xff] }
 0x4a4   :  { %8759 = vmatpush1.bf16.msra.mxu1 %v11746_v16  ;;  %7531 = vmatprep.mubr.msk.f32.mxu1 %vm3429_vm1, %v3410_v46  ;;  %v3413_v16 = vld [vmem:[#allocation4 + $0x60] sm:$0xff]  ;;  %v8810_v46 = vpack.c.bf16 %v3876_v26, %v3875_v22 }
 0x4a5   :  { %8761 = vmatprep.subr.bf16.mxu1 %v11758_v3  ;;  %v3418_v3 = vld [vmem:[#allocation4 + $0x88] sm:$0xff] }
 0x4a7   :  { %3561 = vmatmul.mubr.f32.gmra.mrb[232].mxu1 %v3409_v59  ;;  %v3877_v59 = vld [vmem:[#allocation6 + $0x40] sm:$0xff] }
 0x4a8   :  { %8763 = vmatpush1.bf16.msra.mxu1 %v11756_v61  ;;  %7532 = vmatprep.mubr.msk.f32.mxu1 %vm3429_vm1, %v3412_v36  ;;  %v3415_v61 = vld [vmem:[#allocation4 + $0x70] sm:$0xff]  ;;  %v3878_v36 = vld [vmem:[#allocation6 + $0x48] sm:$0xff] }
 0x4a9   :  { %8765 = vmatprep.subr.bf16.mxu1 %v11768_v53  ;;  %v3420_v53 = vld [vmem:[#allocation4 + $0x98] sm:$0xff] }
 0x4ab   :  { %3567 = vmatmul.mubr.f32.gmra.mrb[234].mxu1 %v3411_v44  ;;  %v8813_v44 = vpack.c.bf16 %v3878_v36, %v3877_v59 }
 0x4ac   :  { %8767 = vmatpush1.bf16.msra.mxu1 %v11766_v48  ;;  %7533 = vmatprep.mubr.msk.f32.mxu1 %vm3429_vm1, %v3414_v62  ;;  %v3417_v48 = vld [vmem:[#allocation4 + $0x80] sm:$0xff]  ;;  %v3879_v62 = vld [vmem:[#allocation6 + $0x50] sm:$0xff] }
 0x4ad   :  { %8769 = vmatprep.subr.bf16.mxu1 %v11778_v37  ;;  %v3422_v37 = vld [vmem:[#allocation4 + $0xa8] sm:$0xff] }
 0x4af   :  { %3573 = vmatmul.mubr.f32.gmra.mrb[236].mxu1 %v3413_v16  ;;  %v3880_v16 = vld [vmem:[#allocation6 + $0x58] sm:$0xff] }
 0x4b0   :  { %8771 = vmatpush1.bf16.msra.mxu1 %v11776_v33  ;;  %7534 = vmatprep.mubr.msk.f32.mxu1 %vm3429_vm1, %v3416_v50  ;;  %v3419_v33 = vld [vmem:[#allocation4 + $0x90] sm:$0xff]  ;;  %v8816_v50 = vpack.c.bf16 %v3880_v16, %v3879_v62 }
 0x4b1   :  { %8773 = vmatprep.subr.bf16.mxu1 %v11788_v39  ;;  %v3424_v39 = vld [vmem:[#allocation4 + $0xb8] sm:$0xff]  ;;  %v4074_v62 = vld [vmem:[#allocation6 + $0xd0] sm:$0xff] }
 0x4b3   :  { %3579 = vmatmul.mubr.f32.gmra.mrb[238].mxu1 %v3415_v61  ;;  %v3881_v61 = vld [vmem:[#allocation6 + $0x60] sm:$0xff] }
 0x4b4   :  { %8775 = vmatpush1.bf16.msra.mxu1 %v11786_v47  ;;  %7535 = vmatprep.mubr.msk.f32.mxu1 %vm3429_vm1, %v3418_v3  ;;  %v3421_v47 = vld [vmem:[#allocation4 + $0xa0] sm:$0xff]  ;;  %v3882_v3 = vld [vmem:[#allocation6 + $0x68] sm:$0xff] }
 0x4b5   :  { %8777 = vmatprep.subr.bf16.mxu1 %v11798_v42  ;;  %v3426_v42 = vld [vmem:[#allocation4 + $0xc8] sm:$0xff] }
 0x4b7   :  { %3585 = vmatmul.mubr.f32.gmra.mrb[240].mxu1 %v3417_v48  ;;  %v8819_v48 = vpack.c.bf16 %v3882_v3, %v3881_v61 }
 0x4b8   :  { %8779 = vmatpush1.bf16.msra.mxu1 %v11796_v27  ;;  %7536 = vmatprep.mubr.msk.f32.mxu1 %vm3429_vm1, %v3420_v53  ;;  %v3423_v27 = vld [vmem:[#allocation4 + $0xb0] sm:$0xff] }
 0x4b9   :  { %8781 = vmatprep.subr.bf16.mxu1 %v11808_v35  ;;  %v3428_v35 = vld [vmem:[#allocation4 + $0xd8] sm:$0xff]  ;;  %v3883_v53 = vld [vmem:[#allocation6 + $0x70] sm:$0xff] }
 0x4bb   :  { %3591 = vmatmul.mubr.f32.gmra.mrb[242].mxu1 %v3419_v33  ;;  %v3884_v33 = vld [vmem:[#allocation6 + $0x78] sm:$0xff] }
 0x4bc   :  { %8783 = vmatpush1.bf16.msra.mxu1 %v11806_v52  ;;  %7537 = vmatprep.mubr.msk.f32.mxu1 %vm3429_vm1, %v3422_v37  ;;  %v3425_v52 = vld [vmem:[#allocation4 + $0xc0] sm:$0xff]  ;;  %v8822_v37 = vpack.c.bf16 %v3884_v33, %v3883_v53  ;;  %v4075_v53 = vld [vmem:[#allocation6 + $0xd8] sm:$0xff] }
 0x4bd   :  { %8785 = vmatprep.subr.bf16.mxu1 %v11818_v57  ;;  %v3623_v57 = vld [vmem:[#allocation4 + $0xe8] sm:$0xff]  ;;  %v4076_v33 = vld [vmem:[#allocation6 + $0xe0] sm:$0xff] }
 0x4bf   :  { %3597 = vmatmul.mubr.f32.gmra.mrb[244].mxu1 %v3421_v47  ;;  %v3885_v47 = vld [vmem:[#allocation6 + $0x80] sm:$0xff] }
 0x4c0   :  { %8787 = vmatpush1.bf16.msra.mxu1 %v11816_v41  ;;  %7538 = vmatprep.mubr.msk.f32.mxu1 %vm3429_vm1, %v3424_v39  ;;  %v3427_v41 = vld [vmem:[#allocation4 + $0xd0] sm:$0xff]  ;;  %v3886_v39 = vld [vmem:[#allocation6 + $0x88] sm:$0xff] }
 0x4c1   :  { %8789 = vmatprep.subr.bf16.mxu1 %v11828_v49  ;;  %v3626_v49 = vld [vmem:[#allocation4 + $0x100] sm:$0xff] }
 0x4c3   :  { %3603 = vmatmul.mubr.f32.gmra.mrb[246].mxu1 %v3423_v27  ;;  %v8825_v27 = vpack.c.bf16 %v3886_v39, %v3885_v47 }
 0x4c4   :  { %8791 = vmatpush1.bf16.msra.mxu1 %v11826_v32  ;;  %7539 = vmatprep.mubr.msk.f32.mxu1 %vm3429_vm1, %v3426_v42  ;;  %v3624_v32 = vld [vmem:[#allocation4 + $0xf0] sm:$0xff] }
 0x4c5   :  { %8793 = vmatprep.subr.bf16.mxu1 %v11838_v4  ;;  %v3640_v4 = vld [vmem:[#allocation4 + $0x170] sm:$0xff] }
 0x4c6   :  { %v3887_v42 = vld [vmem:[#allocation6 + $0x90] sm:$0xff] }
 0x4c7   :  { %3609 = vmatmul.mubr.f32.gmra.mrb[248].mxu1 %v3425_v52  ;;  %v3888_v52 = vld [vmem:[#allocation6 + $0x98] sm:$0xff] }
 0x4c8   :  { %8795 = vmatpush1.bf16.msra.mxu1 %v11836_v5  ;;  %7540 = vmatprep.mubr.msk.f32.mxu1 %vm3429_vm1, %v3428_v35  ;;  %v3638_v5 = vld [vmem:[#allocation4 + $0x160] sm:$0xff]  ;;  %v8828_v35 = vpack.c.bf16 %v3888_v52, %v3887_v42  ;;  %v8840_v42 = vpack.c.bf16 %v4076_v33, %v4075_v53  ;;  %v4077_v52 = vld [vmem:[#allocation6 + $0xe8] sm:$0xff]  ;;  %v4087_v33 = vld [vmem:[#allocation6 + $0x138] sm:$0xff] }
 0x4c9   :  { %8797 = vmatprep.subr.bf16.mxu1 %v11848_v25  ;;  %v3872_v25 = vld [vmem:[#allocation6 + $0x18] sm:$0xff] }
 0x4cb   :  { %3615 = vmatmul.mubr.f32.gmra.mrb[250].mxu1 %v3427_v41  ;;  %v3889_v41 = vld [vmem:[#allocation6 + $0xa0] sm:$0xff] }
 0x4cc   :  { %8799 = vmatpush1.bf16.msra.mxu1 %v11846_v63  ;;  %7541 = vmatprep.mubr.msk.f32.mxu1 %vm3429_vm1, %v3623_v57  ;;  %v3871_v63 = vld [vmem:[#allocation6 + $0x10] sm:$0xff] }
 0x4cd   :  { %8800 = vmatprep.subr.bf16.mxu1 %v9778_v0  ;;  %v8804_v23 = vpack.c.bf16 %v3872_v25, %v3871_v63 }
 0x4cf   :  { %3757 = vmatmul.mubr.f32.vlgmr.msra.gmra.mrb[252].mxu1 %v3622_v21 }
 0x4d0   :  { %7542 = vmatprep.mubr.msk.f32.mxu1 %vm3429_vm1, %v3625_v28  ;;  %8802 = vmatpush1.bf16.msra.mxu1 %v8801_v14  ;;  %v4069_v14 = vld [vmem:[#allocation6 + $0xa8] sm:$0xff] }
 0x4d1   :  { %8803 = vmatprep.subr.bf16.mxu1 %v9778_v0 }
 0x4d3   :  { %3763 = vmatmul.mubr.f32.gmra.mrb[254].mxu1 %v3624_v32 }
 0x4d4   :  { %7543 = vmatprep.mubr.msk.f32.mxu1 %vm3429_vm1, %v3627_v43  ;;  %8805 = vmatpush1.bf16.msra.mxu1 %v8804_v23 }
 0x4d5   :  { %8806 = vmatprep.subr.bf16.mxu1 %v9778_v0 }
 0x4d7   :  { %3769 = vmatmul.mubr.f32.gmra.mrb[0].mxu1 %v3626_v49 }
 0x4d8   :  { %7544 = vmatprep.mubr.msk.f32.mxu1 %vm3429_vm1, %v3629_v6  ;;  %8808 = vmatpush1.bf16.msra.mxu1 %v8807_v18  ;;  %v4072_v18 = vld [vmem:[#allocation6 + $0xc0] sm:$0xff] }
 0x4d9   :  { %8809 = vmatprep.subr.bf16.mxu1 %v9778_v0  ;;  %v8834_v36 = vpack.c.bf16 %v4072_v18, %v4071_v34  ;;  %v4083_v18 = vld [vmem:[#allocation6 + $0x118] sm:$0xff] }
 0x4db   :  { %3775 = vmatmul.mubr.f32.gmra.mrb[2].mxu1 %v3628_v58 }
 0x4dc   :  { %7545 = vmatprep.mubr.msk.f32.mxu1 %vm3429_vm1, %v3631_v29  ;;  %8811 = vmatpush1.bf16.msra.mxu1 %v8810_v46 }
 0x4dd   :  { %8812 = vmatprep.subr.bf16.mxu1 %v9778_v0 }
 0x4df   :  { %3781 = vmatmul.mubr.f32.gmra.mrb[4].mxu1 %v3630_v60 }
 0x4e0   :  { %7546 = vmatprep.mubr.msk.f32.mxu1 %vm3429_vm1, %v3633_v56  ;;  %8814 = vmatpush1.bf16.msra.mxu1 %v8813_v44  ;;  %v4073_v44 = vld [vmem:[#allocation6 + $0xc8] sm:$0xff] }
 0x4e1   :  { %8815 = vmatprep.subr.bf16.mxu1 %v9778_v0 }
 0x4e3   :  { %3787 = vmatmul.mubr.f32.gmra.mrb[6].mxu1 %v3632_v7 }
 0x4e4   :  { %7547 = vmatprep.mubr.msk.f32.mxu1 %vm3429_vm1, %v3635_v11  ;;  %8817 = vmatpush1.bf16.msra.mxu1 %v8816_v50 }
 0x4e5   :  { %8818 = vmatprep.subr.bf16.mxu1 %v9778_v0 }
 0x4e7   :  { %3793 = vmatmul.mubr.f32.gmra.mrb[8].mxu1 %v3634_v12 }
 0x4e8   :  { %7548 = vmatprep.mubr.msk.f32.mxu1 %vm3429_vm1, %v3637_v24  ;;  %8820 = vmatpush1.bf16.msra.mxu1 %v8819_v48  ;;  %v8837_v48 = vpack.c.bf16 %v4074_v62, %v4073_v44  ;;  %v4085_v62 = vld [vmem:[#allocation6 + $0x128] sm:$0xff] }
 0x4e9   :  { %8821 = vmatprep.subr.bf16.mxu1 %v9778_v0 }
 0x4eb   :  { %3799 = vmatmul.mubr.f32.gmra.mrb[10].mxu1 %v3636_v20 }
 0x4ec   :  { %7549 = vmatprep.mubr.msk.f32.mxu1 %vm3429_vm1, %v3639_v8  ;;  %8823 = vmatpush1.bf16.msra.mxu1 %v8822_v37 }
 0x4ed   :  { %8824 = vmatprep.subr.bf16.mxu1 %v9778_v0 }
 0x4ef   :  { %3805 = vmatmul.mubr.f32.gmra.mrb[12].mxu1 %v3638_v5 }
 0x4f0   :  { %7550 = vmatprep.mubr.msk.f32.mxu1 %vm3429_vm1, %v3641_v45  ;;  %8826 = vmatpush1.bf16.msra.mxu1 %v8825_v27 }
 0x4f1   :  { %8827 = vmatprep.subr.bf16.mxu1 %v9778_v0 }
 0x4f3   :  { %3811 = vmatmul.mubr.f32.gmra.mrb[14].mxu1 %v3640_v4 }
 0x4f4   :  { %7551 = vmatprep.mubr.msk.f32.mxu1 %vm3429_vm1, %v3643_v38  ;;  %8829 = vmatpush1.bf16.msra.mxu1 %v8828_v35  ;;  %v4078_v35 = vld [vmem:[#allocation6 + $0xf0] sm:$0xff] }
 0x4f5   :  { %3973 = vmatprep.subr.mxu1 %v9779_v30 }
 0x4f7   :  { %3817 = vmatmul.mubr.f32.gmra.mrb[16].mxu1 %v3642_v55 }
 0x4f8   :  { %7552 = vmatprep.mubr.msk.f32.mxu1 %vm3429_vm1, %v3645_v40  ;;  %3974 = vmatpush1.msra.mxu1 %v3889_v41 }
 0x4f9   :  { %8830 = vmatprep.subr.bf16.mxu1 %v9778_v0 }
 0x4fb   :  { %3823 = vmatmul.mubr.f32.gmra.mrb[18].mxu1 %v3644_v54 }
 0x4fc   :  { %7553 = vmatprep.mubr.msk.f32.mxu1 %vm3429_vm1, %v3647_v31 }
 0x4ff   :  { %3829 = vmatmul.mubr.f32.gmra.mrb[20].mxu1 %v3646_v1 }
 0x500   :  { %7554 = vmatprep.mubr.msk.f32.mxu1 %vm3429_vm1, %v3649_v15  ;;  %v4070_v15 = vld [vmem:[#allocation6 + $0xb0] sm:$0xff] }
 0x501   :  { %v8831_v19 = vpack.c.bf16 %v4070_v15, %v4069_v14  ;;  %v4081_v15 = vld [vmem:[#allocation6 + $0x108] sm:$0xff] }
 0x503   :  { %3835 = vmatmul.mubr.f32.gmra.mrb[22].mxu1 %v3648_v10 }
 0x56a   :  { %v3538_v57 = vpop.f32.mrb[224].mxu1 }
 0x56b   :  { %v3540_v21 = vpop.f32.mrb[225].mxu1 }
 0x56e   :  { %v3544_v28 = vpop.f32.mrb[226].mxu1 }
 0x56f   :  { %v3546_v32 = vpop.f32.mrb[227].mxu1 }
 0x572   :  { %v3550_v43 = vpop.f32.mrb[228].mxu1 }
 0x573   :  { %v3552_v49 = vpop.f32.mrb[229].mxu1 }
 0x576   :  { %v3556_v6 = vpop.f32.mrb[230].mxu1 }
 0x577   :  { %v3558_v58 = vpop.f32.mrb[231].mxu1 }
 0x57a   :  { %v11919_v29 = vpop.f32.mrb[232].mxu1 }
 0x57b   :  { %v11921_v60 = vpop.f32.mrb[233].mxu1 }
 0x57e   :  { %v11923_v56 = vpop.f32.mrb[234].mxu1 }
 0x57f   :  { %v11925_v7 = vpop.f32.mrb[235].mxu1 }
 0x582   :  { %v11927_v11 = vpop.f32.mrb[236].mxu1 }
 0x583   :  { %v11929_v12 = vpop.f32.mrb[237].mxu1 }
 0x586   :  { %v11931_v24 = vpop.f32.mrb[238].mxu1 }
 0x587   :  { %v11933_v20 = vpop.f32.mrb[239].mxu1 }
 0x58a   :  { %v11935_v8 = vpop.f32.mrb[240].mxu1 }
 0x58b   :  { %v11937_v5 = vpop.f32.mrb[241].mxu1 }
 0x58e   :  { %v11939_v45 = vpop.f32.mrb[242].mxu1 }
 0x58f   :  { %v11941_v4 = vpop.f32.mrb[243].mxu1 }
 0x592   :  { %v11943_v38 = vpop.f32.mrb[244].mxu1 }
 0x593   :  { %v11945_v55 = vpop.f32.mrb[245].mxu1 }
 0x596   :  { %v11947_v40 = vpop.f32.mrb[246].mxu1 }
 0x597   :  { %v11949_v54 = vpop.f32.mrb[247].mxu1 }
 0x59a   :  { %v11951_v31 = vpop.f32.mrb[248].mxu1 }
 0x59b   :  { %v11953_v2 = vpop.f32.mrb[249].mxu1 }
 0x59e   :  { %v11955_v9 = vpop.f32.mrb[250].mxu1 }
 0x59f   :  { %v11957_v1 = vpop.f32.mrb[251].mxu1 }
 0x5a2   :  { %v3758_v63 = vpop.f32.mrb[252].mxu1 }
 0x5a3   :  { %v11959_v25 = vmax.f32 %v3538_v57, %v3758_v63  ;;  %v3760_v10 = vpop.f32.mrb[253].mxu1  ;;  %v4082_v63 = vld [vmem:[#allocation6 + $0x110] sm:$0xff] }
 0x5a4   :  { %v11961_v23 = vmax.f32 %v3540_v21, %v3760_v10 }
 0x5a6   :  { %v3764_v22 = vpop.f32.mrb[254].mxu1  ;;  %7555 = vmatprep.mubr.msk.f32.mxu1 %vm3890_vm2, %v11961_v23 }
 0x5a7   :  { %v11965_v26 = vmax.f32 %v3544_v28, %v3764_v22  ;;  %v3766_v46 = vpop.f32.mrb[255].mxu1  ;;  %3998 = vmatmul.mubr.f32.vlgmr.msra.gmra.mrb[24].mxu1 %v11959_v25  ;;  %v4084_v22 = vld [vmem:[#allocation6 + $0x120] sm:$0xff] }
 0x5a8   :  { %v11968_v59 = vmax.f32 %v3546_v32, %v3766_v46  ;;  %8832 = vmatpush1.bf16.msra.mxu1 %v8831_v19  ;;  %v8843_v32 = vpack.c.bf16 %v4078_v35, %v4077_v52 }
 0x5a9   :  { %8833 = vmatprep.subr.bf16.mxu1 %v9778_v0 }
 0x5aa   :  { %v3770_v16 = vpop.f32.mrb[0].mxu1  ;;  %7556 = vmatprep.mubr.msk.f32.mxu1 %vm3890_vm2, %v11968_v59 }
 0x5ab   :  { %v11973_v50 = vmax.f32 %v3550_v43, %v3770_v16  ;;  %v3772_v61 = vpop.f32.mrb[1].mxu1  ;;  %4003 = vmatmul.mubr.f32.gmra.mrb[26].mxu1 %v11965_v26  ;;  %v4079_v43 = vld [vmem:[#allocation6 + $0xf8] sm:$0xff]  ;;  %v4086_v16 = vld [vmem:[#allocation6 + $0x130] sm:$0xff] }
 0x5ac   :  { %v11976_v3 = vmax.f32 %v3552_v49, %v3772_v61  ;;  %8835 = vmatpush1.bf16.msra.mxu1 %v8834_v36  ;;  %v4080_v49 = vld [vmem:[#allocation6 + $0x100] sm:$0xff] }
 0x5ad   :  { %8836 = vmatprep.subr.bf16.mxu1 %v9778_v0 }
 0x5ae   :  { %v3776_v37 = vpop.f32.mrb[2].mxu1  ;;  %7557 = vmatprep.mubr.msk.f32.mxu1 %vm3890_vm2, %v11976_v3 }
 0x5af   :  { %v11981_v47 = vmax.f32 %v3556_v6, %v3776_v37  ;;  %v3778_v39 = vpop.f32.mrb[3].mxu1  ;;  %4008 = vmatmul.mubr.f32.gmra.mrb[28].mxu1 %v11973_v50  ;;  %v4088_v37 = vld [vmem:[#allocation6 + $0x140] sm:$0xff] }
 0x5b0   :  { %v11984_v27 = vmax.f32 %v3558_v58, %v3778_v39  ;;  %8838 = vmatpush1.bf16.msra.mxu1 %v8837_v48  ;;  %v8858_v35 = vpack.c.bf16 %v4088_v37, %v4087_v33 }
 0x5b1   :  { %8839 = vmatprep.subr.bf16.mxu1 %v9778_v0 }
 0x5b2   :  { %v3782_v41 = vpop.f32.mrb[4].mxu1  ;;  %7558 = vmatprep.mubr.msk.f32.mxu1 %vm3890_vm2, %v11984_v27 }
 0x5b3   :  { %v11990_v57 = vmax.f32 %v11919_v29, %v3782_v41  ;;  %v3784_v21 = vpop.f32.mrb[5].mxu1  ;;  %4013 = vmatmul.mubr.f32.gmra.mrb[30].mxu1 %v11981_v47 }
 0x5b4   :  { %v11994_v28 = vmax.f32 %v11921_v60, %v3784_v21  ;;  %8841 = vmatpush1.bf16.msra.mxu1 %v8840_v42  ;;  %v8846_v60 = vpack.c.bf16 %v4080_v49, %v4079_v43 }
 0x5b5   :  { %8842 = vmatprep.subr.bf16.mxu1 %v9778_v0 }
 0x5b6   :  { %v3788_v6 = vpop.f32.mrb[6].mxu1  ;;  %7559 = vmatprep.mubr.msk.f32.mxu1 %vm3890_vm2, %v11994_v28 }
 0x5b7   :  { %v12000_v58 = vmax.f32 %v11923_v56, %v3788_v6  ;;  %v3790_v29 = vpop.f32.mrb[7].mxu1  ;;  %4018 = vmatmul.mubr.f32.gmra.mrb[32].mxu1 %v11990_v57 }
 0x5b8   :  { %v12004_v14 = vmax.f32 %v11925_v7, %v3790_v29  ;;  %8844 = vmatpush1.bf16.msra.mxu1 %v8843_v32  ;;  %v8849_v7 = vpack.c.bf16 %v4082_v63, %v4081_v15 }
 0x5b9   :  { %8845 = vmatprep.subr.bf16.mxu1 %v9778_v0 }
 0x5ba   :  { %v3794_v10 = vpop.f32.mrb[8].mxu1  ;;  %7560 = vmatprep.mubr.msk.f32.mxu1 %vm3890_vm2, %v12004_v14 }
 0x5bb   :  { %v12010_v19 = vmax.f32 %v11927_v11, %v3794_v10  ;;  %v3796_v56 = vpop.f32.mrb[9].mxu1  ;;  %4023 = vmatmul.mubr.f32.gmra.mrb[34].mxu1 %v12000_v58 }
 0x5bc   :  { %v12014_v34 = vmax.f32 %v11929_v12, %v3796_v56  ;;  %8847 = vmatpush1.bf16.msra.mxu1 %v8846_v60  ;;  %v8852_v12 = vpack.c.bf16 %v4084_v22, %v4083_v18 }
 0x5bd   :  { %8848 = vmatprep.subr.bf16.mxu1 %v9778_v0 }
 0x5be   :  { %v3800_v46 = vpop.f32.mrb[10].mxu1  ;;  %7561 = vmatprep.mubr.msk.f32.mxu1 %vm3890_vm2, %v12014_v34 }
 0x5bf   :  { %v12020_v36 = vmax.f32 %v11931_v24, %v3800_v46  ;;  %v3802_v11 = vpop.f32.mrb[11].mxu1  ;;  %4028 = vmatmul.mubr.f32.gmra.mrb[36].mxu1 %v12010_v19 }
 0x5c0   :  { %v12024_v44 = vmax.f32 %v11933_v20, %v3802_v11  ;;  %8850 = vmatpush1.bf16.msra.mxu1 %v8849_v7  ;;  %v8855_v20 = vpack.c.bf16 %v4086_v16, %v4085_v62 }
 0x5c1   :  { %8851 = vmatprep.subr.bf16.mxu1 %v9778_v0 }
 0x5c2   :  { %v3806_v61 = vpop.f32.mrb[12].mxu1  ;;  %7562 = vmatprep.mubr.msk.f32.mxu1 %vm3890_vm2, %v12024_v44 }
 0x5c3   :  { %v12030_v48 = vmax.f32 %v11935_v8, %v3806_v61  ;;  %v3808_v24 = vpop.f32.mrb[13].mxu1  ;;  %4033 = vmatmul.mubr.f32.gmra.mrb[38].mxu1 %v12020_v36 }
 0x5c4   :  { %v3858_v53 = vmax.f32 %v11937_v5, %v3808_v24  ;;  %8853 = vmatpush1.bf16.msra.mxu1 %v8852_v12 }
 0x5c5   :  { %8854 = vmatprep.subr.bf16.mxu1 %v9778_v0 }
 0x5c6   :  { %v3812_v39 = vpop.f32.mrb[14].mxu1  ;;  %7563 = vmatprep.mubr.msk.f32.mxu1 %vm3890_vm2, %v3858_v53 }
 0x5c7   :  { %v3859_v42 = vmax.f32 %v11939_v45, %v3812_v39  ;;  %v3814_v52 = vpop.f32.mrb[15].mxu1  ;;  %4038 = vmatmul.mubr.f32.gmra.mrb[40].mxu1 %v12030_v48  ;;  %v4089_v45 = vld [vmem:[#allocation6 + $0x148] sm:$0xff] }
 0x5c8   :  { %v3860_v8 = vmax.f32 %v11941_v4, %v3814_v52  ;;  %8856 = vmatpush1.bf16.msra.mxu1 %v8855_v20 }
 0x5c9   :  { %8857 = vmatprep.subr.bf16.mxu1 %v9778_v0 }
 0x5ca   :  { %v3818_v5 = vpop.f32.mrb[16].mxu1  ;;  %7564 = vmatprep.mubr.msk.f32.mxu1 %vm3890_vm2, %v3860_v8 }
 0x5cb   :  { %v3861_v41 = vmax.f32 %v11943_v38, %v3818_v5  ;;  %v3820_v21 = vpop.f32.mrb[17].mxu1  ;;  %4043 = vmatmul.mubr.f32.gmra.mrb[42].mxu1 %v3859_v42 }
 0x5cc   :  { %v3862_v32 = vmax.f32 %v11945_v55, %v3820_v21  ;;  %8859 = vmatpush1.bf16.msra.mxu1 %v8858_v35 }
 0x5cd   :  { %4130 = vmatprep.subr.mxu1 %v9779_v30 }
 0x5ce   :  { %v3824_v43 = vpop.f32.mrb[18].mxu1  ;;  %7565 = vmatprep.mubr.msk.f32.mxu1 %vm3890_vm2, %v3862_v32 }
 0x5cf   :  { %v3863_v4 = vmax.f32 %v11947_v40, %v3824_v43  ;;  %v3826_v49 = vpop.f32.mrb[19].mxu1  ;;  %4048 = vmatmul.mubr.f32.gmra.mrb[44].mxu1 %v3861_v41 }
 0x5d0   :  { %v3864_v6 = vmax.f32 %v11949_v54, %v3826_v49  ;;  %4131 = vmatpush1.msra.mxu1 %v4089_v45  ;;  %v4418_v54 = vld [vmem:[#allocation7 + $0x50] sm:$0xff] }
 0x5d2   :  { %v3830_v29 = vpop.f32.mrb[20].mxu1  ;;  %7566 = vmatprep.mubr.msk.f32.mxu1 %vm3890_vm2, %v3864_v6 }
 0x5d3   :  { %v3865_v38 = vmax.f32 %v11951_v31, %v3830_v29  ;;  %v3832_v55 = vpop.f32.mrb[21].mxu1  ;;  %4053 = vmatmul.mubr.f32.gmra.mrb[46].mxu1 %v3863_v4 }
 0x5d4   :  { %v3866_v60 = vmax.f32 %v11953_v2, %v3832_v55 }
 0x5d6   :  { %v3836_v15 = vpop.f32.mrb[22].mxu1  ;;  %7567 = vmatprep.mubr.msk.f32.mxu1 %vm3890_vm2, %v3866_v60 }
 0x5d7   :  { %v3867_v63 = vmax.f32 %v11955_v9, %v3836_v15  ;;  %v3838_v40 = vpop.f32.mrb[23].mxu1  ;;  %4058 = vmatmul.mubr.f32.gmra.mrb[48].mxu1 %v3865_v38 }
 0x5d8   :  { %v3868_v10 = vmax.f32 %v11957_v1, %v3838_v40 }
 0x5da   :  { %7568 = vmatprep.mubr.msk.f32.mxu1 %vm3890_vm2, %v3868_v10 }
 0x5db   :  { %4063 = vmatmul.mubr.f32.gmra.mrb[50].mxu1 %v3867_v63 }
 0x5dc   :  { %7569 = vmatprep.mubr.msk.f32.mxu1 %vm3890_vm2, %v11961_v23 }
 0x5df   :  { %4155 = vmatmul.mubr.f32.vlgmr.msra.gmra.mrb[52].mxu1 %v11959_v25 }
 0x5e0   :  { %7570 = vmatprep.mubr.msk.f32.mxu1 %vm3890_vm2, %v11968_v59 }
 0x5e3   :  { %4160 = vmatmul.mubr.f32.gmra.mrb[54].mxu1 %v11965_v26 }
 0x5e4   :  { %7571 = vmatprep.mubr.msk.f32.mxu1 %vm3890_vm2, %v11976_v3 }
 0x5e7   :  { %4165 = vmatmul.mubr.f32.gmra.mrb[56].mxu1 %v11973_v50 }
 0x5e8   :  { %7572 = vmatprep.mubr.msk.f32.mxu1 %vm3890_vm2, %v11984_v27 }
 0x5eb   :  { %4170 = vmatmul.mubr.f32.gmra.mrb[58].mxu1 %v11981_v47 }
 0x5ec   :  { %7573 = vmatprep.mubr.msk.f32.mxu1 %vm3890_vm2, %v11994_v28 }
 0x5ef   :  { %4175 = vmatmul.mubr.f32.gmra.mrb[60].mxu1 %v11990_v57 }
 0x5f0   :  { %7574 = vmatprep.mubr.msk.f32.mxu1 %vm3890_vm2, %v12004_v14 }
 0x5f3   :  { %4180 = vmatmul.mubr.f32.gmra.mrb[62].mxu1 %v12000_v58  ;;  %v4239_v58 = vld [vmem:[#allocation7] sm:$0xff] }
 0x5f4   :  { %7575 = vmatprep.mubr.msk.f32.mxu1 %vm3890_vm2, %v12014_v34  ;;  %8048 = vmatprep.mubr.msk.f32.mxu0 %vm4249_vm3, %v4239_v58 }
 0x5f7   :  { %4185 = vmatmul.mubr.f32.gmra.mrb[64].mxu1 %v12010_v19 }
 0x5f8   :  { %7576 = vmatprep.mubr.msk.f32.mxu1 %vm3890_vm2, %v12024_v44 }
 0x5fb   :  { %4190 = vmatmul.mubr.f32.gmra.mrb[66].mxu1 %v12020_v36 }
 0x5fc   :  { %7577 = vmatprep.mubr.msk.f32.mxu1 %vm3890_vm2, %v3858_v53 }
 0x5ff   :  { %4195 = vmatmul.mubr.f32.gmra.mrb[68].mxu1 %v12030_v48 }
 0x600   :  { %7578 = vmatprep.mubr.msk.f32.mxu1 %vm3890_vm2, %v3860_v8 }
 0x603   :  { %4200 = vmatmul.mubr.f32.gmra.mrb[70].mxu1 %v3859_v42 }
 0x604   :  { %7579 = vmatprep.mubr.msk.f32.mxu1 %vm3890_vm2, %v3862_v32 }
 0x607   :  { %4205 = vmatmul.mubr.f32.gmra.mrb[72].mxu1 %v3861_v41 }
 0x608   :  { %7580 = vmatprep.mubr.msk.f32.mxu1 %vm3890_vm2, %v3864_v6 }
 0x60b   :  { %4210 = vmatmul.mubr.f32.gmra.mrb[74].mxu1 %v3863_v4 }
 0x60c   :  { %7581 = vmatprep.mubr.msk.f32.mxu1 %vm3890_vm2, %v3866_v60 }
 0x60f   :  { %4215 = vmatmul.mubr.f32.gmra.mrb[76].mxu1 %v3865_v38 }
 0x610   :  { %7582 = vmatprep.mubr.msk.f32.mxu1 %vm3890_vm2, %v3868_v10 }
 0x613   :  { %4220 = vmatmul.mubr.f32.gmra.mrb[78].mxu1 %v3867_v63 }
 0x614   :  { %8091 = vmatprep.mubr.msk.f32.mxu1 %vm4249_vm3, %v4418_v54 }
 0x67a   :  { %v3999_v31 = vpop.f32.mrb[24].mxu1 }
 0x67b   :  { %v4001_v2 = vpop.f32.mrb[25].mxu1 }
 0x67e   :  { %v4004_v9 = vpop.f32.mrb[26].mxu1 }
 0x67f   :  { %v4006_v1 = vpop.f32.mrb[27].mxu1 }
 0x682   :  { %v4009_v25 = vpop.f32.mrb[28].mxu1 }
 0x683   :  { %v4011_v23 = vpop.f32.mrb[29].mxu1 }
 0x686   :  { %v4014_v26 = vpop.f32.mrb[30].mxu1 }
 0x687   :  { %v4016_v59 = vpop.f32.mrb[31].mxu1 }
 0x68a   :  { %v4019_v50 = vpop.f32.mrb[32].mxu1 }
 0x68b   :  { %v4021_v3 = vpop.f32.mrb[33].mxu1 }
 0x68e   :  { %v4024_v47 = vpop.f32.mrb[34].mxu1 }
 0x68f   :  { %v4026_v27 = vpop.f32.mrb[35].mxu1 }
 0x692   :  { %v4029_v57 = vpop.f32.mrb[36].mxu1 }
 0x693   :  { %v4031_v28 = vpop.f32.mrb[37].mxu1 }
 0x696   :  { %v4034_v14 = vpop.f32.mrb[38].mxu1 }
 0x697   :  { %v4036_v19 = vpop.f32.mrb[39].mxu1 }
 0x698   :  { %v7604_v19 = vld [vmem:[%s13095_s7 + $0xb8] sm:$0xff] }
 0x69a   :  { %v12087_v56 = vpop.f32.mrb[40].mxu1 }
 0x69b   :  { %v4041_v34 = vpop.f32.mrb[41].mxu1 }
 0x69e   :  { %v4044_v7 = vpop.f32.mrb[42].mxu1 }
 0x69f   :  { %v4046_v18 = vpop.f32.mrb[43].mxu1 }
 0x6a2   :  { %v12089_v22 = vpop.f32.mrb[44].mxu1 }
 0x6a3   :  { %v4051_v46 = vpop.f32.mrb[45].mxu1 }
 0x6a4   :  { %v7603_v46 = vld [vmem:[%s13095_s7 + $0xb0] sm:$0xff] }
 0x6a6   :  { %v12091_v36 = vpop.f32.mrb[46].mxu1 }
 0x6a7   :  { %v4056_v11 = vpop.f32.mrb[47].mxu1 }
 0x6a8   :  { %v4419_v11 = vld [vmem:[#allocation7 + $0x58] sm:$0xff] }
 0x6aa   :  { %v12093_v44 = vpop.f32.mrb[48].mxu1 }
 0x6ab   :  { %v4061_v12 = vpop.f32.mrb[49].mxu1 }
 0x6ac   :  { %v4420_v12 = vld [vmem:[#allocation7 + $0x60] sm:$0xff] }
 0x6ae   :  { %v12095_v62 = vpop.f32.mrb[50].mxu1 }
 0x6af   :  { %v4066_v16 = vpop.f32.mrb[51].mxu1 }
 0x6b2   :  { %v4156_v61 = vpop.f32.mrb[52].mxu1 }
 0x6b3   :  { %v4225_v48 = vmax.f32 %v3999_v31, %v4156_v61  ;;  %v4158_v24 = vpop.f32.mrb[53].mxu1  ;;  %v7608_v61 = vld [vmem:[%s13095_s7 + $0xd8] sm:$0xff] }
 0x6b4   :  { %v4421_v24 = vld [vmem:[#allocation7 + $0x68] sm:$0xff] }
 0x6b6   :  { %v4161_v53 = vpop.f32.mrb[54].mxu1 }
 0x6b7   :  { %v4226_v20 = vmax.f32 %v4004_v9, %v4161_v53  ;;  %v4163_v33 = vpop.f32.mrb[55].mxu1  ;;  %v4242_v53 = vld [vmem:[#allocation7 + $0x18] sm:$0xff] }
 0x6b8   :  { %v4243_v33 = vld [vmem:[#allocation7 + $0x20] sm:$0xff] }
 0x6b9   :  { %v12097_v37 = vpack.c.bf16 %v4226_v20, %v4225_v48  ;;  %v7610_v48 = vld [vmem:[%s13095_s7 + $0xe8] sm:$0xff]  ;;  %v4422_v20 = vld [vmem:[#allocation7 + $0x70] sm:$0xff] }
 0x6ba   :  { %v4166_v39 = vpop.f32.mrb[56].mxu1 }
 0x6bb   :  { %v4227_v42 = vmax.f32 %v4009_v25, %v4166_v39  ;;  %v4168_v52 = vpop.f32.mrb[57].mxu1  ;;  %8861 = vmatprep.subr.bf16.mxu0 %v12097_v37  ;;  %8889 = vmatprep.subr.bf16.mxu1 %v12097_v37  ;;  %v8920_v39 = vpack.c.bf16 %v7610_v48, %v7608_v61  ;;  %v5285_v61 = vld [vmem:[#allocation7 + $0x110] sm:$0xff]  ;;  %v5286_v48 = vld [vmem:[#allocation7 + $0x118] sm:$0xff] }
 0x6bc   :  { %8863 = vmatpush3.bf16.msra.mxu0 %v12097_v37  ;;  %8891 = vmatpush3.bf16.msra.mxu1 %v12097_v37  ;;  %v7609_v52 = vld [vmem:[%s13095_s7 + $0xe0] sm:$0xff] }
 0x6be   :  { %v4171_v8 = vpop.f32.mrb[58].mxu1 }
 0x6bf   :  { %v4228_v35 = vmax.f32 %v4014_v26, %v4171_v8  ;;  %v4173_v5 = vpop.f32.mrb[59].mxu1  ;;  %v4423_v8 = vld [vmem:[#allocation7 + $0x78] sm:$0xff] }
 0x6c0   :  { %v4424_v5 = vld [vmem:[#allocation7 + $0x80] sm:$0xff] }
 0x6c1   :  { %v12103_v41 = vpack.c.bf16 %v4228_v35, %v4227_v42  ;;  %v7607_v42 = vld [vmem:[%s13095_s7 + $0xd0] sm:$0xff]  ;;  %v4244_v35 = vld [vmem:[#allocation7 + $0x28] sm:$0xff] }
 0x6c2   :  { %v4176_v21 = vpop.f32.mrb[60].mxu1 }
 0x6c3   :  { %v4229_v32 = vmax.f32 %v4019_v50, %v4176_v21  ;;  %v4178_v45 = vpop.f32.mrb[61].mxu1  ;;  %8865 = vmatprep.subr.bf16.mxu0 %v12103_v41  ;;  %8893 = vmatprep.subr.bf16.mxu1 %v12103_v41  ;;  %v4245_v21 = vld [vmem:[#allocation7 + $0x30] sm:$0xff] }
 0x6c4   :  { %8867 = vmatpush3.bf16.msra.mxu0 %v12103_v41  ;;  %8895 = vmatpush3.bf16.msra.mxu1 %v12103_v41  ;;  %v7612_v45 = vld [vmem:[%s13095_s7 + $0xf8] sm:$0xff] }
 0x6c6   :  { %v4181_v43 = vpop.f32.mrb[62].mxu1 }
 0x6c7   :  { %v4230_v4 = vmax.f32 %v4024_v47, %v4181_v43  ;;  %v4183_v49 = vpop.f32.mrb[63].mxu1  ;;  %v7614_v43 = vld [vmem:[%s13095_s7 + $0x108] sm:$0xff] }
 0x6c8   :  { %v4246_v49 = vld [vmem:[#allocation7 + $0x38] sm:$0xff] }
 0x6c9   :  { %v12109_v6 = vpack.c.bf16 %v4230_v4, %v4229_v32  ;;  %v8922_v32 = vpack.c.bf16 %v7609_v52, %v7607_v42  ;;  %v4425_v4 = vld [vmem:[#allocation7 + $0x88] sm:$0xff]  ;;  %v5647_v42 = vld [vmem:[#allocation7 + $0x170] sm:$0xff]  ;;  %v5648_v52 = vld [vmem:[#allocation7 + $0x178] sm:$0xff] }
 0x6ca   :  { %v4186_v29 = vpop.f32.mrb[64].mxu1 }
 0x6cb   :  { %v4231_v38 = vmax.f32 %v4029_v57, %v4186_v29  ;;  %v4188_v55 = vpop.f32.mrb[65].mxu1  ;;  %8869 = vmatprep.subr.bf16.mxu0 %v12109_v6  ;;  %8897 = vmatprep.subr.bf16.mxu1 %v12109_v6  ;;  %v4426_v29 = vld [vmem:[#allocation7 + $0x90] sm:$0xff] }
 0x6cc   :  { %8871 = vmatpush3.bf16.msra.mxu0 %v12109_v6  ;;  %8899 = vmatpush3.bf16.msra.mxu1 %v12109_v6  ;;  %v8924_v55 = vpack.c.bf16 %v7614_v43, %v7612_v45  ;;  %v4395_v45 = vld [vmem:[%s13095_s7] sm:$0xff]  ;;  %v4397_v43 = vld [vmem:[%s13095_s7 + $0x10] sm:$0xff] }
 0x6ce   :  { %v4191_v60 = vpop.f32.mrb[66].mxu1 }
 0x6cf   :  { %v4232_v15 = vmax.f32 %v4034_v14, %v4191_v60  ;;  %v4193_v63 = vpop.f32.mrb[67].mxu1  ;;  %v7611_v60 = vld [vmem:[%s13095_s7 + $0xf0] sm:$0xff] }
 0x6d0   :  { %v7616_v63 = vld [vmem:[%s13095_s7 + $0x118] sm:$0xff] }
 0x6d1   :  { %v12115_v40 = vpack.c.bf16 %v4232_v15, %v4231_v38  ;;  %v4247_v38 = vld [vmem:[#allocation7 + $0x40] sm:$0xff]  ;;  %v7613_v15 = vld [vmem:[%s13095_s7 + $0x100] sm:$0xff] }
 0x6d2   :  { %v4196_v10 = vpop.f32.mrb[68].mxu1 }
 0x6d3   :  { %v4233_v54 = vmax.f32 %v12087_v56, %v4196_v10  ;;  %v4198_v31 = vpop.f32.mrb[69].mxu1  ;;  %8873 = vmatprep.subr.bf16.mxu0 %v12115_v40  ;;  %8901 = vmatprep.subr.bf16.mxu1 %v12115_v40  ;;  %v7606_v56 = vld [vmem:[%s13095_s7 + $0xc8] sm:$0xff] }
 0x6d4   :  { %8875 = vmatpush3.bf16.msra.mxu0 %v12115_v40  ;;  %8903 = vmatpush3.bf16.msra.mxu1 %v12115_v40  ;;  %v7618_v10 = vld [vmem:[%s13095_s7 + $0x128] sm:$0xff]  ;;  %v4248_v31 = vld [vmem:[#allocation7 + $0x48] sm:$0xff] }
 0x6d6   :  { %v4201_v2 = vpop.f32.mrb[70].mxu1 }
 0x6d7   :  { %v4234_v9 = vmax.f32 %v4044_v7, %v4201_v2  ;;  %v4203_v1 = vpop.f32.mrb[71].mxu1  ;;  %v4921_v2 = vld [vmem:[#allocation7 + $0xa0] sm:$0xff] }
 0x6d8   :  { %v8928_v1 = vpack.c.bf16 %v7618_v10, %v7616_v63 }
 0x6d9   :  { %v12122_v25 = vpack.c.bf16 %v4234_v9, %v4233_v54  ;;  %v4427_v54 = vld [vmem:[#allocation7 + $0x98] sm:$0xff]  ;;  %v8926_v9 = vpack.c.bf16 %v7613_v15, %v7611_v60  ;;  %v4399_v60 = vld [vmem:[%s13095_s7 + $0x20] sm:$0xff]  ;;  %v4401_v15 = vld [vmem:[%s13095_s7 + $0x30] sm:$0xff] }
 0x6da   :  { %v4206_v23 = vpop.f32.mrb[72].mxu1 }
 0x6db   :  { %v4235_v26 = vmax.f32 %v12089_v22, %v4206_v23  ;;  %v4208_v59 = vpop.f32.mrb[73].mxu1  ;;  %8877 = vmatprep.subr.bf16.mxu0 %v12122_v25  ;;  %8905 = vmatprep.subr.bf16.mxu1 %v12122_v25  ;;  %v8916_v22 = vpack.c.bf16 %v7606_v56, %v7604_v19  ;;  %v7615_v23 = vld [vmem:[%s13095_s7 + $0x110] sm:$0xff]  ;;  %v4923_v19 = vld [vmem:[#allocation7 + $0xb0] sm:$0xff]  ;;  %v4924_v56 = vld [vmem:[#allocation7 + $0xb8] sm:$0xff] }
 0x6dc   :  { %8879 = vmatpush3.bf16.msra.mxu0 %v12122_v25  ;;  %8907 = vmatpush3.bf16.msra.mxu1 %v12122_v25  ;;  %v7620_v59 = vld [vmem:[%s13095_s7 + $0x138] sm:$0xff] }
 0x6de   :  { %v4211_v50 = vpop.f32.mrb[74].mxu1 }
 0x6df   :  { %v4236_v3 = vmax.f32 %v12091_v36, %v4211_v50  ;;  %v4213_v47 = vpop.f32.mrb[75].mxu1  ;;  %v7605_v36 = vld [vmem:[%s13095_s7 + $0xc0] sm:$0xff]  ;;  %v7622_v50 = vld [vmem:[%s13095_s7 + $0x148] sm:$0xff] }
 0x6e0   :  { %v8918_v16 = vpack.c.bf16 %v7605_v36, %v7603_v46  ;;  %v8932_v47 = vpack.c.bf16 %v7622_v50, %v7620_v59  ;;  %v4928_v46 = vld [vmem:[#allocation7 + $0xd8] sm:$0xff]  ;;  %v4929_v36 = vld [vmem:[#allocation7 + $0xe0] sm:$0xff] }
 0x6e1   :  { %v12130_v27 = vpack.c.bf16 %v4236_v3, %v4235_v26  ;;  %v7617_v26 = vld [vmem:[%s13095_s7 + $0x120] sm:$0xff]  ;;  %v4405_v59 = vld [vmem:[%s13095_s7 + $0x50] sm:$0xff] }
 0x6e2   :  { %v4216_v57 = vpop.f32.mrb[76].mxu1  ;;  %v8930_v3 = vpack.c.bf16 %v7617_v26, %v7615_v23  ;;  %v4403_v26 = vld [vmem:[%s13095_s7 + $0x40] sm:$0xff] }
 0x6e3   :  { %v4237_v28 = vmax.f32 %v12093_v44, %v4216_v57  ;;  %v4218_v58 = vpop.f32.mrb[77].mxu1  ;;  %8881 = vmatprep.subr.bf16.mxu0 %v12130_v27  ;;  %8909 = vmatprep.subr.bf16.mxu1 %v12130_v27  ;;  %v4240_v44 = vld [vmem:[#allocation7 + $0x8] sm:$0xff]  ;;  %v7619_v57 = vld [vmem:[%s13095_s7 + $0x130] sm:$0xff] }
 0x6e4   :  { %8883 = vmatpush3.bf16.msra.mxu0 %v12130_v27  ;;  %8911 = vmatpush3.bf16.msra.mxu1 %v12130_v27 }
 0x6e6   :  { %v4221_v14 = vpop.f32.mrb[78].mxu1 }
 0x6e7   :  { %v4238_v34 = vmax.f32 %v12095_v62, %v4221_v14  ;;  %v4223_v7 = vpop.f32.mrb[79].mxu1  ;;  %v4241_v62 = vld [vmem:[#allocation7 + $0x10] sm:$0xff]  ;;  %v4922_v14 = vld [vmem:[#allocation7 + $0xa8] sm:$0xff] }
 0x6e8   :  { %v4926_v7 = vld [vmem:[#allocation7 + $0xc8] sm:$0xff] }
 0x6e9   :  { %v12144_v18 = vpack.c.bf16 %v4238_v34, %v4237_v28  ;;  %v7621_v28 = vld [vmem:[%s13095_s7 + $0x140] sm:$0xff]  ;;  %v4925_v34 = vld [vmem:[#allocation7 + $0xc0] sm:$0xff] }
 0x6ea   :  { %v8934_v58 = vpack.c.bf16 %v7621_v28, %v7619_v57  ;;  %v4410_v57 = vld [vmem:[%s13095_s7 + $0x78] sm:$0xff] }
 0x6eb   :  { %8885 = vmatprep.subr.bf16.mxu0 %v12144_v18  ;;  %8913 = vmatprep.subr.bf16.mxu1 %v12144_v18 }
 0x6ec   :  { %8887 = vmatpush3.bf16.msra.mxu0 %v12144_v18  ;;  %8915 = vmatpush3.bf16.msra.mxu1 %v12144_v18 }
 0x6ed   :  { %8957 = vmatprep.subr.bf16.mxu1 %v12097_v37  ;;  %8917 = vmatprep.subr.bf16.mxu0 %v8916_v22  ;;  %v4927_v22 = vld [vmem:[#allocation7 + $0xd0] sm:$0xff] }
 0x6ef   :  { %8092 = vmatmul.mubr.msk.f32.vlgmr.msra.gmra.mrb[80].mxu1 %vm4249_vm3, %v4419_v11  ;;  %8049 = vmatmul.mubr.msk.f32.vlgmr.msra.gmra.mrb[112].mxu0 %vm4249_vm3, %v4240_v44  ;;  %v4930_v11 = vld [vmem:[#allocation7 + $0xe8] sm:$0xff]  ;;  %v5281_v44 = vld [vmem:[#allocation7 + $0xf0] sm:$0xff] }
 0x6f0   :  { %8959 = vmatpush3.bf16.msra.mxu1 %v12097_v37  ;;  %8094 = vmatprep.mubr.msk.f32.mxu1 %vm4249_vm3, %v4420_v12  ;;  %v5282_v12 = vld [vmem:[#allocation7 + $0xf8] sm:$0xff] }
 0x6f1   :  { %8961 = vmatprep.subr.bf16.mxu1 %v12103_v41  ;;  %8051 = vmatprep.mubr.msk.f32.mxu0 %vm4249_vm3, %v4241_v62  ;;  %v5283_v62 = vld [vmem:[#allocation7 + $0x100] sm:$0xff] }
 0x6f2   :  { %8919 = vmatpush1.bf16.msra.mxu0 %v8918_v16  ;;  %v5284_v16 = vld [vmem:[#allocation7 + $0x108] sm:$0xff] }
 0x6f3   :  { %8095 = vmatmul.mubr.msk.f32.gmra.mrb[82].mxu1 %vm4249_vm3, %v4421_v24  ;;  %8052 = vmatmul.mubr.msk.f32.gmra.mrb[114].mxu0 %vm4249_vm3, %v4242_v53  ;;  %v5287_v24 = vld [vmem:[#allocation7 + $0x120] sm:$0xff]  ;;  %v5289_v53 = vld [vmem:[#allocation7 + $0x130] sm:$0xff] }
 0x6f4   :  { %8963 = vmatpush3.bf16.msra.mxu1 %v12103_v41  ;;  %8097 = vmatprep.mubr.msk.f32.mxu1 %vm4249_vm3, %v4422_v20  ;;  %v5641_v20 = vld [vmem:[#allocation7 + $0x140] sm:$0xff] }
 0x6f5   :  { %8965 = vmatprep.subr.bf16.mxu1 %v12109_v6  ;;  %8054 = vmatprep.mubr.msk.f32.mxu0 %vm4249_vm3, %v4243_v33  ;;  %v7624_v33 = vld [vmem:[%s13095_s7 + $0x158] sm:$0xf] }
 0x6f6   :  { %8921 = vmatprep.subr.bf16.mxu0 %v8920_v39  ;;  %v5646_v39 = vld [vmem:[#allocation7 + $0x168] sm:$0xff] }
 0x6f7   :  { %8098 = vmatmul.mubr.msk.f32.gmra.mrb[84].mxu1 %vm4249_vm3, %v4423_v8  ;;  %8055 = vmatmul.mubr.msk.f32.gmra.mrb[116].mxu0 %vm4249_vm3, %v4244_v35  ;;  %v5649_v8 = vld [vmem:[#allocation7 + $0x180] sm:$0xff]  ;;  %v5650_v35 = vld [vmem:[#allocation7 + $0x188] sm:$0xff] }
 0x6f8   :  { %8967 = vmatpush3.bf16.msra.mxu1 %v12109_v6  ;;  %8100 = vmatprep.mubr.msk.f32.mxu1 %vm4249_vm3, %v4424_v5  ;;  %v4396_v5 = vld [vmem:[%s13095_s7 + $0x8] sm:$0xff] }
 0x6f9   :  { %8969 = vmatprep.subr.bf16.mxu1 %v12115_v40  ;;  %8057 = vmatprep.mubr.msk.f32.mxu0 %vm4249_vm3, %v4245_v21  ;;  %v4398_v21 = vld [vmem:[%s13095_s7 + $0x18] sm:$0xff] }
 0x6fa   :  { %8923 = vmatpush1.bf16.msra.mxu0 %v8922_v32  ;;  %v8936_v32 = vpack.c.bf16 %v4398_v21, %v4396_v5  ;;  %v7659_v5 = vld [vmem:[%s13095_s7 + $0x160] sm:$0xff]  ;;  %v7661_v21 = vld [vmem:[%s13095_s7 + $0x170] sm:$0xff] }
 0x6fb   :  { %8101 = vmatmul.mubr.msk.f32.gmra.mrb[86].mxu1 %vm4249_vm3, %v4425_v4  ;;  %8058 = vmatmul.mubr.msk.f32.gmra.mrb[118].mxu0 %vm4249_vm3, %v4246_v49  ;;  %v4400_v4 = vld [vmem:[%s13095_s7 + $0x28] sm:$0xff]  ;;  %v4402_v49 = vld [vmem:[%s13095_s7 + $0x38] sm:$0xff] }
 0x6fc   :  { %8971 = vmatpush3.bf16.msra.mxu1 %v12115_v40  ;;  %8103 = vmatprep.mubr.msk.f32.mxu1 %vm4249_vm3, %v4426_v29  ;;  %v8938_v29 = vpack.c.bf16 %v4397_v43, %v4395_v45  ;;  %v7664_v45 = vld [vmem:[%s13095_s7 + $0x188] sm:$0xff]  ;;  %v7666_v43 = vld [vmem:[%s13095_s7 + $0x198] sm:$0xff] }
 0x6fd   :  { %8973 = vmatprep.subr.bf16.mxu1 %v12122_v25  ;;  %8060 = vmatprep.mubr.msk.f32.mxu0 %vm4249_vm3, %v4247_v38 }
 0x6fe   :  { %8925 = vmatprep.subr.bf16.mxu0 %v8924_v55  ;;  %v8940_v55 = vpack.c.bf16 %v4402_v49, %v4400_v4  ;;  %v8986_v49 = vpack.c.bf16 %v7661_v21, %v7659_v5  ;;  %v7707_v5 = vld [vmem:[%s13095_s7 + $0x230] sm:$0xff]  ;;  %v7709_v21 = vld [vmem:[%s13095_s7 + $0x240] sm:$0xff] }
 0x6ff   :  { %8104 = vmatmul.mubr.msk.f32.gmra.mrb[88].mxu1 %vm4249_vm3, %v4427_v54  ;;  %8061 = vmatmul.mubr.msk.f32.gmra.mrb[120].mxu0 %vm4249_vm3, %v4248_v31  ;;  %v4404_v54 = vld [vmem:[%s13095_s7 + $0x48] sm:$0xff]  ;;  %v4406_v31 = vld [vmem:[%s13095_s7 + $0x58] sm:$0xff] }
 0x700   :  { %8975 = vmatpush3.bf16.msra.mxu1 %v12122_v25  ;;  %8134 = vmatprep.mubr.msk.f32.mxu1 %vm4249_vm3, %v4921_v2  ;;  %v8944_v23 = vpack.c.bf16 %v4406_v31, %v4404_v54 }
 0x701   :  { %8977 = vmatprep.subr.bf16.mxu1 %v12130_v27  ;;  %8927 = vmatpush1.bf16.msra.mxu0 %v8926_v9  ;;  %v8942_v9 = vpack.c.bf16 %v4401_v15, %v4399_v60  ;;  %v7668_v15 = vld [vmem:[%s13095_s7 + $0x1a8] sm:$0xff] }
 0x702   :  { %8929 = vmatprep.subr.bf16.mxu0 %v8928_v1  ;;  %4698 = vmatprep.mubr.f32.mxu0 %v9779_v30 }
 0x704   :  { %8979 = vmatpush3.bf16.msra.mxu1 %v12130_v27 }
 0x705   :  { %8981 = vmatprep.subr.bf16.mxu1 %v12144_v18  ;;  %8931 = vmatpush1.bf16.msra.mxu0 %v8930_v3 }
 0x706   :  { %8933 = vmatprep.subr.bf16.mxu0 %v8932_v47  ;;  %v4408_v47 = vld [vmem:[%s13095_s7 + $0x68] sm:$0xff] }
 0x708   :  { %8983 = vmatpush3.bf16.msra.mxu1 %v12144_v18 }
 0x709   :  { %9005 = vmatprep.subr.bf16.mxu1 %v12097_v37  ;;  %8935 = vmatpush1.bf16.msra.mxu0 %v8934_v58  ;;  %v8946_v58 = vpack.c.bf16 %v4405_v59, %v4403_v26  ;;  %v7674_v59 = vld [vmem:[%s13095_s7 + $0x1d8] sm:$0xff] }
 0x70a   :  { %7625 = vmatprep.subr.msk.mxu0 %vm4627_vm4, %v7624_v33  ;;  %v7660_v33 = vld [vmem:[%s13095_s7 + $0x168] sm:$0xff] }
 0x70b   :  { %8135 = vmatmul.mubr.msk.f32.vlgmr.msra.gmra.mrb[90].mxu1 %vm4249_vm3, %v4922_v14 }
 0x70c   :  { %9007 = vmatpush3.bf16.msra.mxu1 %v12097_v37  ;;  %8137 = vmatprep.mubr.msk.f32.mxu1 %vm4249_vm3, %v4923_v19  ;;  %v8948_v19 = vpack.c.bf16 %v4410_v57, %v4408_v47 }
 0x70d   :  { %9009 = vmatprep.subr.bf16.mxu1 %v12103_v41 }
 0x70f   :  { %8138 = vmatmul.mubr.msk.f32.gmra.mrb[92].mxu1 %vm4249_vm3, %v4924_v56  ;;  %v4407_v56 = vld [vmem:[%s13095_s7 + $0x60] sm:$0xff] }
 0x710   :  { %9011 = vmatpush3.bf16.msra.mxu1 %v12103_v41  ;;  %8140 = vmatprep.mubr.msk.f32.mxu1 %vm4249_vm3, %v4925_v34  ;;  %v4409_v34 = vld [vmem:[%s13095_s7 + $0x70] sm:$0xff] }
 0x711   :  { %9013 = vmatprep.subr.bf16.mxu1 %v12109_v6 }
 0x713   :  { %8141 = vmatmul.mubr.msk.f32.gmra.mrb[94].mxu1 %vm4249_vm3, %v4926_v7 }
 0x714   :  { %9015 = vmatpush3.bf16.msra.mxu1 %v12109_v6  ;;  %8143 = vmatprep.mubr.msk.f32.mxu1 %vm4249_vm3, %v4927_v22 }
 0x715   :  { %9017 = vmatprep.subr.bf16.mxu1 %v12115_v40 }
 0x717   :  { %8144 = vmatmul.mubr.msk.f32.gmra.mrb[96].mxu1 %vm4249_vm3, %v4928_v46  ;;  %v4412_v46 = vld [vmem:[%s13095_s7 + $0x88] sm:$0xff] }
 0x718   :  { %9019 = vmatpush3.bf16.msra.mxu1 %v12115_v40  ;;  %8146 = vmatprep.mubr.msk.f32.mxu1 %vm4249_vm3, %v4929_v36  ;;  %v4414_v36 = vld [vmem:[%s13095_s7 + $0x98] sm:$0xff] }
 0x719   :  { %9021 = vmatprep.subr.bf16.mxu1 %v12122_v25 }
 0x71b   :  { %8147 = vmatmul.mubr.msk.f32.gmra.mrb[98].mxu1 %vm4249_vm3, %v4930_v11 }
 0x71c   :  { %9023 = vmatpush3.bf16.msra.mxu1 %v12122_v25  ;;  %8177 = vmatprep.mubr.msk.f32.mxu1 %vm4249_vm3, %v5281_v44  ;;  %v8950_v44 = vpack.c.bf16 %v4409_v34, %v4407_v56 }
 0x71d   :  { %9025 = vmatprep.subr.bf16.mxu1 %v12130_v27 }
 0x720   :  { %9027 = vmatpush3.bf16.msra.mxu1 %v12130_v27 }
 0x721   :  { %9029 = vmatprep.subr.bf16.mxu1 %v12144_v18 }
 0x724   :  { %9031 = vmatpush3.bf16.msra.mxu1 %v12144_v18 }
 0x725   :  { %9053 = vmatprep.subr.bf16.mxu1 %v12097_v37 }
 0x727   :  { %8178 = vmatmul.mubr.msk.f32.vlgmr.msra.gmra.mrb[100].mxu1 %vm4249_vm3, %v5282_v12 }
 0x728   :  { %9055 = vmatpush3.bf16.msra.mxu1 %v12097_v37  ;;  %8180 = vmatprep.mubr.msk.f32.mxu1 %vm4249_vm3, %v5283_v62  ;;  %v5288_v37 = vld [vmem:[#allocation7 + $0x128] sm:$0xff]  ;;  %v8952_v62 = vpack.c.bf16 %v4414_v36, %v4412_v46  ;;  %v7677_v46 = vld [vmem:[%s13095_s7 + $0x1f0] sm:$0xff] }
 0x729   :  { %9057 = vmatprep.subr.bf16.mxu1 %v12103_v41 }
 0x72b   :  { %8181 = vmatmul.mubr.msk.f32.gmra.mrb[102].mxu1 %vm4249_vm3, %v5284_v16  ;;  %v4411_v16 = vld [vmem:[%s13095_s7 + $0x80] sm:$0xff] }
 0x72c   :  { %9059 = vmatpush3.bf16.msra.mxu1 %v12103_v41  ;;  %8183 = vmatprep.mubr.msk.f32.mxu1 %vm4249_vm3, %v5285_v61  ;;  %v5290_v41 = vld [vmem:[#allocation7 + $0x138] sm:$0xff]  ;;  %v4413_v61 = vld [vmem:[%s13095_s7 + $0x90] sm:$0xff] }
 0x72d   :  { %9061 = vmatprep.subr.bf16.mxu1 %v12109_v6 }
 0x72f   :  { %8184 = vmatmul.mubr.msk.f32.gmra.mrb[104].mxu1 %vm4249_vm3, %v5286_v48 }
 0x730   :  { %9063 = vmatpush3.bf16.msra.mxu1 %v12109_v6  ;;  %8186 = vmatprep.mubr.msk.f32.mxu1 %vm4249_vm3, %v5287_v24  ;;  %v5642_v6 = vld [vmem:[#allocation7 + $0x148] sm:$0xff] }
 0x731   :  { %9065 = vmatprep.subr.bf16.mxu1 %v12115_v40 }
 0x733   :  { %8187 = vmatmul.mubr.msk.f32.gmra.mrb[106].mxu1 %vm4249_vm3, %v5288_v37 }
 0x734   :  { %9067 = vmatpush3.bf16.msra.mxu1 %v12115_v40  ;;  %8189 = vmatprep.mubr.msk.f32.mxu1 %vm4249_vm3, %v5289_v53  ;;  %v5643_v40 = vld [vmem:[#allocation7 + $0x150] sm:$0xff]  ;;  %v8954_v53 = vpack.c.bf16 %v4413_v61, %v4411_v16 }
 0x735   :  { %9069 = vmatprep.subr.bf16.mxu1 %v12122_v25  ;;  %v7679_v16 = vld [vmem:[%s13095_s7 + $0x200] sm:$0xf] }
 0x737   :  { %8190 = vmatmul.mubr.msk.f32.gmra.mrb[108].mxu1 %vm4249_vm3, %v5290_v41 }
 0x738   :  { %9071 = vmatpush3.bf16.msra.mxu1 %v12122_v25  ;;  %8220 = vmatprep.mubr.msk.f32.mxu1 %vm4249_vm3, %v5641_v20  ;;  %v7623_v25 = vld [vmem:[%s13095_s7 + $0x150] sm:$0xf] }
 0x739   :  { %9073 = vmatprep.subr.bf16.mxu1 %v12130_v27  ;;  %7626 = vmatpush1.msk.msra.mxu0 %vm4627_vm4, %v7623_v25  ;;  %v7662_v25 = vld [vmem:[%s13095_s7 + $0x178] sm:$0xff] }
 0x73a   :  { %8937 = vmatprep.subr.bf16.mxu0 %v8936_v32 }
 0x73c   :  { %9075 = vmatpush3.bf16.msra.mxu1 %v12130_v27  ;;  %v5644_v27 = vld [vmem:[#allocation7 + $0x158] sm:$0xff] }
 0x73d   :  { %9077 = vmatprep.subr.bf16.mxu1 %v12144_v18 }
 0x740   :  { %9079 = vmatpush3.bf16.msra.mxu1 %v12144_v18  ;;  %v5645_v18 = vld [vmem:[#allocation7 + $0x160] sm:$0xff] }
 0x743   :  { %8221 = vmatmul.mubr.msk.f32.vlgmr.msra.gmra.mrb[110].mxu1 %vm4249_vm3, %v5642_v6 }
 0x744   :  { %8223 = vmatprep.mubr.msk.f32.mxu1 %vm4249_vm3, %v5643_v40  ;;  %v4416_v40 = vld [vmem:[%s13095_s7 + $0xa8] sm:$0xf] }
 0x747   :  { %8224 = vmatmul.mubr.msk.f32.gmra.mrb[112].mxu1 %vm4249_vm3, %v5644_v27 }
 0x748   :  { %8226 = vmatprep.mubr.msk.f32.mxu1 %vm4249_vm3, %v5645_v18  ;;  %v4415_v18 = vld [vmem:[%s13095_s7 + $0xa0] sm:$0xf] }
 0x74b   :  { %8227 = vmatmul.mubr.msk.f32.gmra.mrb[114].mxu1 %vm4249_vm3, %v5646_v39  ;;  %v8984_v39 = vpack.c.bf16 %v7662_v25, %v7660_v33  ;;  %v7705_v25 = vld [vmem:[%s13095_s7 + $0x220] sm:$0xff] }
 0x74c   :  { %8229 = vmatprep.mubr.msk.f32.mxu1 %vm4249_vm3, %v5647_v42 }
 0x74f   :  { %8230 = vmatmul.mubr.msk.f32.gmra.mrb[116].mxu1 %vm4249_vm3, %v5648_v52 }
 0x750   :  { %8232 = vmatprep.mubr.msk.f32.mxu1 %vm4249_vm3, %v5649_v8 }
 0x753   :  { %8233 = vmatmul.mubr.msk.f32.gmra.mrb[118].mxu1 %vm4249_vm3, %v5650_v35 }
 0x754   :  { %6137 = vmatprep.mubr.f32.mxu1 %v9779_v30 }
 0x7c2   :  { %v8093_v38 = vpop.f32.mrb[80].mxu1  ;;  %v12328_v63 = vpop.f32.mrb[112].mxu0 }
 0x7c3   :  { %v4524_v10 = vpop.f32.mrb[81].mxu1  ;;  %v12336_v2 = vpop.f32.mrb[113].mxu0 }
 0x7c4   :  { %7627 = vmatmul.mubr.msk.f32.vlgmr.msra.gmra.mrb[122].mxu0 %vm4596_vm5, %v4524_v10  ;;  %v7670_v10 = vld [vmem:[%s13095_s7 + $0x1b8] sm:$0xff] }
 0x7c5   :  { %4704 = vmatprep.mubr.f32.mxu0 %v9779_v30  ;;  %8939 = vmatpush1.bf16.msra.mxu0 %v8938_v29  ;;  %v8988_v29 = vpack.c.bf16 %v7666_v43, %v7664_v45  ;;  %v7712_v45 = vld [vmem:[%s13095_s7 + $0x258] sm:$0xff]  ;;  %v9038_v43 = vpack.c.bf16 %v7709_v21, %v7707_v5  ;;  %v7757_v5 = vld [vmem:[%s13095_s7 + $0x310] sm:$0xff]  ;;  %v7760_v21 = vld [vmem:[%s13095_s7 + $0x328] sm:$0xff] }
 0x7c6   :  { %v8096_v1 = vpop.f32.mrb[82].mxu1  ;;  %8941 = vmatprep.subr.bf16.mxu0 %v8940_v55  ;;  %v12346_v50 = vpop.f32.mrb[114].mxu0  ;;  %v7665_v55 = vld [vmem:[%s13095_s7 + $0x190] sm:$0xff] }
 0x7c7   :  { %v4534_v3 = vpop.f32.mrb[83].mxu1  ;;  %v12354_v28 = vpop.f32.mrb[115].mxu0 }
 0x7c8   :  { %7628 = vmatmul.mubr.msk.f32.gmra.mrb[124].mxu0 %vm4596_vm5, %v8093_v38  ;;  %v7663_v38 = vld [vmem:[%s13095_s7 + $0x180] sm:$0xff] }
 0x7c9   :  { %4710 = vmatprep.mubr.f32.mxu0 %v9779_v30  ;;  %8943 = vmatpush1.bf16.msra.mxu0 %v8942_v9  ;;  %v8990_v31 = vpack.c.bf16 %v7665_v55, %v7663_v38  ;;  %v8992_v9 = vpack.c.bf16 %v7670_v10, %v7668_v15  ;;  %v7713_v38 = vld [vmem:[%s13095_s7 + $0x260] sm:$0xff]  ;;  %v7718_v15 = vld [vmem:[%s13095_s7 + $0x288] sm:$0xff] }
 0x7ca   :  { %v8099_v14 = vpop.f32.mrb[84].mxu1  ;;  %8945 = vmatprep.subr.bf16.mxu0 %v8944_v23  ;;  %v12364_v7 = vpop.f32.mrb[116].mxu0  ;;  %v7669_v23 = vld [vmem:[%s13095_s7 + $0x1b0] sm:$0xff] }
 0x7cb   :  { %v4544_v22 = vpop.f32.mrb[85].mxu1  ;;  %v12372_v11 = vpop.f32.mrb[117].mxu0 }
 0x7cc   :  { %7629 = vmatmul.mubr.msk.f32.gmra.mrb[126].mxu0 %vm4596_vm5, %v4534_v3 }
 0x7cd   :  { %4716 = vmatprep.mubr.f32.mxu0 %v9779_v30  ;;  %8947 = vmatpush1.bf16.msra.mxu0 %v8946_v58  ;;  %v7671_v58 = vld [vmem:[%s13095_s7 + $0x1c0] sm:$0xff] }
 0x7ce   :  { %v8102_v12 = vpop.f32.mrb[86].mxu1  ;;  %8949 = vmatprep.subr.bf16.mxu0 %v8948_v19  ;;  %v12382_v48 = vpop.f32.mrb[118].mxu0  ;;  %v7676_v19 = vld [vmem:[%s13095_s7 + $0x1e8] sm:$0xff] }
 0x7cf   :  { %v4554_v24 = vpop.f32.mrb[87].mxu1  ;;  %v12384_v37 = vpop.f32.mrb[119].mxu0 }
 0x7d0   :  { %7630 = vmatmul.mubr.msk.f32.gmra.mrb[128].mxu0 %vm4596_vm5, %v8096_v1  ;;  %v7667_v1 = vld [vmem:[%s13095_s7 + $0x1a0] sm:$0xff] }
 0x7d1   :  { %4722 = vmatprep.mubr.f32.mxu0 %v9779_v30  ;;  %8951 = vmatpush1.bf16.msra.mxu0 %v8950_v44  ;;  %v8994_v47 = vpack.c.bf16 %v7669_v23, %v7667_v1  ;;  %v7680_v44 = vld [vmem:[%s13095_s7 + $0x208] sm:$0xf]  ;;  %v7715_v1 = vld [vmem:[%s13095_s7 + $0x270] sm:$0xff]  ;;  %v7717_v23 = vld [vmem:[%s13095_s7 + $0x280] sm:$0xff] }
 0x7d2   :  { %v8105_v41 = vpop.f32.mrb[88].mxu1  ;;  %8953 = vmatprep.subr.bf16.mxu0 %v8952_v62  ;;  %v12388_v20 = vpop.f32.mrb[120].mxu0  ;;  %v7706_v62 = vld [vmem:[%s13095_s7 + $0x228] sm:$0xff] }
 0x7d3   :  { %v4564_v6 = vpop.f32.mrb[89].mxu1  ;;  %v12399_v27 = vpop.f32.mrb[121].mxu0 }
 0x7d4   :  { %7631 = vmatmul.mubr.msk.f32.gmra.mrb[130].mxu0 %vm4596_vm5, %v4544_v22  ;;  %v7675_v22 = vld [vmem:[%s13095_s7 + $0x1e0] sm:$0xff] }
 0x7d5   :  { %4728 = vmatprep.mubr.f32.mxu0 %v9779_v30  ;;  %8955 = vmatpush1.bf16.msra.mxu0 %v8954_v53 }
 0x7d6   :  { %7637 = vmatprep.subr.msk.mxu0 %vm4627_vm4, %v4416_v40 }
 0x7d8   :  { %7632 = vmatmul.mubr.msk.f32.gmra.mrb[132].mxu0 %vm4596_vm5, %v8099_v14  ;;  %v7673_v14 = vld [vmem:[%s13095_s7 + $0x1d0] sm:$0xff] }
 0x7d9   :  { %4734 = vmatprep.mubr.f32.mxu0 %v9779_v30  ;;  %7638 = vmatpush1.msk.msra.mxu0 %vm4627_vm4, %v4415_v18  ;;  %v8998_v56 = vpack.c.bf16 %v7673_v14, %v7671_v58  ;;  %v7710_v18 = vld [vmem:[%s13095_s7 + $0x248] sm:$0xff]  ;;  %v7719_v14 = vld [vmem:[%s13095_s7 + $0x290] sm:$0xff] }
 0x7da   :  { %8985 = vmatprep.subr.bf16.mxu0 %v8984_v39 }
 0x7dc   :  { %7633 = vmatmul.mubr.msk.f32.gmra.mrb[134].mxu0 %vm4596_vm5, %v4554_v24 }
 0x7dd   :  { %4740 = vmatprep.mubr.f32.mxu0 %v9779_v30 }
 0x7de   :  { %v12412_v42 = vpop.f32.mrb[90].mxu1 }
 0x7df   :  { %v12414_v52 = vpop.f32.mrb[91].mxu1 }
 0x7e0   :  { %7634 = vmatmul.mubr.msk.f32.gmra.mrb[136].mxu0 %vm4596_vm5, %v8102_v12  ;;  %v7704_v12 = vld [vmem:[%s13095_s7 + $0x218] sm:$0xff] }
 0x7e1   :  { %4746 = vmatprep.mubr.f32.mxu0 %v9779_v30  ;;  %v9032_v61 = vpack.c.bf16 %v7706_v62, %v7704_v12 }
 0x7e2   :  { %v12418_v8 = vpop.f32.mrb[92].mxu1 }
 0x7e3   :  { %v12420_v35 = vpop.f32.mrb[93].mxu1 }
 0x7e4   :  { %7635 = vmatmul.mubr.msk.f32.gmra.mrb[138].mxu0 %vm4596_vm5, %v4564_v6 }
 0x7e5   :  { %4752 = vmatprep.mubr.f32.mxu0 %v9779_v30 }
 0x7e6   :  { %v12430_v32 = vpop.f32.mrb[94].mxu1 }
 0x7e7   :  { %v12438_v4 = vpop.f32.mrb[95].mxu1 }
 0x7e8   :  { %7636 = vmatmul.mubr.msk.f32.gmra.mrb[140].mxu0 %vm4596_vm5, %v8105_v41 }
 0x7e9   :  { %4859 = vmatprep.mubr.f32.mxu0 %v9779_v30 }
 0x7ea   :  { %v12448_v60 = vpop.f32.mrb[96].mxu1 }
 0x7eb   :  { %v12456_v54 = vpop.f32.mrb[97].mxu1 }
 0x7ec   :  { %7639 = vmatmul.mubr.msk.f32.vlgmr.msra.gmra.mrb[122].mxu0 %vm4596_vm5, %v12336_v2  ;;  %v7672_v2 = vld [vmem:[%s13095_s7 + $0x1c8] sm:$0xff] }
 0x7ed   :  { %4865 = vmatprep.mubr.f32.mxu0 %v9779_v30  ;;  %8987 = vmatpush1.bf16.msra.mxu0 %v8986_v49  ;;  %v8996_v57 = vpack.c.bf16 %v7674_v59, %v7672_v2  ;;  %v7722_v59 = vld [vmem:[%s13095_s7 + $0x2a8] sm:$0xff] }
 0x7ee   :  { %8989 = vmatprep.subr.bf16.mxu0 %v8988_v29  ;;  %v12467_v26 = vpop.f32.mrb[98].mxu1  ;;  %v7711_v29 = vld [vmem:[%s13095_s7 + $0x250] sm:$0xff] }
 0x7ef   :  { %v12475_v3 = vpop.f32.mrb[99].mxu1 }
 0x7f0   :  { %7640 = vmatmul.mubr.msk.f32.gmra.mrb[124].mxu0 %vm4596_vm5, %v12328_v63  ;;  %v7678_v63 = vld [vmem:[%s13095_s7 + $0x1f8] sm:$0xff] }
 0x7f1   :  { %4871 = vmatprep.mubr.f32.mxu0 %v9779_v30  ;;  %8991 = vmatpush1.bf16.msra.mxu0 %v8990_v31  ;;  %v9000_v34 = vpack.c.bf16 %v7678_v63, %v7676_v19  ;;  %v9042_v31 = vpack.c.bf16 %v7713_v38, %v7711_v29  ;;  %v7721_v19 = vld [vmem:[%s13095_s7 + $0x2a0] sm:$0xff]  ;;  %v7764_v29 = vld [vmem:[%s13095_s7 + $0x348] sm:$0xff] }
 0x7f2   :  { %8993 = vmatprep.subr.bf16.mxu0 %v8992_v9 }
 0x7f4   :  { %7641 = vmatmul.mubr.msk.f32.gmra.mrb[126].mxu0 %vm4596_vm5, %v12354_v28  ;;  %v9002_v28 = vpack.c.bf16 %v7677_v46, %v7675_v22  ;;  %v7724_v22 = vld [vmem:[%s13095_s7 + $0x2b8] sm:$0xf]  ;;  %v7748_v46 = vld [vmem:[%s13095_s7 + $0x2c8] sm:$0xff] }
 0x7f5   :  { %4877 = vmatprep.mubr.f32.mxu0 %v9779_v30  ;;  %8995 = vmatpush1.bf16.msra.mxu0 %v8994_v47 }
 0x7f6   :  { %8997 = vmatprep.subr.bf16.mxu0 %v8996_v57  ;;  %v9046_v57 = vpack.c.bf16 %v7717_v23, %v7715_v1 }
 0x7f8   :  { %7642 = vmatmul.mubr.msk.f32.gmra.mrb[128].mxu0 %vm4596_vm5, %v12346_v50 }
 0x7f9   :  { %4883 = vmatprep.mubr.f32.mxu0 %v9779_v30  ;;  %8999 = vmatpush1.bf16.msra.mxu0 %v8998_v56 }
 0x7fa   :  { %9001 = vmatprep.subr.bf16.mxu0 %v9000_v34  ;;  %v12504_v36 = vpop.f32.mrb[100].mxu1 }
 0x7fb   :  { %v12515_v50 = vpop.f32.mrb[101].mxu1 }
 0x7fc   :  { %7643 = vmatmul.mubr.msk.f32.gmra.mrb[130].mxu0 %vm4596_vm5, %v12372_v11 }
 0x7fd   :  { %4889 = vmatprep.mubr.f32.mxu0 %v9779_v30  ;;  %9003 = vmatpush1.bf16.msra.mxu0 %v9002_v28  ;;  %v7750_v28 = vld [vmem:[%s13095_s7 + $0x2d8] sm:$0xff] }
 0x7fe   :  { %7681 = vmatprep.subr.msk.mxu0 %vm4627_vm4, %v7680_v44  ;;  %v12524_v24 = vpop.f32.mrb[102].mxu1  ;;  %v7723_v44 = vld [vmem:[%s13095_s7 + $0x2b0] sm:$0xf]  ;;  %v9080_v12 = vpack.c.bf16 %v7750_v28, %v7748_v46 }
 0x7ff   :  { %v12526_v53 = vpop.f32.mrb[103].mxu1 }
 0x800   :  { %7644 = vmatmul.mubr.msk.f32.gmra.mrb[132].mxu0 %vm4596_vm5, %v12364_v7 }
 0x801   :  { %4895 = vmatprep.mubr.f32.mxu0 %v9779_v30  ;;  %7682 = vmatpush1.msk.msra.mxu0 %vm4627_vm4, %v7679_v16 }
 0x802   :  { %9033 = vmatprep.subr.bf16.mxu0 %v9032_v61  ;;  %v12532_v11 = vpop.f32.mrb[104].mxu1 }
 0x803   :  { %v12534_v41 = vpop.f32.mrb[105].mxu1 }
 0x804   :  { %7645 = vmatmul.mubr.msk.f32.gmra.mrb[134].mxu0 %vm4596_vm5, %v12384_v37  ;;  %v7703_v37 = vld [vmem:[%s13095_s7 + $0x210] sm:$0xff] }
 0x805   :  { %4901 = vmatprep.mubr.f32.mxu0 %v9779_v30 }
 0x806   :  { %v12539_v6 = vpop.f32.mrb[106].mxu1 }
 0x807   :  { %v12541_v40 = vpop.f32.mrb[107].mxu1 }
 0x808   :  { %7646 = vmatmul.mubr.msk.f32.gmra.mrb[136].mxu0 %vm4596_vm5, %v12382_v48  ;;  %v7708_v48 = vld [vmem:[%s13095_s7 + $0x238] sm:$0xff] }
 0x809   :  { %4907 = vmatprep.mubr.f32.mxu0 %v9779_v30  ;;  %v9036_v39 = vpack.c.bf16 %v7710_v18, %v7708_v48  ;;  %v7756_v48 = vld [vmem:[%s13095_s7 + $0x308] sm:$0xff] }
 0x80a   :  { %v12546_v7 = vpop.f32.mrb[108].mxu1 }
 0x80b   :  { %v12548_v33 = vpop.f32.mrb[109].mxu1 }
 0x80c   :  { %7647 = vmatmul.mubr.msk.f32.gmra.mrb[138].mxu0 %vm4596_vm5, %v12399_v27  ;;  %v9034_v27 = vpack.c.bf16 %v7705_v25, %v7703_v37  ;;  %v7751_v37 = vld [vmem:[%s13095_s7 + $0x2e0] sm:$0xff]  ;;  %v7753_v25 = vld [vmem:[%s13095_s7 + $0x2f0] sm:$0xff] }
 0x80d   :  { %4913 = vmatprep.mubr.f32.mxu0 %v9779_v30  ;;  %v9086_v18 = vpack.c.bf16 %v7753_v25, %v7751_v37 }
 0x810   :  { %7648 = vmatmul.mubr.msk.f32.gmra.mrb[140].mxu0 %vm4596_vm5, %v12388_v20  ;;  %v7714_v20 = vld [vmem:[%s13095_s7 + $0x268] sm:$0xff] }
 0x811   :  { %5199 = vmatprep.mubr.f32.mxu0 %v9779_v30  ;;  %v9040_v49 = vpack.c.bf16 %v7714_v20, %v7712_v45 }
 0x814   :  { %7683 = vmatmul.mubr.msk.f32.vlgmr.msra.gmra.mrb[122].mxu0 %vm4596_vm5, %v12414_v52  ;;  %v7716_v52 = vld [vmem:[%s13095_s7 + $0x278] sm:$0xff] }
 0x815   :  { %5205 = vmatprep.mubr.f32.mxu0 %v9779_v30  ;;  %9035 = vmatpush1.bf16.msra.mxu0 %v9034_v27  ;;  %v9044_v9 = vpack.c.bf16 %v7718_v15, %v7716_v52  ;;  %v7763_v15 = vld [vmem:[%s13095_s7 + $0x340] sm:$0xff] }
 0x816   :  { %9037 = vmatprep.subr.bf16.mxu0 %v9036_v39  ;;  %v12589_v55 = vpop.f32.mrb[110].mxu1  ;;  %v7755_v39 = vld [vmem:[%s13095_s7 + $0x300] sm:$0xff] }
 0x817   :  { %v12597_v10 = vpop.f32.mrb[111].mxu1  ;;  %v9090_v45 = vpack.c.bf16 %v7757_v5, %v7755_v39 }
 0x818   :  { %7684 = vmatmul.mubr.msk.f32.gmra.mrb[124].mxu0 %vm4596_vm5, %v12412_v42  ;;  %v7720_v42 = vld [vmem:[%s13095_s7 + $0x298] sm:$0xff] }
 0x819   :  { %5211 = vmatprep.mubr.f32.mxu0 %v9779_v30  ;;  %9039 = vmatpush1.bf16.msra.mxu0 %v9038_v43  ;;  %v9048_v58 = vpack.c.bf16 %v7722_v59, %v7720_v42  ;;  %v7759_v43 = vld [vmem:[%s13095_s7 + $0x320] sm:$0xff] }
 0x81a   :  { %9041 = vmatprep.subr.bf16.mxu0 %v9040_v49  ;;  %v12608_v2 = vpop.f32.mrb[112].mxu1  ;;  %v7761_v49 = vld [vmem:[%s13095_s7 + $0x330] sm:$0xff] }
 0x81b   :  { %v12616_v47 = vpop.f32.mrb[113].mxu1  ;;  %v9094_v38 = vpack.c.bf16 %v7761_v49, %v7759_v43 }
 0x81c   :  { %7685 = vmatmul.mubr.msk.f32.gmra.mrb[126].mxu0 %vm4596_vm5, %v12420_v35  ;;  %v9050_v35 = vpack.c.bf16 %v7721_v19, %v7719_v14 }
 0x81d   :  { %5217 = vmatprep.mubr.f32.mxu0 %v9779_v30  ;;  %9043 = vmatpush1.bf16.msra.mxu0 %v9042_v31  ;;  %v7765_v31 = vld [vmem:[%s13095_s7 + $0x350] sm:$0xff] }
 0x81e   :  { %9045 = vmatprep.subr.bf16.mxu0 %v9044_v9  ;;  %v12627_v63 = vpop.f32.mrb[114].mxu1  ;;  %v7768_v9 = vld [vmem:[%s13095_s7 + $0x368] sm:$0xf] }
 0x81f   :  { %v12629_v56 = vpop.f32.mrb[115].mxu1 }
 0x820   :  { %7686 = vmatmul.mubr.msk.f32.gmra.mrb[128].mxu0 %vm4596_vm5, %v12418_v8 }
 0x821   :  { %5223 = vmatprep.mubr.f32.mxu0 %v9779_v30  ;;  %9047 = vmatpush1.bf16.msra.mxu0 %v9046_v57 }
 0x822   :  { %9049 = vmatprep.subr.bf16.mxu0 %v9048_v58  ;;  %v12634_v34 = vpop.f32.mrb[116].mxu1 }
 0x823   :  { %v12645_v8 = vpop.f32.mrb[117].mxu1 }
 0x824   :  { %7687 = vmatmul.mubr.msk.f32.gmra.mrb[130].mxu0 %vm4596_vm5, %v12438_v4  ;;  %v7749_v4 = vld [vmem:[%s13095_s7 + $0x2d0] sm:$0xff] }
 0x825   :  { %5229 = vmatprep.mubr.f32.mxu0 %v9779_v30  ;;  %9051 = vmatpush1.bf16.msra.mxu0 %v9050_v35 }
 0x826   :  { %7725 = vmatprep.subr.msk.mxu0 %vm4627_vm4, %v7724_v22  ;;  %v12654_v62 = vpop.f32.mrb[118].mxu1 }
 0x827   :  { %v12656_v16 = vpop.f32.mrb[119].mxu1 }
 0x828   :  { %7688 = vmatmul.mubr.msk.f32.gmra.mrb[132].mxu0 %vm4596_vm5, %v12430_v32  ;;  %v7747_v32 = vld [vmem:[%s13095_s7 + $0x2c0] sm:$0xff] }
 0x829   :  { %5235 = vmatprep.mubr.f32.mxu0 %v9779_v30  ;;  %7726 = vmatpush1.msk.msra.mxu0 %vm4627_vm4, %v7723_v44 }
 0x82a   :  { %9081 = vmatprep.subr.bf16.mxu0 %v9080_v12 }
 0x82c   :  { %7689 = vmatmul.mubr.msk.f32.gmra.mrb[134].mxu0 %vm4596_vm5, %v12456_v54  ;;  %v7752_v54 = vld [vmem:[%s13095_s7 + $0x2e8] sm:$0xff] }
 0x82d   :  { %5241 = vmatprep.mubr.f32.mxu0 %v9779_v30 }
 0x830   :  { %7690 = vmatmul.mubr.msk.f32.gmra.mrb[136].mxu0 %vm4596_vm5, %v12448_v60  ;;  %v7754_v60 = vld [vmem:[%s13095_s7 + $0x2f8] sm:$0xff] }
 0x831   :  { %5247 = vmatprep.mubr.f32.mxu0 %v9779_v30  ;;  %v9084_v61 = vpack.c.bf16 %v7754_v60, %v7752_v54 }
 0x834   :  { %7691 = vmatmul.mubr.msk.f32.gmra.mrb[138].mxu0 %vm4596_vm5, %v12475_v3  ;;  %v9082_v3 = vpack.c.bf16 %v7749_v4, %v7747_v32 }
 0x835   :  { %5253 = vmatprep.mubr.f32.mxu0 %v9779_v30 }
 0x838   :  { %7692 = vmatmul.mubr.msk.f32.gmra.mrb[140].mxu0 %vm4596_vm5, %v12467_v26  ;;  %v7758_v26 = vld [vmem:[%s13095_s7 + $0x318] sm:$0xff] }
 0x839   :  { %5559 = vmatprep.mubr.f32.mxu0 %v9779_v30  ;;  %v9088_v27 = vpack.c.bf16 %v7758_v26, %v7756_v48 }
 0x83c   :  { %7727 = vmatmul.mubr.msk.f32.vlgmr.msra.gmra.mrb[122].mxu0 %vm4596_vm5, %v12515_v50  ;;  %v7762_v50 = vld [vmem:[%s13095_s7 + $0x338] sm:$0xff] }
 0x83d   :  { %5565 = vmatprep.mubr.f32.mxu0 %v9779_v30  ;;  %9083 = vmatpush1.bf16.msra.mxu0 %v9082_v3  ;;  %v9092_v20 = vpack.c.bf16 %v7762_v50, %v7760_v21 }
 0x83e   :  { %9085 = vmatprep.subr.bf16.mxu0 %v9084_v61 }
 0x840   :  { %7728 = vmatmul.mubr.msk.f32.gmra.mrb[124].mxu0 %vm4596_vm5, %v12504_v36  ;;  %v7766_v36 = vld [vmem:[%s13095_s7 + $0x358] sm:$0xff] }
 0x841   :  { %5571 = vmatprep.mubr.f32.mxu0 %v9779_v30  ;;  %9087 = vmatpush1.bf16.msra.mxu0 %v9086_v18  ;;  %v9096_v52 = vpack.c.bf16 %v7766_v36, %v7764_v29 }
 0x842   :  { %9089 = vmatprep.subr.bf16.mxu0 %v9088_v27 }
 0x844   :  { %7729 = vmatmul.mubr.msk.f32.gmra.mrb[126].mxu0 %vm4596_vm5, %v12526_v53  ;;  %v9098_v53 = vpack.c.bf16 %v7765_v31, %v7763_v15 }
 0x845   :  { %5577 = vmatprep.mubr.f32.mxu0 %v9779_v30  ;;  %9091 = vmatpush1.bf16.msra.mxu0 %v9090_v45 }
 0x846   :  { %9093 = vmatprep.subr.bf16.mxu0 %v9092_v20 }
 0x848   :  { %7730 = vmatmul.mubr.msk.f32.gmra.mrb[128].mxu0 %vm4596_vm5, %v12524_v24  ;;  %v7767_v24 = vld [vmem:[%s13095_s7 + $0x360] sm:$0xf] }
 0x849   :  { %5583 = vmatprep.mubr.f32.mxu0 %v9779_v30  ;;  %9095 = vmatpush1.bf16.msra.mxu0 %v9094_v38 }
 0x84a   :  { %9097 = vmatprep.subr.bf16.mxu0 %v9096_v52 }
 0x84c   :  { %7731 = vmatmul.mubr.msk.f32.gmra.mrb[130].mxu0 %vm4596_vm5, %v12534_v41 }
 0x84d   :  { %5589 = vmatprep.mubr.f32.mxu0 %v9779_v30  ;;  %9099 = vmatpush1.bf16.msra.mxu0 %v9098_v53 }
 0x84e   :  { %7769 = vmatprep.subr.msk.mxu0 %vm4627_vm4, %v7768_v9 }
 0x850   :  { %7732 = vmatmul.mubr.msk.f32.gmra.mrb[132].mxu0 %vm4596_vm5, %v12532_v11  ;;  %v6000_v11 = vld [vmem:[%s13096_s8] sm:$0x3] }
 0x851   :  { %5595 = vmatprep.mubr.f32.mxu0 %v9779_v30  ;;  %7770 = vmatpush1.msk.msra.mxu0 %vm4627_vm4, %v7767_v24  ;;  %v12801_v41 = vrot.slane %v6000_v11, %v3281_v51 }
 0x852   :  { %9200 = vmatprep.subr.bf16.mxu0 %v9778_v0 }
 0x854   :  { %7733 = vmatmul.mubr.msk.f32.gmra.mrb[134].mxu0 %vm4596_vm5, %v12541_v40  ;;  %v12805_v40 = vrot.slane %v6000_v11, %v3285_v17 }
 0x855   :  { %5601 = vmatprep.mubr.f32.mxu0 %v9779_v30 }
 0x858   :  { %7734 = vmatmul.mubr.msk.f32.gmra.mrb[136].mxu0 %vm4596_vm5, %v12539_v6 }
 0x859   :  { %5607 = vmatprep.mubr.f32.mxu0 %v9779_v30 }
 0x85c   :  { %7735 = vmatmul.mubr.msk.f32.gmra.mrb[138].mxu0 %vm4596_vm5, %v12548_v33 }
 0x85d   :  { %5613 = vmatprep.mubr.f32.mxu0 %v9779_v30 }
 0x860   :  { %7736 = vmatmul.mubr.msk.f32.gmra.mrb[140].mxu0 %vm4596_vm5, %v12546_v7 }
 0x861   :  { %5919 = vmatprep.mubr.f32.mxu0 %v9779_v30 }
 0x864   :  { %7771 = vmatmul.mubr.msk.f32.vlgmr.msra.gmra.mrb[122].mxu0 %vm4596_vm5, %v12597_v10 }
 0x865   :  { %5925 = vmatprep.mubr.f32.mxu0 %v9779_v30 }
 0x868   :  { %7772 = vmatmul.mubr.msk.f32.gmra.mrb[124].mxu0 %vm4596_vm5, %v12589_v55 }
 0x869   :  { %5931 = vmatprep.mubr.f32.mxu0 %v9779_v30 }
 0x86c   :  { %7773 = vmatmul.mubr.msk.f32.gmra.mrb[126].mxu0 %vm4596_vm5, %v12616_v47 }
 0x86d   :  { %5937 = vmatprep.mubr.f32.mxu0 %v9779_v30 }
 0x870   :  { %7774 = vmatmul.mubr.msk.f32.gmra.mrb[128].mxu0 %vm4596_vm5, %v12608_v2 }
 0x871   :  { %5943 = vmatprep.mubr.f32.mxu0 %v9779_v30 }
 0x874   :  { %7775 = vmatmul.mubr.msk.f32.gmra.mrb[130].mxu0 %vm4596_vm5, %v12629_v56 }
 0x875   :  { %5949 = vmatprep.mubr.f32.mxu0 %v9779_v30 }
 0x878   :  { %7776 = vmatmul.mubr.msk.f32.gmra.mrb[132].mxu0 %vm4596_vm5, %v12627_v63 }
 0x879   :  { %5955 = vmatprep.mubr.f32.mxu0 %v9779_v30 }
 0x87c   :  { %7777 = vmatmul.mubr.msk.f32.gmra.mrb[134].mxu0 %vm4596_vm5, %v12645_v8 }
 0x87d   :  { %5961 = vmatprep.mubr.f32.mxu0 %v9779_v30 }
 0x880   :  { %7778 = vmatmul.mubr.msk.f32.gmra.mrb[136].mxu0 %vm4596_vm5, %v12634_v34 }
 0x881   :  { %5967 = vmatprep.mubr.f32.mxu0 %v9779_v30 }
 0x884   :  { %7779 = vmatmul.mubr.msk.f32.gmra.mrb[138].mxu0 %vm4596_vm5, %v12656_v16 }
 0x885   :  { %5973 = vmatprep.mubr.f32.mxu0 %v9779_v30 }
 0x888   :  { %7780 = vmatmul.mubr.msk.f32.gmra.mrb[140].mxu0 %vm4596_vm5, %v12654_v62 }
 0x889   :  { %8255 = vmatprep.mubr.msk.f32.mxu0 %vm9780_vm7, %v9779_v30 }
 0x937   :  { %v5921_v6 = vpop.f32.mrb[122].mxu0 }
 0x938   :  { %v5923_v7 = vpop.f32.mrb[123].mxu0  ;;  %v6012_v33 = vadd.f32 %v12801_v41, %v5921_v6 }
 0x939   :  { %v6013_v55 = vadd.f32 %v12805_v40, %v5923_v7 }
 0x93a   :  { %v6032_v42 = vmax.f32 %v6012_v33, 0.0 }
 0x93b   :  { %v5927_v10 = vpop.f32.mrb[124].mxu0  ;;  %v6033_v51 = vmax.f32 %v6013_v55, 0.0 }
 0x93c   :  { %v6014_v1 = vadd.f32 %v12801_v41, %v5927_v10  ;;  %v5929_v23 = vpop.f32.mrb[125].mxu0 }
 0x93d   :  { %v6015_v2 = vadd.f32 %v12805_v40, %v5929_v23 }
 0x93e   :  { %v6034_v59 = vmax.f32 %v6014_v1, 0.0 }
 0x93f   :  { %v6035_v47 = vmax.f32 %v6015_v2, 0.0  ;;  %v5933_v57 = vpop.f32.mrb[126].mxu0 }
 0x940   :  { %v12811_v58 = vpack.c.bf16 %v6034_v59, %v6032_v42  ;;  %v5935_v13 = vpop.f32.mrb[127].mxu0  ;;  %v6016_v14 = vadd.f32 %v12801_v41, %v5933_v57  ;;  %v6056_v57 = vld [vmem:[%s13097_s9 + $0x20] sm:$0xff] }
 0x941   :  { %v12813_v17 = vpack.c.bf16 %v6035_v47, %v6033_v51  ;;  %v6017_v19 = vadd.f32 %v12805_v40, %v5935_v13  ;;  %v6052_v51 = vld [vmem:[%s13097_s9] sm:$0xff]  ;;  %v6055_v47 = vld [vmem:[%s13097_s9 + $0x18] sm:$0xff]  ;;  %v6295_v13 = vld [vmem:[#allocation9 + $0x8] sm:$0xff] }
 0x942   :  { %v6036_v22 = vmax.f32 %v6016_v14, 0.0 }
 0x943   :  { %v5939_v63 = vpop.f32.mrb[128].mxu0  ;;  %9101 = vmatprep.subr.bf16.mxu1 %v12813_v17  ;;  %v6037_v28 = vmax.f32 %v6017_v19, 0.0  ;;  %v6296_v19 = vld [vmem:[#allocation9 + $0x10] sm:$0xff] }
 0x944   :  { %v6018_v56 = vadd.f32 %v12801_v41, %v5939_v63  ;;  %v5941_v35 = vpop.f32.mrb[129].mxu0  ;;  %9103 = vmatpush1.bf16.msra.mxu1 %v12811_v58  ;;  %v6297_v63 = vld [vmem:[#allocation9 + $0x18] sm:$0xff] }
 0x945   :  { %v6019_v34 = vadd.f32 %v12805_v40, %v5941_v35  ;;  %v9144_v35 = vpack.c.bf16 %v6297_v63, %v6296_v19  ;;  %v6426_v19 = vld [vmem:[#allocation9 + $0xd0] sm:$0xff]  ;;  %v6427_v63 = vld [vmem:[#allocation9 + $0xd8] sm:$0xff] }
 0x946   :  { %v6038_v46 = vmax.f32 %v6018_v56, 0.0  ;;  %v7787_v56 = vld [vmem:[%s13097_s9 + $0x30] sm:$0xff] }
 0x947   :  { %v6039_v8 = vmax.f32 %v6019_v34, 0.0  ;;  %v5945_v44 = vpop.f32.mrb[130].mxu0  ;;  %v6298_v34 = vld [vmem:[#allocation9 + $0x20] sm:$0xff] }
 0x948   :  { %v9106_v12 = vpack.c.bf16 %v6038_v46, %v6036_v22  ;;  %v5947_v62 = vpop.f32.mrb[131].mxu0  ;;  %v6020_v32 = vadd.f32 %v12801_v41, %v5945_v44  ;;  %v6299_v22 = vld [vmem:[#allocation9 + $0x28] sm:$0xff]  ;;  %v7788_v46 = vld [vmem:[%s13097_s9 + $0x38] sm:$0xff] }
 0x949   :  { %v9104_v16 = vpack.c.bf16 %v6039_v8, %v6037_v28  ;;  %v6021_v4 = vadd.f32 %v12805_v40, %v5947_v62  ;;  %v9147_v28 = vpack.c.bf16 %v6299_v22, %v6298_v34  ;;  %v6300_v8 = vld [vmem:[#allocation9 + $0x30] sm:$0xff]  ;;  %v6301_v44 = vld [vmem:[#allocation9 + $0x38] sm:$0xff] }
 0x94a   :  { %v6040_v37 = vmax.f32 %v6020_v32, 0.0  ;;  %v9150_v62 = vpack.c.bf16 %v6301_v44, %v6300_v8  ;;  %v6303_v32 = vld [vmem:[#allocation9 + $0x48] sm:$0xff] }
 0x94b   :  { %v5951_v54 = vpop.f32.mrb[132].mxu0  ;;  %9105 = vmatprep.subr.bf16.mxu1 %v9104_v16  ;;  %v6041_v48 = vmax.f32 %v6021_v4, 0.0  ;;  %v7790_v4 = vld [vmem:[%s13097_s9 + $0x48] sm:$0xff] }
 0x94c   :  { %v6022_v60 = vadd.f32 %v12801_v41, %v5951_v54  ;;  %v5953_v3 = vpop.f32.mrb[133].mxu0  ;;  %9107 = vmatpush1.bf16.msra.mxu1 %v9106_v12  ;;  %v6429_v8 = vld [vmem:[#allocation9 + $0xe8] sm:$0xff] }
 0x94d   :  { %v6023_v61 = vadd.f32 %v12805_v40, %v5953_v3  ;;  %v6305_v3 = vld [vmem:[#allocation9 + $0x58] sm:$0xff] }
 0x94e   :  { %v6042_v25 = vmax.f32 %v6022_v60, 0.0  ;;  %v6304_v60 = vld [vmem:[#allocation9 + $0x50] sm:$0xff] }
 0x94f   :  { %v6043_v26 = vmax.f32 %v6023_v61, 0.0  ;;  %v5957_v18 = vpop.f32.mrb[134].mxu0  ;;  %v9156_v61 = vpack.c.bf16 %v6305_v3, %v6304_v60  ;;  %v6432_v3 = vld [vmem:[#allocation9 + $0x100] sm:$0xff] }
 0x950   :  { %v9110_v27 = vpack.c.bf16 %v6042_v25, %v6040_v37  ;;  %v5959_v39 = vpop.f32.mrb[135].mxu0  ;;  %v6024_v21 = vadd.f32 %v12801_v41, %v5957_v18  ;;  %v6306_v37 = vld [vmem:[#allocation9 + $0x60] sm:$0xff]  ;;  %v6307_v25 = vld [vmem:[#allocation9 + $0x68] sm:$0xff]  ;;  %v6309_v18 = vld [vmem:[#allocation9 + $0x78] sm:$0xff] }
 0x951   :  { %v9108_v5 = vpack.c.bf16 %v6043_v26, %v6041_v48  ;;  %v6025_v50 = vadd.f32 %v12805_v40, %v5959_v39  ;;  %v9159_v48 = vpack.c.bf16 %v6307_v25, %v6306_v37  ;;  %v6308_v26 = vld [vmem:[#allocation9 + $0x70] sm:$0xff]  ;;  %v6310_v39 = vld [vmem:[#allocation9 + $0x80] sm:$0xff] }
 0x952   :  { %v6044_v29 = vmax.f32 %v6024_v21, 0.0  ;;  %v6434_v25 = vld [vmem:[#allocation9 + $0x110] sm:$0xff] }
 0x953   :  { %v5963_v45 = vpop.f32.mrb[136].mxu0  ;;  %9109 = vmatprep.subr.bf16.mxu1 %v9108_v5  ;;  %v6045_v38 = vmax.f32 %v6025_v50, 0.0  ;;  %v6312_v50 = vld [vmem:[#allocation9 + $0x90] sm:$0xff] }
 0x954   :  { %v6026_v20 = vadd.f32 %v12801_v41, %v5963_v45  ;;  %v5965_v43 = vpop.f32.mrb[137].mxu0  ;;  %9111 = vmatpush1.bf16.msra.mxu1 %v9110_v27  ;;  %v6313_v45 = vld [vmem:[#allocation9 + $0x98] sm:$0xff] }
 0x955   :  { %v6027_v49 = vadd.f32 %v12805_v40, %v5965_v43 }
 0x956   :  { %v6046_v36 = vmax.f32 %v6026_v20, 0.0  ;;  %v9168_v20 = vpack.c.bf16 %v6313_v45, %v6312_v50  ;;  %v6535_v45 = vld [vmem:[#allocation10] sm:$0xff] }
 0x957   :  { %v6047_v52 = vmax.f32 %v6027_v49, 0.0  ;;  %v5969_v15 = vpop.f32.mrb[138].mxu0 }
 0x958   :  { %v9114_v31 = vpack.c.bf16 %v6046_v36, %v6044_v29  ;;  %v5971_v53 = vpop.f32.mrb[139].mxu0  ;;  %v6028_v24 = vadd.f32 %v12801_v41, %v5969_v15 }
 0x959   :  { %v9112_v9 = vpack.c.bf16 %v6047_v52, %v6045_v38  ;;  %v6029_v11 = vadd.f32 %v12805_v40, %v5971_v53 }
 0x95a   :  { %v6048_v10 = vmax.f32 %v6028_v24, 0.0  ;;  %v6420_v24 = vld [vmem:[#allocation9 + $0xa0] sm:$0xff] }
 0x95b   :  { %v5975_v6 = vpop.f32.mrb[140].mxu0  ;;  %9113 = vmatprep.subr.bf16.mxu1 %v9112_v9  ;;  %v6049_v23 = vmax.f32 %v6029_v11, 0.0  ;;  %v6421_v11 = vld [vmem:[#allocation9 + $0xa8] sm:$0xff] }
 0x95c   :  { %v6030_v7 = vadd.f32 %v12801_v41, %v5975_v6  ;;  %v5977_v33 = vpop.f32.mrb[141].mxu0  ;;  %9115 = vmatpush1.bf16.msra.mxu1 %v9114_v31  ;;  %v6053_v41 = vld [vmem:[%s13097_s9 + $0x8] sm:$0xff] }
 0x95d   :  { %v6031_v55 = vadd.f32 %v12805_v40, %v5977_v33  ;;  %v6054_v40 = vld [vmem:[%s13097_s9 + $0x10] sm:$0xff] }
 0x95e   :  { %v6050_v1 = vmax.f32 %v6030_v7, 0.0 }
 0x95f   :  { %v6051_v2 = vmax.f32 %v6031_v55, 0.0 }
 0x960   :  { %v9118_v42 = vpack.c.bf16 %v6050_v1, %v6048_v10  ;;  %v9171_v10 = vpack.c.bf16 %v6421_v11, %v6420_v24  ;;  %v6422_v1 = vld [vmem:[#allocation9 + $0xb0] sm:$0xff]  ;;  %v6539_v24 = vld [vmem:[#allocation10 + $0x20] sm:$0xff]  ;;  %v6540_v11 = vld [vmem:[#allocation10 + $0x28] sm:$0xff] }
 0x961   :  { %v9116_v59 = vpack.c.bf16 %v6051_v2, %v6049_v23  ;;  %v6423_v23 = vld [vmem:[#allocation9 + $0xb8] sm:$0xff] }
 0x963   :  { %9117 = vmatprep.subr.bf16.mxu1 %v9116_v59 }
 0x964   :  { %9119 = vmatpush1.bf16.msra.mxu1 %v9118_v42 }
 0x965   :  { %9121 = vmatprep.subr.bf16.mxu1 %v12813_v17  ;;  %v7786_v17 = vld [vmem:[%s13097_s9 + $0x28] sm:$0xff] }
 0x967   :  { %7781 = vmatmul.mubr.msk.f32.vlgmr.msra.gmra.mrb[120].mxu1 %vm6057_vm6, %v6052_v51 }
 0x968   :  { %9123 = vmatpush1.bf16.msra.mxu1 %v12811_v58  ;;  %6143 = vmatprep.mubr.f32.mxu1 %v9779_v30  ;;  %v6294_v58 = vld [vmem:[#allocation9] sm:$0xff] }
 0x969   :  { %9125 = vmatprep.subr.bf16.mxu1 %v9104_v16  ;;  %v9141_v14 = vpack.c.bf16 %v6295_v13, %v6294_v58  ;;  %v6302_v16 = vld [vmem:[#allocation9 + $0x40] sm:$0xff] }
 0x96a   :  { %v9153_v54 = vpack.c.bf16 %v6303_v32, %v6302_v16 }
 0x96b   :  { %7782 = vmatmul.mubr.msk.f32.gmra.mrb[122].mxu1 %vm6057_vm6, %v6053_v41  ;;  %v9174_v41 = vpack.c.bf16 %v6423_v23, %v6422_v1  ;;  %v6542_v1 = vld [vmem:[#allocation10 + $0x38] sm:$0xff]  ;;  %v6551_v23 = vld [vmem:[#allocation10 + $0x80] sm:$0xff] }
 0x96c   :  { %9127 = vmatpush1.bf16.msra.mxu1 %v9106_v12  ;;  %6149 = vmatprep.mubr.f32.mxu1 %v9779_v30  ;;  %v7789_v12 = vld [vmem:[%s13097_s9 + $0x40] sm:$0xff] }
 0x96d   :  { %9129 = vmatprep.subr.bf16.mxu1 %v9108_v5  ;;  %v6311_v5 = vld [vmem:[#allocation9 + $0x88] sm:$0xff] }
 0x96e   :  { %v9165_v21 = vpack.c.bf16 %v6311_v5, %v6310_v39  ;;  %v6438_v5 = vld [vmem:[#allocation9 + $0x130] sm:$0xff] }
 0x96f   :  { %7783 = vmatmul.mubr.msk.f32.gmra.mrb[124].mxu1 %vm6057_vm6, %v6054_v40  ;;  %v6424_v40 = vld [vmem:[#allocation9 + $0xc0] sm:$0xff] }
 0x970   :  { %9131 = vmatpush1.bf16.msra.mxu1 %v9110_v27  ;;  %6155 = vmatprep.mubr.f32.mxu1 %v9779_v30  ;;  %v9162_v27 = vpack.c.bf16 %v6309_v18, %v6308_v26  ;;  %v6436_v18 = vld [vmem:[#allocation9 + $0x120] sm:$0xff] }
 0x971   :  { %9133 = vmatprep.subr.bf16.mxu1 %v9112_v9 }
 0x973   :  { %7784 = vmatmul.mubr.msk.f32.gmra.mrb[126].mxu1 %vm6057_vm6, %v6055_v47  ;;  %v6425_v47 = vld [vmem:[#allocation9 + $0xc8] sm:$0xff] }
 0x974   :  { %9135 = vmatpush1.bf16.msra.mxu1 %v9114_v31  ;;  %6161 = vmatprep.mubr.f32.mxu1 %v9779_v30 }
 0x975   :  { %9137 = vmatprep.subr.bf16.mxu1 %v9116_v59 }
 0x977   :  { %7785 = vmatmul.mubr.msk.f32.gmra.mrb[128].mxu1 %vm6057_vm6, %v6056_v57 }
 0x978   :  { %9139 = vmatpush1.bf16.msra.mxu1 %v9118_v42  ;;  %6253 = vmatprep.mubr.f32.mxu1 %v9779_v30 }
 0x979   :  { %9140 = vmatprep.subr.bf16.mxu1 %v9778_v0 }
 0x97b   :  { %7791 = vmatmul.mubr.msk.f32.vlgmr.msra.gmra.mrb[130].mxu1 %vm6057_vm6, %v7786_v17 }
 0x97c   :  { %6259 = vmatprep.mubr.f32.mxu1 %v9779_v30  ;;  %9142 = vmatpush1.bf16.msra.mxu1 %v9141_v14  ;;  %v9177_v14 = vpack.c.bf16 %v6425_v47, %v6424_v40  ;;  %v6553_v47 = vld [vmem:[#allocation10 + $0x90] sm:$0xff] }
 0x97d   :  { %9143 = vmatprep.subr.bf16.mxu1 %v9778_v0 }
 0x97f   :  { %7792 = vmatmul.mubr.msk.f32.gmra.mrb[132].mxu1 %vm6057_vm6, %v7787_v56 }
 0x980   :  { %6265 = vmatprep.mubr.f32.mxu1 %v9779_v30  ;;  %9145 = vmatpush1.bf16.msra.mxu1 %v9144_v35 }
 0x981   :  { %9146 = vmatprep.subr.bf16.mxu1 %v9778_v0 }
 0x983   :  { %7793 = vmatmul.mubr.msk.f32.gmra.mrb[134].mxu1 %vm6057_vm6, %v7788_v46  ;;  %v9180_v46 = vpack.c.bf16 %v6427_v63, %v6426_v19 }
 0x984   :  { %6271 = vmatprep.mubr.f32.mxu1 %v9779_v30  ;;  %9148 = vmatpush1.bf16.msra.mxu1 %v9147_v28  ;;  %v6428_v28 = vld [vmem:[#allocation9 + $0xe0] sm:$0xff] }
 0x985   :  { %9149 = vmatprep.subr.bf16.mxu1 %v9778_v0  ;;  %v9183_v32 = vpack.c.bf16 %v6429_v8, %v6428_v28  ;;  %v6785_v28 = vld [vmem:[#allocation10 + $0xf0] sm:$0xff]  ;;  %v6786_v8 = vld [vmem:[#allocation10 + $0xf8] sm:$0xff] }
 0x987   :  { %7794 = vmatmul.mubr.msk.f32.gmra.mrb[136].mxu1 %vm6057_vm6, %v7789_v12 }
 0x988   :  { %6277 = vmatprep.mubr.f32.mxu1 %v9779_v30  ;;  %9151 = vmatpush1.bf16.msra.mxu1 %v9150_v62 }
 0x989   :  { %9152 = vmatprep.subr.bf16.mxu1 %v9778_v0 }
 0x98b   :  { %7795 = vmatmul.mubr.msk.f32.gmra.mrb[138].mxu1 %vm6057_vm6, %v7790_v4  ;;  %v6430_v4 = vld [vmem:[#allocation9 + $0xf0] sm:$0xff] }
 0x98c   :  { %9154 = vmatpush1.bf16.msra.mxu1 %v9153_v54  ;;  %v6431_v54 = vld [vmem:[#allocation9 + $0xf8] sm:$0xff] }
 0x98d   :  { %9155 = vmatprep.subr.bf16.mxu1 %v9778_v0  ;;  %v9186_v60 = vpack.c.bf16 %v6431_v54, %v6430_v4  ;;  %v6702_v4 = vld [vmem:[#allocation10 + $0xa8] sm:$0xff]  ;;  %v6787_v54 = vld [vmem:[#allocation10 + $0x100] sm:$0xff] }
 0x990   :  { %9157 = vmatpush1.bf16.msra.mxu1 %v9156_v61  ;;  %v6433_v61 = vld [vmem:[#allocation9 + $0x108] sm:$0xff] }
 0x991   :  { %9158 = vmatprep.subr.bf16.mxu1 %v9778_v0  ;;  %v9189_v37 = vpack.c.bf16 %v6433_v61, %v6432_v3 }
 0x994   :  { %9160 = vmatpush1.bf16.msra.mxu1 %v9159_v48  ;;  %v6435_v48 = vld [vmem:[#allocation9 + $0x118] sm:$0xff] }
 0x995   :  { %9161 = vmatprep.subr.bf16.mxu1 %v9778_v0  ;;  %v9192_v26 = vpack.c.bf16 %v6435_v48, %v6434_v25  ;;  %v6703_v25 = vld [vmem:[#allocation10 + $0xb0] sm:$0xff] }
 0x998   :  { %9163 = vmatpush1.bf16.msra.mxu1 %v9162_v27  ;;  %v6437_v27 = vld [vmem:[#allocation9 + $0x128] sm:$0xff] }
 0x999   :  { %9164 = vmatprep.subr.bf16.mxu1 %v9778_v0  ;;  %v9195_v39 = vpack.c.bf16 %v6437_v27, %v6436_v18  ;;  %v6704_v18 = vld [vmem:[#allocation10 + $0xb8] sm:$0xff]  ;;  %v6789_v27 = vld [vmem:[#allocation10 + $0x110] sm:$0xff] }
 0x99c   :  { %9166 = vmatpush1.bf16.msra.mxu1 %v9165_v21  ;;  %v6439_v21 = vld [vmem:[#allocation9 + $0x138] sm:$0xff] }
 0x99d   :  { %9167 = vmatprep.subr.bf16.mxu1 %v9778_v0  ;;  %v9198_v50 = vpack.c.bf16 %v6439_v21, %v6438_v5  ;;  %v9234_v21 = vpack.c.bf16 %v6704_v18, %v6703_v25  ;;  %v6972_v25 = vld [vmem:[%s13101_s13 + $0x50] sm:$0xff]  ;;  %v6974_v18 = vld [vmem:[%s13101_s13 + $0x60] sm:$0xff] }
 0x9a0   :  { %9169 = vmatpush1.bf16.msra.mxu1 %v9168_v20  ;;  %v6536_v20 = vld [vmem:[#allocation10 + $0x8] sm:$0xff] }
 0x9a1   :  { %9170 = vmatprep.subr.bf16.mxu1 %v9778_v0 }
 0xa3a   :  { %v6139_v43 = vpop.f32.mrb[120].mxu1 }
 0xa3b   :  { %v6141_v49 = vpop.f32.mrb[121].mxu1 }
 0xa3e   :  { %v6145_v29 = vpop.f32.mrb[122].mxu1 }
 0xa3f   :  { %v6147_v36 = vpop.f32.mrb[123].mxu1 }
 0xa42   :  { %v6151_v38 = vpop.f32.mrb[124].mxu1 }
 0xa43   :  { %v6153_v52 = vpop.f32.mrb[125].mxu1 }
 0xa46   :  { %v6157_v15 = vpop.f32.mrb[126].mxu1 }
 0xa47   :  { %v6159_v31 = vpop.f32.mrb[127].mxu1 }
 0xa4a   :  { %v6163_v53 = vpop.f32.mrb[128].mxu1 }
 0xa4b   :  { %v6165_v9 = vpop.f32.mrb[129].mxu1 }
 0xa4e   :  { %v6255_v6 = vpop.f32.mrb[130].mxu1 }
 0xa4f   :  { %v12895_v7 = vmax.f32 %v6139_v43, %v6255_v6  ;;  %v6257_v33 = vpop.f32.mrb[131].mxu1  ;;  %v6545_v43 = vld [vmem:[#allocation10 + $0x50] sm:$0xff] }
 0xa50   :  { %v6285_v55 = vmax.f32 %v6141_v49, %v6257_v33  ;;  %v9216_v49 = vpack.c.bf16 %v6536_v20, %v6535_v45  ;;  %v6549_v6 = vld [vmem:[#allocation10 + $0x70] sm:$0xff]  ;;  %v9222_v33 = vpack.c.bf16 %v6540_v11, %v6539_v24  ;;  %v6705_v45 = vld [vmem:[#allocation10 + $0xc0] sm:$0xff]  ;;  %v6708_v24 = vld [vmem:[#allocation10 + $0xd8] sm:$0xff] }
 0xa51   :  { %v6793_v11 = vld [vmem:[#allocation10 + $0x130] sm:$0xff] }
 0xa52   :  { %v6261_v2 = vpop.f32.mrb[132].mxu1  ;;  %7796 = vmatprep.mubr.msk.f32.mxu1 %vm710_vm0, %v6285_v55 }
 0xa53   :  { %v12898_v42 = vmax.f32 %v6145_v29, %v6261_v2  ;;  %v6263_v59 = vpop.f32.mrb[133].mxu1  ;;  %6394 = vmatmul.mubr.f32.vlgmr.msra.gmra.mrb[140].mxu1 %v12895_v7  ;;  %v6546_v29 = vld [vmem:[#allocation10 + $0x58] sm:$0xff]  ;;  %v6552_v2 = vld [vmem:[#allocation10 + $0x88] sm:$0xff] }
 0xa54   :  { %v12901_v51 = vmax.f32 %v6147_v36, %v6263_v59  ;;  %9172 = vmatpush1.bf16.msra.mxu1 %v9171_v10  ;;  %v6537_v36 = vld [vmem:[#allocation10 + $0x10] sm:$0xff]  ;;  %v9210_v59 = vpack.c.bf16 %v6552_v2, %v6551_v23  ;;  %v6709_v23 = vld [vmem:[#allocation10 + $0xe0] sm:$0xff]  ;;  %v6710_v2 = vld [vmem:[#allocation10 + $0xe8] sm:$0xff] }
 0xa55   :  { %9173 = vmatprep.subr.bf16.mxu1 %v9778_v0  ;;  %v6541_v10 = vld [vmem:[#allocation10 + $0x30] sm:$0xff] }
 0xa56   :  { %v6267_v57 = vpop.f32.mrb[134].mxu1  ;;  %7797 = vmatprep.mubr.msk.f32.mxu1 %vm710_vm0, %v12901_v51 }
 0xa57   :  { %v12906_v58 = vmax.f32 %v6151_v38, %v6267_v57  ;;  %v6269_v13 = vpop.f32.mrb[135].mxu1  ;;  %6399 = vmatmul.mubr.f32.gmra.mrb[142].mxu1 %v12898_v42  ;;  %v6538_v38 = vld [vmem:[#allocation10 + $0x18] sm:$0xff] }
 0xa58   :  { %v6289_v17 = vmax.f32 %v6153_v52, %v6269_v13  ;;  %9175 = vmatpush1.bf16.msra.mxu1 %v9174_v41  ;;  %v9201_v52 = vpack.c.bf16 %v6546_v29, %v6545_v43  ;;  %v6544_v41 = vld [vmem:[#allocation10 + $0x48] sm:$0xff]  ;;  %v6554_v57 = vld [vmem:[#allocation10 + $0x98] sm:$0xff]  ;;  %v6791_v29 = vld [vmem:[#allocation10 + $0x120] sm:$0xff] }
 0xa59   :  { %9176 = vmatprep.subr.bf16.mxu1 %v9778_v0 }
 0xa5a   :  { %v6273_v56 = vpop.f32.mrb[136].mxu1  ;;  %7798 = vmatprep.mubr.msk.f32.mxu1 %vm710_vm0, %v6289_v17  ;;  %9202 = vmatpush3.bf16.msra.mxu0 %v9201_v52 }
 0xa5b   :  { %v6290_v35 = vmax.f32 %v6157_v15, %v6273_v56  ;;  %v6275_v34 = vpop.f32.mrb[137].mxu1  ;;  %6404 = vmatmul.mubr.f32.gmra.mrb[144].mxu1 %v12906_v58  ;;  %v6547_v15 = vld [vmem:[#allocation10 + $0x60] sm:$0xff]  ;;  %9203 = vmatprep.subr.bf16.mxu0 %v9778_v0 }
 0xa5c   :  { %v6291_v22 = vmax.f32 %v6159_v31, %v6275_v34  ;;  %9178 = vmatpush1.bf16.msra.mxu1 %v9177_v14  ;;  %v6548_v31 = vld [vmem:[#allocation10 + $0x68] sm:$0xff] }
 0xa5d   :  { %9179 = vmatprep.subr.bf16.mxu1 %v9778_v0 }
 0xa5e   :  { %v6279_v44 = vpop.f32.mrb[138].mxu1  ;;  %7799 = vmatprep.mubr.msk.f32.mxu1 %vm710_vm0, %v6291_v22 }
 0xa5f   :  { %v6292_v12 = vmax.f32 %v6163_v53, %v6279_v44  ;;  %v6281_v62 = vpop.f32.mrb[139].mxu1  ;;  %6409 = vmatmul.mubr.f32.gmra.mrb[146].mxu1 %v6290_v35  ;;  %v9219_v53 = vpack.c.bf16 %v6538_v38, %v6537_v36  ;;  %v6792_v36 = vld [vmem:[#allocation10 + $0x128] sm:$0xff] }
 0xa60   :  { %v6293_v16 = vmax.f32 %v6165_v9, %v6281_v62  ;;  %9181 = vmatpush1.bf16.msra.mxu1 %v9180_v46  ;;  %v9204_v9 = vpack.c.bf16 %v6548_v31, %v6547_v15  ;;  %v6701_v62 = vld [vmem:[#allocation10 + $0xa0] sm:$0xff]  ;;  %v9255_v15 = vpack.c.bf16 %v6792_v36, %v6791_v29  ;;  %v6707_v31 = vld [vmem:[#allocation10 + $0xd0] sm:$0xff]  ;;  %v7064_v36 = vld [vmem:[%s13103_s15 + $0x28] sm:$0xff] }
 0xa61   :  { %9182 = vmatprep.subr.bf16.mxu1 %v9778_v0  ;;  %v9231_v61 = vpack.c.bf16 %v6702_v4, %v6701_v62  ;;  %v6966_v62 = vld [vmem:[%s13101_s13 + $0x20] sm:$0xff]  ;;  %v6968_v4 = vld [vmem:[%s13101_s13 + $0x30] sm:$0xff] }
 0xa62   :  { %7800 = vmatprep.mubr.msk.f32.mxu1 %vm710_vm0, %v6293_v16  ;;  %9205 = vmatpush3.bf16.msra.mxu0 %v9204_v9  ;;  %v7063_v29 = vld [vmem:[%s13103_s15 + $0x20] sm:$0xff] }
 0xa63   :  { %6414 = vmatmul.mubr.f32.gmra.mrb[148].mxu1 %v6292_v12  ;;  %9206 = vmatprep.subr.bf16.mxu0 %v9778_v0 }
 0xa64   :  { %9184 = vmatpush1.bf16.msra.mxu1 %v9183_v32  ;;  %7801 = vmatprep.mubr.msk.f32.mxu1 %vm710_vm0, %v6285_v55 }
 0xa65   :  { %9185 = vmatprep.subr.bf16.mxu1 %v9778_v0 }
 0xa68   :  { %9187 = vmatpush1.bf16.msra.mxu1 %v9186_v60  ;;  %v6788_v60 = vld [vmem:[#allocation10 + $0x108] sm:$0xff] }
 0xa69   :  { %9188 = vmatprep.subr.bf16.mxu1 %v9778_v0 }
 0xa6c   :  { %9190 = vmatpush1.bf16.msra.mxu1 %v9189_v37  ;;  %v9249_v37 = vpack.c.bf16 %v6788_v60, %v6787_v54  ;;  %v6969_v54 = vld [vmem:[%s13101_s13 + $0x38] sm:$0xff] }
 0xa6d   :  { %9191 = vmatprep.subr.bf16.mxu1 %v9778_v0  ;;  %v9285_v60 = vpack.c.bf16 %v6969_v54, %v6968_v4 }
 0xa70   :  { %9193 = vmatpush1.bf16.msra.mxu1 %v9192_v26 }
 0xa71   :  { %9194 = vmatprep.subr.bf16.mxu1 %v9778_v0 }
 0xa74   :  { %9196 = vmatpush1.bf16.msra.mxu1 %v9195_v39  ;;  %v6790_v39 = vld [vmem:[#allocation10 + $0x118] sm:$0xff] }
 0xa75   :  { %9197 = vmatprep.subr.bf16.mxu1 %v9778_v0 }
 0xa78   :  { %9199 = vmatpush1.bf16.msra.mxu1 %v9198_v50  ;;  %v9252_v50 = vpack.c.bf16 %v6790_v39, %v6789_v27  ;;  %v6975_v27 = vld [vmem:[%s13101_s13 + $0x68] sm:$0xff] }
 0xa79   :  { %9215 = vmatprep.subr.bf16.mxu1 %v9778_v0  ;;  %v9294_v39 = vpack.c.bf16 %v6975_v27, %v6974_v18 }
 0xa7b   :  { %6505 = vmatmul.mubr.f32.vlgmr.msra.gmra.mrb[150].mxu1 %v12895_v7  ;;  %v6550_v7 = vld [vmem:[#allocation10 + $0x78] sm:$0xff] }
 0xa7c   :  { %7802 = vmatprep.mubr.msk.f32.mxu1 %vm710_vm0, %v12901_v51  ;;  %9217 = vmatpush3.bf16.msra.mxu1 %v9216_v49  ;;  %v9207_v55 = vpack.c.bf16 %v6550_v7, %v6549_v6  ;;  %v6543_v51 = vld [vmem:[#allocation10 + $0x40] sm:$0xff]  ;;  %v6706_v49 = vld [vmem:[#allocation10 + $0xc8] sm:$0xff]  ;;  %v6794_v6 = vld [vmem:[#allocation10 + $0x138] sm:$0xff] }
 0xa7d   :  { %9218 = vmatprep.subr.bf16.mxu1 %v9778_v0  ;;  %v9228_v40 = vpack.c.bf16 %v6544_v41, %v6543_v51  ;;  %v9237_v52 = vpack.c.bf16 %v6706_v49, %v6705_v45  ;;  %v6870_v51 = vld [vmem:[#allocation10 + $0x148] sm:$0xff]  ;;  %v7061_v45 = vld [vmem:[%s13103_s15 + $0x10] sm:$0xff] }
 0xa7e   :  { %9208 = vmatpush3.bf16.msra.mxu0 %v9207_v55  ;;  %v9258_v55 = vpack.c.bf16 %v6794_v6, %v6793_v11 }
 0xa7f   :  { %6510 = vmatmul.mubr.f32.gmra.mrb[152].mxu1 %v12898_v42  ;;  %v9225_v42 = vpack.c.bf16 %v6542_v1, %v6541_v10  ;;  %9209 = vmatprep.subr.bf16.mxu0 %v9778_v0 }
 0xa80   :  { %7803 = vmatprep.mubr.msk.f32.mxu1 %vm710_vm0, %v6289_v17  ;;  %9220 = vmatpush3.bf16.msra.mxu1 %v9219_v53 }
 0xa81   :  { %9221 = vmatprep.subr.bf16.mxu1 %v9778_v0 }
 0xa82   :  { %9211 = vmatpush3.bf16.msra.mxu0 %v9210_v59  ;;  %v6869_v59 = vld [vmem:[#allocation10 + $0x140] sm:$0xff] }
 0xa83   :  { %6515 = vmatmul.mubr.f32.gmra.mrb[154].mxu1 %v12906_v58  ;;  %9212 = vmatprep.subr.bf16.mxu0 %v9778_v0  ;;  %v9213_v58 = vpack.c.bf16 %v6554_v57, %v6553_v47  ;;  %v9261_v41 = vpack.c.bf16 %v6870_v51, %v6869_v59  ;;  %v6872_v47 = vld [vmem:[#allocation10 + $0x158] sm:$0xff] }
 0xa84   :  { %7804 = vmatprep.mubr.msk.f32.mxu1 %vm710_vm0, %v6291_v22  ;;  %9223 = vmatpush3.bf16.msra.mxu1 %v9222_v33  ;;  %v9240_v33 = vpack.c.bf16 %v6708_v24, %v6707_v31 }
 0xa85   :  { %9224 = vmatprep.subr.bf16.mxu1 %v9778_v0 }
 0xa86   :  { %9214 = vmatpush3.bf16.msra.mxu0 %v9213_v58  ;;  %v6873_v58 = vld [vmem:[#allocation10 + $0x160] sm:$0xff] }
 0xa87   :  { %6520 = vmatmul.mubr.f32.gmra.mrb[156].mxu1 %v6290_v35  ;;  %9230 = vmatprep.subr.bf16.mxu0 %v9778_v0 }
 0xa88   :  { %7805 = vmatprep.mubr.msk.f32.mxu1 %vm710_vm0, %v6293_v16  ;;  %9226 = vmatpush3.bf16.msra.mxu1 %v9225_v42  ;;  %v9243_v42 = vpack.c.bf16 %v6710_v2, %v6709_v23 }
 0xa89   :  { %9227 = vmatprep.subr.bf16.mxu1 %v9778_v0 }
 0xa8b   :  { %6525 = vmatmul.mubr.f32.gmra.mrb[158].mxu1 %v6292_v12  ;;  %v9246_v12 = vpack.c.bf16 %v6786_v8, %v6785_v28  ;;  %v6964_v8 = vld [vmem:[%s13101_s13 + $0x10] sm:$0xff] }
 0xa8c   :  { %9229 = vmatpush3.bf16.msra.mxu1 %v9228_v40  ;;  %8278 = vmatprep.mubr.msk.f32.mxu1 %vm9780_vm7, %v9779_v30  ;;  %v6871_v40 = vld [vmem:[#allocation10 + $0x150] sm:$0xff] }
 0xa8d   :  { %9245 = vmatprep.subr.bf16.mxu1 %v9778_v0  ;;  %v9264_v57 = vpack.c.bf16 %v6872_v47, %v6871_v40  ;;  %v7067_v40 = vld [vmem:[%s13103_s15 + $0x40] sm:$0xff]  ;;  %v7068_v47 = vld [vmem:[%s13103_s15 + $0x48] sm:$0xff] }
 0xb26   :  { %v6395_v13 = vpop.f32.mrb[140].mxu1 }
 0xb27   :  { %v6397_v17 = vpop.f32.mrb[141].mxu1 }
 0xb2a   :  { %v6400_v14 = vpop.f32.mrb[142].mxu1 }
 0xb2b   :  { %v6402_v19 = vpop.f32.mrb[143].mxu1 }
 0xb2c   :  { %v6876_v19 = vld [vmem:[#allocation10 + $0x178] sm:$0xff] }
 0xb2e   :  { %v12945_v63 = vpop.f32.mrb[144].mxu1 }
 0xb2f   :  { %v6407_v56 = vpop.f32.mrb[145].mxu1 }
 0xb30   :  { %v6877_v56 = vld [vmem:[#allocation10 + $0x180] sm:$0xff] }
 0xb32   :  { %v12947_v35 = vpop.f32.mrb[146].mxu1 }
 0xb33   :  { %v6412_v34 = vpop.f32.mrb[147].mxu1 }
 0xb36   :  { %v12949_v22 = vpop.f32.mrb[148].mxu1 }
 0xb37   :  { %v6417_v46 = vpop.f32.mrb[149].mxu1 }
 0xb38   :  { %v6963_v46 = vld [vmem:[%s13101_s13 + $0x8] sm:$0xff] }
 0xb4e   :  { %v6506_v44 = vpop.f32.mrb[150].mxu1 }
 0xb4f   :  { %v6530_v16 = vmax.f32 %v6395_v13, %v6506_v44  ;;  %v6508_v32 = vpop.f32.mrb[151].mxu1  ;;  %v6874_v13 = vld [vmem:[#allocation10 + $0x168] sm:$0xff]  ;;  %v6965_v44 = vld [vmem:[%s13101_s13 + $0x18] sm:$0xff] }
 0xb50   :  { %v9267_v17 = vpack.c.bf16 %v6874_v13, %v6873_v58  ;;  %v7069_v58 = vld [vmem:[%s13103_s15 + $0x50] sm:$0xf]  ;;  %v7812_v13 = vld [vmem:[%s13102_s14] ss:$0 sm:$0xff] }
 0xb51   :  { %8279 = vmatmul.mubr.msk.f32.vlgmr.msra.gmra.mrb[160].mxu1 %vm6057_vm6, %v6530_v16  ;;  %v6967_v16 = vld [vmem:[%s13101_s13 + $0x28] sm:$0xff] }
 0xb52   :  { %9247 = vmatpush3.bf16.msra.mxu1 %v9246_v12  ;;  %v6511_v3 = vpop.f32.mrb[152].mxu1  ;;  %8324 = vmatprep.mubr.msk.f32.mxu1 %vm9780_vm7, %v9779_v30  ;;  %v9279_v12 = vpack.c.bf16 %v6965_v44, %v6964_v8  ;;  %v9282_v32 = vpack.c.bf16 %v6967_v16, %v6966_v62 }
 0xb53   :  { %v6531_v48 = vmax.f32 %v6400_v14, %v6511_v3  ;;  %v6513_v26 = vpop.f32.mrb[153].mxu1  ;;  %9248 = vmatprep.subr.bf16.mxu1 %v9778_v0  ;;  %v6875_v14 = vld [vmem:[#allocation10 + $0x170] sm:$0xff]  ;;  %v6970_v3 = vld [vmem:[%s13101_s13 + $0x40] sm:$0xff] }
 0xb55   :  { %8256 = vmatmul.mubr.msk.f32.vlgmr.msra.gmra.mrb[142].mxu0 %vm6057_vm6, %v6531_v48  ;;  %v6973_v48 = vld [vmem:[%s13101_s13 + $0x58] sm:$0xff] }
 0xb56   :  { %9232 = vmatpush3.bf16.msra.mxu0 %v9231_v61  ;;  %9250 = vmatpush3.bf16.msra.mxu1 %v9249_v37  ;;  %v6516_v5 = vpop.f32.mrb[154].mxu1  ;;  %v6971_v61 = vld [vmem:[%s13101_s13 + $0x48] sm:$0xff]  ;;  %v9291_v26 = vpack.c.bf16 %v6973_v48, %v6972_v25 }
 0xb57   :  { %v6532_v20 = vmax.f32 %v12945_v63, %v6516_v5  ;;  %v6518_v43 = vpop.f32.mrb[155].mxu1  ;;  %9233 = vmatprep.subr.bf16.mxu0 %v9778_v0  ;;  %9251 = vmatprep.subr.bf16.mxu1 %v9778_v0  ;;  %v9270_v63 = vpack.c.bf16 %v6876_v19, %v6875_v14  ;;  %v9288_v37 = vpack.c.bf16 %v6971_v61, %v6970_v3  ;;  %v6976_v5 = vld [vmem:[%s13101_s13 + $0x70] sm:$0xff] }
 0xb58   :  { %8301 = vmatprep.mubr.msk.f32.mxu0 %vm9780_vm7, %v9779_v30  ;;  %v7062_v43 = vld [vmem:[%s13103_s15 + $0x18] sm:$0xff] }
 0xb59   :  { %v9300_v49 = vpack.c.bf16 %v7062_v43, %v7061_v45 }
 0xb5a   :  { %9235 = vmatpush3.bf16.msra.mxu0 %v9234_v21  ;;  %9253 = vmatpush3.bf16.msra.mxu1 %v9252_v50  ;;  %v6521_v38 = vpop.f32.mrb[156].mxu1  ;;  %v7059_v21 = vld [vmem:[%s13103_s15] sm:$0xff]  ;;  %v7060_v50 = vld [vmem:[%s13103_s15 + $0x8] sm:$0xff] }
 0xb5b   :  { %v6533_v53 = vmax.f32 %v12947_v35, %v6521_v38  ;;  %v6523_v9 = vpop.f32.mrb[157].mxu1  ;;  %9236 = vmatprep.subr.bf16.mxu0 %v9778_v0  ;;  %9254 = vmatprep.subr.bf16.mxu1 %v9778_v0  ;;  %v6878_v35 = vld [vmem:[#allocation10 + $0x188] sm:$0xff]  ;;  %v9303_v38 = vpack.c.bf16 %v7064_v36, %v7063_v29 }
 0xb5c   :  { %v9273_v34 = vpack.c.bf16 %v6878_v35, %v6877_v56 }
 0xb5e   :  { %9238 = vmatpush3.bf16.msra.mxu0 %v9237_v52  ;;  %9256 = vmatpush3.bf16.msra.mxu1 %v9255_v15  ;;  %v6526_v7 = vpop.f32.mrb[158].mxu1  ;;  %v7065_v52 = vld [vmem:[%s13103_s15 + $0x30] sm:$0xff]  ;;  %v7066_v15 = vld [vmem:[%s13103_s15 + $0x38] sm:$0xff] }
 0xb5f   :  { %v6534_v10 = vmax.f32 %v12949_v22, %v6526_v7  ;;  %v6528_v1 = vpop.f32.mrb[159].mxu1  ;;  %9239 = vmatprep.subr.bf16.mxu0 %v9778_v0  ;;  %9257 = vmatprep.subr.bf16.mxu1 %v9778_v0  ;;  %v6962_v22 = vld [vmem:[%s13101_s13] sm:$0xff]  ;;  %v9306_v31 = vpack.c.bf16 %v7066_v15, %v7065_v52 }
 0xb60   :  { %v9276_v28 = vpack.c.bf16 %v6963_v46, %v6962_v22 }
 0xb62   :  { %9241 = vmatpush3.bf16.msra.mxu0 %v9240_v33  ;;  %9259 = vmatpush3.bf16.msra.mxu1 %v9258_v55 }
 0xb63   :  { %9242 = vmatprep.subr.bf16.mxu0 %v9778_v0  ;;  %9275 = vmatprep.subr.bf16.mxu1 %v9778_v0 }
 0xb65   :  { %8325 = vmatmul.mubr.msk.f32.vlgmr.msra.gmra.mrb[162].mxu1 %vm6057_vm6, %v6533_v53 }
 0xb66   :  { %9244 = vmatpush3.bf16.msra.mxu0 %v9243_v42  ;;  %8380 = vmatprep.mubr.msk.f32.mxu1 %vm9780_vm7, %v9779_v30  ;;  %v7811_v42 = vld [vmem:[%s13100_s12] ss:$0 sm:$0xff] }
 0xb67   :  { %9260 = vmatprep.subr.bf16.mxu0 %v9778_v0  ;;  %9277 = vmatpush3.bf16.msra.mxu1 %v9276_v28 }
 0xb68   :  { %9278 = vmatprep.subr.bf16.mxu1 %v9778_v0 }
 0xb69   :  { %8302 = vmatmul.mubr.msk.f32.vlgmr.msra.gmra.mrb[144].mxu0 %vm6057_vm6, %v6532_v20  ;;  %v9297_v20 = vpack.c.bf16 %v7060_v50, %v7059_v21 }
 0xb6a   :  { %9262 = vmatpush3.bf16.msra.mxu0 %v9261_v41  ;;  %8347 = vmatprep.mubr.msk.f32.mxu0 %vm9780_vm7, %v9779_v30 }
 0xb6b   :  { %9263 = vmatprep.subr.bf16.mxu0 %v9778_v0  ;;  %9280 = vmatpush3.bf16.msra.mxu1 %v9279_v12 }
 0xb6c   :  { %9281 = vmatprep.subr.bf16.mxu1 %v9778_v0 }
 0xb6e   :  { %9265 = vmatpush3.bf16.msra.mxu0 %v9264_v57  ;;  %v9309_v57 = vpack.c.bf16 %v7068_v47, %v7067_v40 }
 0xb6f   :  { %9266 = vmatprep.subr.bf16.mxu0 %v9778_v0  ;;  %9283 = vmatpush3.bf16.msra.mxu1 %v9282_v32 }
 0xb70   :  { %9284 = vmatprep.subr.bf16.mxu1 %v9778_v0 }
 0xb72   :  { %9268 = vmatpush3.bf16.msra.mxu0 %v9267_v17 }
 0xb73   :  { %9269 = vmatprep.subr.bf16.mxu0 %v9778_v0  ;;  %9286 = vmatpush3.bf16.msra.mxu1 %v9285_v60 }
 0xb74   :  { %9287 = vmatprep.subr.bf16.mxu1 %v9778_v0 }
 0xb76   :  { %9271 = vmatpush3.bf16.msra.mxu0 %v9270_v63 }
 0xb77   :  { %9272 = vmatprep.subr.bf16.mxu0 %v9778_v0  ;;  %9289 = vmatpush3.bf16.msra.mxu1 %v9288_v37 }
 0xb78   :  { %9290 = vmatprep.subr.bf16.mxu1 %v9778_v0 }
 0xb7a   :  { %9274 = vmatpush3.bf16.msra.mxu0 %v9273_v34 }
 0xb7b   :  { %9296 = vmatprep.subr.bf16.mxu0 %v9778_v0  ;;  %9292 = vmatpush3.bf16.msra.mxu1 %v9291_v26 }
 0xb7c   :  { %9293 = vmatprep.subr.bf16.mxu1 %v9778_v0 }
 0xb7d   :  { %8348 = vmatmul.mubr.msk.f32.vlgmr.msra.gmra.mrb[146].mxu0 %vm6057_vm6, %v6534_v10 }
 0xb7e   :  { %8405 = vmatprep.mubr.msk.f32.mxu0 %vm9780_vm7, %v9779_v30  ;;  %9298 = vmatpush3.bf16.msra.mxu0 %v9297_v20 }
 0xb7f   :  { %9295 = vmatpush3.bf16.msra.mxu1 %v9294_v39  ;;  %9299 = vmatprep.subr.bf16.mxu0 %v9778_v0 }
 0xb80   :  { %8378 = vmatprep.subr.mxu1 %v9779_v30 }
 0xb82   :  { %9301 = vmatpush3.bf16.msra.mxu0 %v9300_v49 }
 0xb83   :  { %8379 = vmatpush3.msra.mxu1 %v6976_v5  ;;  %9302 = vmatprep.subr.bf16.mxu0 %v9778_v0 }
 0xb86   :  { %9304 = vmatpush3.bf16.msra.mxu0 %v9303_v38 }
 0xb87   :  { %9305 = vmatprep.subr.bf16.mxu0 %v9778_v0 }
 0xb8a   :  { %9307 = vmatpush3.bf16.msra.mxu0 %v9306_v31 }
 0xb8b   :  { %9308 = vmatprep.subr.bf16.mxu0 %v9778_v0 }
 0xb8e   :  { %9310 = vmatpush3.bf16.msra.mxu0 %v9309_v57 }
 0xb8f   :  { %8403 = vmatprep.subr.mxu0 %v9779_v30  ;;  %v7814_v30 = vld [vmem:[%s13104_s16] ss:$0 sm:$0xff] }
 0xb92   :  { %8404 = vmatpush3.msk.msra.mxu0 %vm4627_vm4, %v7069_v58 }
 0xc24   :  { %v6697_v53 = vpop.f32.mrb[160].mxu1 }
 0xc25   :  { %v8280_v9 = vpop.f32.mrb[161].mxu1 }
 0xc28   :  { %v6624_v24 = vpop.f32.mrb[142].mxu0 }
 0xc29   :  { %v6698_v11 = vadd.f32 %v6697_v53, %v6624_v24  ;;  %v8257_v6 = vpop.f32.mrb[143].mxu0 }
 0xc38   :  { %v6864_v7 = vpop.f32.mrb[162].mxu1 }
 0xc39   :  { %v8326_v33 = vpop.f32.mrb[163].mxu1 }
 0xc3c   :  { %v6780_v55 = vpop.f32.mrb[144].mxu0 }
 0xc3d   :  { %v6784_v10 = vadd.f32 %v6780_v55, %v6698_v11  ;;  %v8303_v1 = vpop.f32.mrb[145].mxu0 }
 0xc3f   :  { %v6868_v23 = vadd.f32 %v6864_v7, %v6784_v10 }
 0xc50   :  { %v6948_v2 = vpop.f32.mrb[146].mxu0 }
 0xc51   :  { %v6952_v59 = vadd.f32 %v6948_v2, %v6868_v23  ;;  %v8349_v51 = vpop.f32.mrb[147].mxu0 }
 0xc53   :  { %v6960_v41 = vadd.f32 %v7811_v42, %v6952_v59 }
 0xc55   :  { %v6961_v0 = vmax.f32 %v6960_v41, 0.0 }
 0xc57   :  { %8381 = vmatmul.mubr.msk.f32.vlgmr.msra.gmra.mrb[164].mxu1 %vm6984_vm8, %v6961_v0 }
 0xd2a   :  { %v7054_v17 = vpop.f32.mrb[164].mxu1 }
 0xd2b   :  { %v7055_v14 = vadd.f32 %v7812_v13, %v7054_v17  ;;  %v8382_v19 = vpop.f32.mrb[165].mxu1 }
 0xd2d   :  { %v7058_v63 = vmax.f32 %v7055_v14, 0.0 }
 0xd2f   :  { %8406 = vmatmul.mubr.msk.f32.vlgmr.msra.gmra.mrb[148].mxu0 %vm4596_vm5, %v7058_v63 }
 0xe02   :  { %v7149_v56 = vpop.f32.mrb[148].mxu0 }
 0xe03   :  { %v7150_v35 = vadd.f32 %v7814_v30, %v7149_v56  ;;  %v8407_v34 = vpop.f32.mrb[149].mxu0 }
 0xe05   :  { %7154 = vst.msk [vmem:[%s13113_s0] sm:$0xff] %vm7153_vm9, %v7150_v35 }
 0xe06   :  { %7159 = vsyncpa [#allocation3], 1 }
 0xe07   :  { %7160 = vsyncpa [#allocation5], 1 }
 0xe08   :  { %7161 = vsyncpa [#allocation8], 1 }
 0xe09   :  { %7162 = vsyncpa [#allocation11], 1 }

</bundles_post_ra>
